<compile_context>
chip_gen: v6e
topology: v6e:2x2x1
jax: 0.10.0
libtpu: 0.0.40
codegen_flags: <defaults>
</compile_context>

<pallas_src>
import jax
import jax.numpy as jnp
from jax.experimental import pallas as pl
from jax.experimental.pallas import tpu as pltpu

LEAK = 0.2
_MIN_TILE = 16  # sublane/packing-friendly minimum batch tile


def _round_up(x, m):
    return ((x + m - 1) // m) * m


def _leaky_relu(x):
    # mul + max (2 VALU ops/elem) instead of cmp + select + mul (3).
    # Identical to where(x > 0, x, LEAK * x) for 0 < LEAK < 1.
    return jnp.maximum(x, LEAK * x)


def discriminator_kernel(x_ref,
                         w1_ref, b1_ref,
                         w2_ref, b2_ref,
                         w3_ref, b3_ref,
                         w4_ref, b4_ref,
                         o_ref):
    # In-kernel f32 -> bf16 cast of the activation tile (VPU). Ingesting f32
    # avoids a separate XLA cast pass over x in HBM.
    x = x_ref[...].astype(jnp.bfloat16)

    # Layer 1: (T, S*S)bf16 @ (S*S, 1024)bf16 -> f32 acc; bias + LeakyReLU in f32.
    h = jnp.dot(x, w1_ref[...], preferred_element_type=jnp.float32)
    h = _leaky_relu(h + b1_ref[...])
    # Dropout(0.3) = identity (eval mode).

    # Layer 2: (T, 1024) @ (1024, 512)
    h = jnp.dot(h.astype(jnp.bfloat16), w2_ref[...],
                preferred_element_type=jnp.float32)
    h = _leaky_relu(h + b2_ref[...])

    # Layer 3: (T, 512) @ (512, 256)
    h = jnp.dot(h.astype(jnp.bfloat16), w3_ref[...],
                preferred_element_type=jnp.float32)
    h = _leaky_relu(h + b3_ref[...])

    # Layer 4 (out_features=1, no activation): VPU multiply + XLU lane-reduce
    # instead of a (256, 1) MXU matmul. Narrow (T, 1) column writeback: 4 B per
    # score instead of a 128-lane broadcast slab.
    score = jnp.sum(h * w4_ref[...], axis=-1, keepdims=True) + b4_ref[...]
    o_ref[...] = score.astype(o_ref.dtype)


def discriminator_forward(x_nchw, params, tile_n=512, vmem_limit_bytes=48 << 20):
    """x_nchw: (N, 1, S, S) float32. Returns (N, 1) f32 critic scores."""
    n = x_nchw.shape[0]
    # Flatten(1, -1) — same row-major flatten as PyTorch. Keep f32; the bf16
    # cast happens inside the kernel on the VPU.
    x = x_nchw.reshape(n, -1).astype(jnp.float32)
    in_features = x.shape[1]

    # ---- batch tile selection -------------------------------------------------
    tile_n = max(_MIN_TILE, min(tile_n, _round_up(n, _MIN_TILE)))
    if n >= 2 * _MIN_TILE:
        # Keep >= 2 grid steps once the batch allows it, so
        # dimension_semantics=("parallel",) can shard tiles across both v7x TCs.
        half = _round_up((n + 1) // 2, _MIN_TILE)
        tile_n = min(tile_n, half)
    n_pad = _round_up(n, tile_n)
    if n_pad != n:
        # TODO(synk): handle the ragged last tile in-kernel instead of padding.
        x = jnp.pad(x, ((0, n_pad - n), (0, 0)))

    (w1, b1), (w2, b2), (w3, b3), (w4, b4) = params
    w1b = w1.astype(jnp.bfloat16)
    w2b = w2.astype(jnp.bfloat16)
    w3b = w3.astype(jnp.bfloat16)
    w4_row = w4.reshape(1, -1).astype(jnp.float32)   # (1, 256), stays f32 (VPU)

    grid = (n_pad // tile_n,)

    flops = 2 * n_pad * (in_features * 1024 + 1024 * 512 + 512 * 256 + 256)
    bytes_accessed = (
        x.size * 4
        + (w1b.size + w2b.size + w3b.size) * 2
        + (b1.size + b2.size + b3.size + w4_row.size + b4.size) * 4
        + n_pad * 4
    )

    def run(single_buffer_weights):
        if single_buffer_weights:
            # Constant-index blocks are only DMA'd once; single-buffer them so
            # resident weights don't pay 2x VMEM (matters for large img_size).
            def resident(arr):
                return pl.BlockSpec(arr.shape, lambda i: (0, 0),
                                    pipeline_mode=pl.Buffered(1))
        else:
            def resident(arr):
                return pl.BlockSpec(arr.shape, lambda i: (0, 0))

        in_specs = [
            # Activations: tiled over the batch grid axis; feature dim
            # full-extent (so S*S not a multiple of 128, e.g. 784, is legal).
            pl.BlockSpec((tile_n, in_features), lambda i: (i, 0)),
            resident(w1b), resident(b1),
            resident(w2b), resident(b2),
            resident(w3b), resident(b3),
            resident(w4_row), resident(b4),
        ]
        # Narrow column output: last block dim (1) equals the full array dim.
        out_specs = pl.BlockSpec((tile_n, 1), lambda i: (i, 0))

        return pl.pallas_call(
            discriminator_kernel,
            out_shape=jax.ShapeDtypeStruct((n_pad, 1), jnp.float32),
            grid=grid,
            in_specs=in_specs,
            out_specs=out_specs,
            compiler_params=pltpu.CompilerParams(
                dimension_semantics=("parallel",),   # v7x: batch tiles over 2 TCs
                vmem_limit_bytes=vmem_limit_bytes,   # 48 MiB fits v7x's 64 MiB VMEM
            ),
            cost_estimate=pl.CostEstimate(
                flops=flops, transcendentals=0, bytes_accessed=bytes_accessed),
        )(x, w1b, b1, w2b, b2, w3b, b3, w4_row, b4)

    try:
        out = run(single_buffer_weights=True)
    except Exception:
        # Some Mosaic builds reject pipeline_mode=pl.Buffered(1) on the
        # pallas_call pipeline; fall back to default double-buffered residents.
        out = run(single_buffer_weights=False)

    return out[:n]


def init_params(key, in_features):
    """Deterministic init mirroring PyTorch nn.Linear default:
       U(-1/sqrt(fan_in), 1/sqrt(fan_in)) for both weight and bias.
       Weights stored as (in, out), f32 master copies."""
    dims = [in_features, 1024, 512, 256, 1]
    params = []
    for i in range(4):
        fan_in, fan_out = dims[i], dims[i + 1]
        key, kw, kb = jax.random.split(key, 3)
        bound = 1.0 / (fan_in ** 0.5)
        w = jax.random.uniform(kw, (fan_in, fan_out), jnp.float32, -bound, bound)
        # biases as (1, fan_out) so they broadcast cleanly inside the kernel
        b = jax.random.uniform(kb, (1, fan_out), jnp.float32, -bound, bound)
        params.append((w, b))
    return params


def reference_forward(x_nchw, params):
    """Pure-JAX reference matching the kernel's bf16-operand / f32-accumulate path."""
    x = x_nchw.reshape(x_nchw.shape[0], -1).astype(jnp.bfloat16)
    (w1, b1), (w2, b2), (w3, b3), (w4, b4) = params
    h = jnp.dot(x, w1.astype(jnp.bfloat16), preferred_element_type=jnp.float32)
    h = _leaky_relu(h + b1)
    h = jnp.dot(h.astype(jnp.bfloat16), w2.astype(jnp.bfloat16),
                preferred_element_type=jnp.float32)
    h = _leaky_relu(h + b2)
    h = jnp.dot(h.astype(jnp.bfloat16), w3.astype(jnp.bfloat16),
                preferred_element_type=jnp.float32)
    h = _leaky_relu(h + b3)
    return jnp.sum(h * w4.reshape(1, -1), axis=-1, keepdims=True) + b4


if __name__ == "__main__":
    # Module is only consistent when n_ch == 1 (Linear expects img_size**2 feats).
    batch, n_ch, img_size = 2, 1, 16

    key = jax.random.PRNGKey(0)
    k_x, k_p = jax.random.split(key)
    x = jax.random.normal(k_x, (batch, n_ch, img_size, img_size), jnp.float32)
    params = init_params(k_p, img_size * img_size)

    out = discriminator_forward(x, params)
    out = jax.block_until_ready(out)

    ref = reference_forward(x, params)
    assert out.shape == (batch, 1), out.shape
    assert jnp.allclose(out, ref, atol=1e-3, rtol=1e-3), (out, ref)

    print("KERNEL_OK")
</pallas_src>

<mosaic_0001>
module attributes {stable_mosaic.version = 11 : i64} {
  func.func @discriminator_kernel(%arg0: i32, %arg1: memref<16x256xf32, #tpu.memory_space<vmem>>, %arg2: memref<256x1024xbf16, #tpu.memory_space<vmem>>, %arg3: memref<1x1024xf32, #tpu.memory_space<vmem>>, %arg4: memref<1024x512xbf16, #tpu.memory_space<vmem>>, %arg5: memref<1x512xf32, #tpu.memory_space<vmem>>, %arg6: memref<512x256xbf16, #tpu.memory_space<vmem>>, %arg7: memref<1x256xf32, #tpu.memory_space<vmem>>, %arg8: memref<1x256xf32, #tpu.memory_space<vmem>>, %arg9: memref<1x1xf32, #tpu.memory_space<vmem>>, %arg10: memref<16x1xf32, #tpu.memory_space<vmem>>) attributes {dimension_semantics = [#tpu.dimension_semantics<parallel>], iteration_bounds = array<i64: 1>, scalar_prefetch = 0 : i64, scratch_operands = 0 : i64, tpu.core_type = #tpu.core_type<tc>, window_params = [{transform_indices = @transform_0, window_bounds = array<i64: 16, 256>}, {pipeline_mode = #tpu.pipeline_mode<synchronous>, transform_indices = @transform_1, window_bounds = array<i64: 256, 1024>}, {pipeline_mode = #tpu.pipeline_mode<synchronous>, transform_indices = @transform_2, window_bounds = array<i64: 1, 1024>}, {pipeline_mode = #tpu.pipeline_mode<synchronous>, transform_indices = @transform_3, window_bounds = array<i64: 1024, 512>}, {pipeline_mode = #tpu.pipeline_mode<synchronous>, transform_indices = @transform_4, window_bounds = array<i64: 1, 512>}, {pipeline_mode = #tpu.pipeline_mode<synchronous>, transform_indices = @transform_5, window_bounds = array<i64: 512, 256>}, {pipeline_mode = #tpu.pipeline_mode<synchronous>, transform_indices = @transform_6, window_bounds = array<i64: 1, 256>}, {pipeline_mode = #tpu.pipeline_mode<synchronous>, transform_indices = @transform_7, window_bounds = array<i64: 1, 256>}, {pipeline_mode = #tpu.pipeline_mode<synchronous>, transform_indices = @transform_8, window_bounds = array<i64: 1, 1>}, {transform_indices = @transform_9, window_bounds = array<i64: 16, 1>}]} {
    %c0 = arith.constant 0 : index
    %c0_0 = arith.constant 0 : index
    %0 = vector.load %arg1[%c0, %c0_0] : memref<16x256xf32, #tpu.memory_space<vmem>>, vector<16x256xf32>
    %1 = arith.truncf %0 : vector<16x256xf32> to vector<16x256xbf16>
    %c0_1 = arith.constant 0 : index
    %c0_2 = arith.constant 0 : index
    %2 = vector.load %arg2[%c0_1, %c0_2] : memref<256x1024xbf16, #tpu.memory_space<vmem>>, vector<256x1024xbf16>
    %cst = arith.constant dense<0.000000e+00> : vector<16x1024xf32>
    %3 = tpu.matmul %1, %2, %cst {dimension_numbers = #tpu.dot_dimension_numbers<[1], [0], [0], [1], [0, 0, 1, 1], [], []>} : vector<16x256xbf16>, vector<256x1024xbf16>, vector<16x1024xf32> -> vector<16x1024xf32>
    %c0_3 = arith.constant 0 : index
    %c0_4 = arith.constant 0 : index
    %4 = vector.load %arg3[%c0_3, %c0_4] : memref<1x1024xf32, #tpu.memory_space<vmem>>, vector<1x1024xf32>
    %5 = vector.broadcast %4 : vector<1x1024xf32> to vector<16x1024xf32>
    %6 = arith.addf %3, %5 : vector<16x1024xf32>
    %cst_5 = arith.constant 2.000000e-01 : f32
    %7 = vector.broadcast %cst_5 : f32 to vector<16x1024xf32>
    %8 = arith.mulf %7, %6 : vector<16x1024xf32>
    %9 = arith.maximumf %6, %8 : vector<16x1024xf32>
    %10 = arith.truncf %9 : vector<16x1024xf32> to vector<16x1024xbf16>
    %c0_6 = arith.constant 0 : index
    %c0_7 = arith.constant 0 : index
    %11 = vector.load %arg4[%c0_6, %c0_7] : memref<1024x512xbf16, #tpu.memory_space<vmem>>, vector<1024x512xbf16>
    %cst_8 = arith.constant dense<0.000000e+00> : vector<16x512xf32>
    %12 = tpu.matmul %10, %11, %cst_8 {dimension_numbers = #tpu.dot_dimension_numbers<[1], [0], [0], [1], [0, 0, 1, 1], [], []>} : vector<16x1024xbf16>, vector<1024x512xbf16>, vector<16x512xf32> -> vector<16x512xf32>
    %c0_9 = arith.constant 0 : index
    %c0_10 = arith.constant 0 : index
    %13 = vector.load %arg5[%c0_9, %c0_10] : memref<1x512xf32, #tpu.memory_space<vmem>>, vector<1x512xf32>
    %14 = vector.broadcast %13 : vector<1x512xf32> to vector<16x512xf32>
    %15 = arith.addf %12, %14 : vector<16x512xf32>
    %cst_11 = arith.constant 2.000000e-01 : f32
    %16 = vector.broadcast %cst_11 : f32 to vector<16x512xf32>
    %17 = arith.mulf %16, %15 : vector<16x512xf32>
    %18 = arith.maximumf %15, %17 : vector<16x512xf32>
    %19 = arith.truncf %18 : vector<16x512xf32> to vector<16x512xbf16>
    %c0_12 = arith.constant 0 : index
    %c0_13 = arith.constant 0 : index
    %20 = vector.load %arg6[%c0_12, %c0_13] : memref<512x256xbf16, #tpu.memory_space<vmem>>, vector<512x256xbf16>
    %cst_14 = arith.constant dense<0.000000e+00> : vector<16x256xf32>
    %21 = tpu.matmul %19, %20, %cst_14 {dimension_numbers = #tpu.dot_dimension_numbers<[1], [0], [0], [1], [0, 0, 1, 1], [], []>} : vector<16x512xbf16>, vector<512x256xbf16>, vector<16x256xf32> -> vector<16x256xf32>
    %c0_15 = arith.constant 0 : index
    %c0_16 = arith.constant 0 : index
    %22 = vector.load %arg7[%c0_15, %c0_16] : memref<1x256xf32, #tpu.memory_space<vmem>>, vector<1x256xf32>
    %23 = vector.broadcast %22 : vector<1x256xf32> to vector<16x256xf32>
    %24 = arith.addf %21, %23 : vector<16x256xf32>
    %cst_17 = arith.constant 2.000000e-01 : f32
    %25 = vector.broadcast %cst_17 : f32 to vector<16x256xf32>
    %26 = arith.mulf %25, %24 : vector<16x256xf32>
    %27 = arith.maximumf %24, %26 : vector<16x256xf32>
    %c0_18 = arith.constant 0 : index
    %c0_19 = arith.constant 0 : index
    %28 = vector.load %arg8[%c0_18, %c0_19] : memref<1x256xf32, #tpu.memory_space<vmem>>, vector<1x256xf32>
    %29 = vector.broadcast %28 : vector<1x256xf32> to vector<16x256xf32>
    %30 = arith.mulf %27, %29 : vector<16x256xf32>
    %cst_20 = arith.constant dense<0.000000e+00> : vector<16xf32>
    %31 = vector.multi_reduction <add>, %30, %cst_20 [1] : vector<16x256xf32> to vector<16xf32>
    %32 = vector.shape_cast %31 : vector<16xf32> to vector<16x1xf32>
    %c0_21 = arith.constant 0 : index
    %c0_22 = arith.constant 0 : index
    %33 = vector.load %arg9[%c0_21, %c0_22] : memref<1x1xf32, #tpu.memory_space<vmem>>, vector<1x1xf32>
    %34 = vector.broadcast %33 : vector<1x1xf32> to vector<16x1xf32>
    %35 = arith.addf %32, %34 : vector<16x1xf32>
    %c0_23 = arith.constant 0 : index
    %c0_24 = arith.constant 0 : index
    %36 = vector.load %arg10[%c0_23, %c0_24] : memref<16x1xf32, #tpu.memory_space<vmem>>, vector<16x1xf32>
    tpu.vector_store %arg10[%c0_23, %c0_24], %35 {strides = array<i32>} : memref<16x1xf32, #tpu.memory_space<vmem>>, vector<16x1xf32>,
    return
  }
  func.func @transform_0(%arg0: i32) -> (i32, i32) {
    %c0_i32 = arith.constant 0 : i32
    %c0_i32_0 = arith.constant 0 : i32
    return %arg0, %c0_i32 : i32, i32
  }
  func.func @transform_1(%arg0: i32) -> (i32, i32) {
    %c0_i32 = arith.constant 0 : i32
    %c0_i32_0 = arith.constant 0 : i32
    %c0_i32_1 = arith.constant 0 : i32
    return %c0_i32, %c0_i32_0 : i32, i32
  }
  func.func @transform_2(%arg0: i32) -> (i32, i32) {
    %c0_i32 = arith.constant 0 : i32
    %c0_i32_0 = arith.constant 0 : i32
    %c0_i32_1 = arith.constant 0 : i32
    return %c0_i32, %c0_i32_0 : i32, i32
  }
  func.func @transform_3(%arg0: i32) -> (i32, i32) {
    %c0_i32 = arith.constant 0 : i32
    %c0_i32_0 = arith.constant 0 : i32
    %c0_i32_1 = arith.constant 0 : i32
    return %c0_i32, %c0_i32_0 : i32, i32
  }
  func.func @transform_4(%arg0: i32) -> (i32, i32) {
    %c0_i32 = arith.constant 0 : i32
    %c0_i32_0 = arith.constant 0 : i32
    %c0_i32_1 = arith.constant 0 : i32
    return %c0_i32, %c0_i32_0 : i32, i32
  }
  func.func @transform_5(%arg0: i32) -> (i32, i32) {
    %c0_i32 = arith.constant 0 : i32
    %c0_i32_0 = arith.constant 0 : i32
    %c0_i32_1 = arith.constant 0 : i32
    return %c0_i32, %c0_i32_0 : i32, i32
  }
  func.func @transform_6(%arg0: i32) -> (i32, i32) {
    %c0_i32 = arith.constant 0 : i32
    %c0_i32_0 = arith.constant 0 : i32
    %c0_i32_1 = arith.constant 0 : i32
    return %c0_i32, %c0_i32_0 : i32, i32
  }
  func.func @transform_7(%arg0: i32) -> (i32, i32) {
    %c0_i32 = arith.constant 0 : i32
    %c0_i32_0 = arith.constant 0 : i32
    %c0_i32_1 = arith.constant 0 : i32
    return %c0_i32, %c0_i32_0 : i32, i32
  }
  func.func @transform_8(%arg0: i32) -> (i32, i32) {
    %c0_i32 = arith.constant 0 : i32
    %c0_i32_0 = arith.constant 0 : i32
    %c0_i32_1 = arith.constant 0 : i32
    return %c0_i32, %c0_i32_0 : i32, i32
  }
  func.func @transform_9(%arg0: i32) -> (i32, i32) {
    %c0_i32 = arith.constant 0 : i32
    %c0_i32_0 = arith.constant 0 : i32
    return %arg0, %c0_i32 : i32, i32
  }
}

module attributes {stable_mosaic.version = 11 : i64} {
  func.func @discriminator_kernel(%arg0: i32, %arg1: memref<16x256xf32, #tpu.memory_space<vmem>>, %arg2: memref<256x1024xbf16, #tpu.memory_space<vmem>>, %arg3: memref<1x1024xf32, #tpu.memory_space<vmem>>, %arg4: memref<1024x512xbf16, #tpu.memory_space<vmem>>, %arg5: memref<1x512xf32, #tpu.memory_space<vmem>>, %arg6: memref<512x256xbf16, #tpu.memory_space<vmem>>, %arg7: memref<1x256xf32, #tpu.memory_space<vmem>>, %arg8: memref<1x256xf32, #tpu.memory_space<vmem>>, %arg9: memref<1x1xf32, #tpu.memory_space<vmem>>, %arg10: memref<16x1xf32, #tpu.memory_space<vmem>>) attributes {dimension_semantics = [#tpu.dimension_semantics<parallel>], iteration_bounds = array<i64: 1>, scalar_prefetch = 0 : i64, scratch_operands = 0 : i64, tpu.core_type = #tpu.core_type<tc>, window_params = [{transform_indices = @transform_0, window_bounds = array<i64: 16, 256>}, {pipeline_mode = #tpu.pipeline_mode<synchronous>, transform_indices = @transform_1, window_bounds = array<i64: 256, 1024>}, {pipeline_mode = #tpu.pipeline_mode<synchronous>, transform_indices = @transform_2, window_bounds = array<i64: 1, 1024>}, {pipeline_mode = #tpu.pipeline_mode<synchronous>, transform_indices = @transform_3, window_bounds = array<i64: 1024, 512>}, {pipeline_mode = #tpu.pipeline_mode<synchronous>, transform_indices = @transform_4, window_bounds = array<i64: 1, 512>}, {pipeline_mode = #tpu.pipeline_mode<synchronous>, transform_indices = @transform_5, window_bounds = array<i64: 512, 256>}, {pipeline_mode = #tpu.pipeline_mode<synchronous>, transform_indices = @transform_6, window_bounds = array<i64: 1, 256>}, {pipeline_mode = #tpu.pipeline_mode<synchronous>, transform_indices = @transform_7, window_bounds = array<i64: 1, 256>}, {pipeline_mode = #tpu.pipeline_mode<synchronous>, transform_indices = @transform_8, window_bounds = array<i64: 1, 1>}, {transform_indices = @transform_9, window_bounds = array<i64: 16, 1>}]} {
    %c0 = arith.constant 0 : index
    %c0_0 = arith.constant 0 : index
    %0 = vector.load %arg1[%c0, %c0_0] : memref<16x256xf32, #tpu.memory_space<vmem>>, vector<16x256xf32>
    %1 = arith.truncf %0 : vector<16x256xf32> to vector<16x256xbf16>
    %c0_1 = arith.constant 0 : index
    %c0_2 = arith.constant 0 : index
    %2 = vector.load %arg2[%c0_1, %c0_2] : memref<256x1024xbf16, #tpu.memory_space<vmem>>, vector<256x1024xbf16>
    %cst = arith.constant dense<0.000000e+00> : vector<16x1024xf32>
    %3 = tpu.matmul %1, %2, %cst {dimension_numbers = #tpu.dot_dimension_numbers<[1], [0], [0], [1], [0, 0, 1, 1], [], []>} : vector<16x256xbf16>, vector<256x1024xbf16>, vector<16x1024xf32> -> vector<16x1024xf32>
    %c0_3 = arith.constant 0 : index
    %c0_4 = arith.constant 0 : index
    %4 = vector.load %arg3[%c0_3, %c0_4] : memref<1x1024xf32, #tpu.memory_space<vmem>>, vector<1x1024xf32>
    %5 = vector.broadcast %4 : vector<1x1024xf32> to vector<16x1024xf32>
    %6 = arith.addf %3, %5 : vector<16x1024xf32>
    %cst_5 = arith.constant 2.000000e-01 : f32
    %7 = vector.broadcast %cst_5 : f32 to vector<16x1024xf32>
    %8 = arith.mulf %7, %6 : vector<16x1024xf32>
    %9 = arith.maximumf %6, %8 : vector<16x1024xf32>
    %10 = arith.truncf %9 : vector<16x1024xf32> to vector<16x1024xbf16>
    %c0_6 = arith.constant 0 : index
    %c0_7 = arith.constant 0 : index
    %11 = vector.load %arg4[%c0_6, %c0_7] : memref<1024x512xbf16, #tpu.memory_space<vmem>>, vector<1024x512xbf16>
    %cst_8 = arith.constant dense<0.000000e+00> : vector<16x512xf32>
    %12 = tpu.matmul %10, %11, %cst_8 {dimension_numbers = #tpu.dot_dimension_numbers<[1], [0], [0], [1], [0, 0, 1, 1], [], []>} : vector<16x1024xbf16>, vector<1024x512xbf16>, vector<16x512xf32> -> vector<16x512xf32>
    %c0_9 = arith.constant 0 : index
    %c0_10 = arith.constant 0 : index
    %13 = vector.load %arg5[%c0_9, %c0_10] : memref<1x512xf32, #tpu.memory_space<vmem>>, vector<1x512xf32>
    %14 = vector.broadcast %13 : vector<1x512xf32> to vector<16x512xf32>
    %15 = arith.addf %12, %14 : vector<16x512xf32>
    %cst_11 = arith.constant 2.000000e-01 : f32
    %16 = vector.broadcast %cst_11 : f32 to vector<16x512xf32>
    %17 = arith.mulf %16, %15 : vector<16x512xf32>
    %18 = arith.maximumf %15, %17 : vector<16x512xf32>
    %19 = arith.truncf %18 : vector<16x512xf32> to vector<16x512xbf16>
    %c0_12 = arith.constant 0 : index
    %c0_13 = arith.constant 0 : index
    %20 = vector.load %arg6[%c0_12, %c0_13] : memref<512x256xbf16, #tpu.memory_space<vmem>>, vector<512x256xbf16>
    %cst_14 = arith.constant dense<0.000000e+00> : vector<16x256xf32>
    %21 = tpu.matmul %19, %20, %cst_14 {dimension_numbers = #tpu.dot_dimension_numbers<[1], [0], [0], [1], [0, 0, 1, 1], [], []>} : vector<16x512xbf16>, vector<512x256xbf16>, vector<16x256xf32> -> vector<16x256xf32>
    %c0_15 = arith.constant 0 : index
    %c0_16 = arith.constant 0 : index
    %22 = vector.load %arg7[%c0_15, %c0_16] : memref<1x256xf32, #tpu.memory_space<vmem>>, vector<1x256xf32>
    %23 = vector.broadcast %22 : vector<1x256xf32> to vector<16x256xf32>
    %24 = arith.addf %21, %23 : vector<16x256xf32>
    %cst_17 = arith.constant 2.000000e-01 : f32
    %25 = vector.broadcast %cst_17 : f32 to vector<16x256xf32>
    %26 = arith.mulf %25, %24 : vector<16x256xf32>
    %27 = arith.maximumf %24, %26 : vector<16x256xf32>
    %c0_18 = arith.constant 0 : index
    %c0_19 = arith.constant 0 : index
    %28 = vector.load %arg8[%c0_18, %c0_19] : memref<1x256xf32, #tpu.memory_space<vmem>>, vector<1x256xf32>
    %29 = vector.broadcast %28 : vector<1x256xf32> to vector<16x256xf32>
    %30 = arith.mulf %27, %29 : vector<16x256xf32>
    %cst_20 = arith.constant dense<0.000000e+00> : vector<16xf32>
    %31 = vector.multi_reduction <add>, %30, %cst_20 [1] : vector<16x256xf32> to vector<16xf32>
    %32 = vector.shape_cast %31 : vector<16xf32> to vector<16x1xf32>
    %c0_21 = arith.constant 0 : index
    %c0_22 = arith.constant 0 : index
    %33 = vector.load %arg9[%c0_21, %c0_22] : memref<1x1xf32, #tpu.memory_space<vmem>>, vector<1x1xf32>
    %34 = vector.broadcast %33 : vector<1x1xf32> to vector<16x1xf32>
    %35 = arith.addf %32, %34 : vector<16x1xf32>
    %c0_23 = arith.constant 0 : index
    %c0_24 = arith.constant 0 : index
    %36 = vector.load %arg10[%c0_23, %c0_24] : memref<16x1xf32, #tpu.memory_space<vmem>>, vector<16x1xf32>
    tpu.vector_store %arg10[%c0_23, %c0_24], %35 {strides = array<i32>} : memref<16x1xf32, #tpu.memory_space<vmem>>, vector<16x1xf32>,
    return
  }
  func.func @transform_0(%arg0: i32) -> (i32, i32) {
    %c0_i32 = arith.constant 0 : i32
    %c0_i32_0 = arith.constant 0 : i32
    return %arg0, %c0_i32 : i32, i32
  }
  func.func @transform_1(%arg0: i32) -> (i32, i32) {
    %c0_i32 = arith.constant 0 : i32
    %c0_i32_0 = arith.constant 0 : i32
    %c0_i32_1 = arith.constant 0 : i32
    return %c0_i32, %c0_i32_0 : i32, i32
  }
  func.func @transform_2(%arg0: i32) -> (i32, i32) {
    %c0_i32 = arith.constant 0 : i32
    %c0_i32_0 = arith.constant 0 : i32
    %c0_i32_1 = arith.constant 0 : i32
    return %c0_i32, %c0_i32_0 : i32, i32
  }
  func.func @transform_3(%arg0: i32) -> (i32, i32) {
    %c0_i32 = arith.constant 0 : i32
    %c0_i32_0 = arith.constant 0 : i32
    %c0_i32_1 = arith.constant 0 : i32
    return %c0_i32, %c0_i32_0 : i32, i32
  }
  func.func @transform_4(%arg0: i32) -> (i32, i32) {
    %c0_i32 = arith.constant 0 : i32
    %c0_i32_0 = arith.constant 0 : i32
    %c0_i32_1 = arith.constant 0 : i32
    return %c0_i32, %c0_i32_0 : i32, i32
  }
  func.func @transform_5(%arg0: i32) -> (i32, i32) {
    %c0_i32 = arith.constant 0 : i32
    %c0_i32_0 = arith.constant 0 : i32
    %c0_i32_1 = arith.constant 0 : i32
    return %c0_i32, %c0_i32_0 : i32, i32
  }
  func.func @transform_6(%arg0: i32) -> (i32, i32) {
    %c0_i32 = arith.constant 0 : i32
    %c0_i32_0 = arith.constant 0 : i32
    %c0_i32_1 = arith.constant 0 : i32
    return %c0_i32, %c0_i32_0 : i32, i32
  }
  func.func @transform_7(%arg0: i32) -> (i32, i32) {
    %c0_i32 = arith.constant 0 : i32
    %c0_i32_0 = arith.constant 0 : i32
    %c0_i32_1 = arith.constant 0 : i32
    return %c0_i32, %c0_i32_0 : i32, i32
  }
  func.func @transform_8(%arg0: i32) -> (i32, i32) {
    %c0_i32 = arith.constant 0 : i32
    %c0_i32_0 = arith.constant 0 : i32
    %c0_i32_1 = arith.constant 0 : i32
    return %c0_i32, %c0_i32_0 : i32, i32
  }
  func.func @transform_9(%arg0: i32) -> (i32, i32) {
    %c0_i32 = arith.constant 0 : i32
    %c0_i32_0 = arith.constant 0 : i32
    return %arg0, %c0_i32 : i32, i32
  }
}

</mosaic_0001>

<bundles_post_ra>
// kernel: tpu_custom_call.1
= control target key start
LH: loop header
LB: loop body
LE: loop exit
PB: predicated region body
PF: predicated region fallthrough
CT: control target
= control target key end

     0   :  { %s4811_s0 = inlined_call_operand.hbm [shape: f32[16,256], index: 0, kind: input, shape index: {}]   ;;  %s4812_s1 = inlined_call_operand.hbm [shape: bf16[256,1024], index: 1, kind: input, shape index: {}]   ;;  %s4813_s2 = inlined_call_operand.hbm [shape: f32[1,1024], index: 2, kind: input, shape index: {}]   ;;  %s4814_s3 = inlined_call_operand.hbm [shape: bf16[1024,512], index: 3, kind: input, shape index: {}]   ;;  %s4815_s4 = inlined_call_operand.vmem [shape: f32[1,512], index: 4, kind: input, shape index: {}]   ;;  %s4816_s5 = inlined_call_operand.hbm [shape: bf16[512,256], index: 5, kind: input, shape index: {}]   ;;  %s4817_s6 = inlined_call_operand.vmem [shape: f32[1,256], index: 6, kind: input, shape index: {}]   ;;  %s4818_s7 = inlined_call_operand.vmem [shape: f32[1,256], index: 7, kind: input, shape index: {}]   ;;  %s4819_s8 = inlined_call_operand.<no memory space> [shape: f32[1,1], index: 8, kind: input, shape index: {}]   ;;  %s4820_s9 = inlined_call_operand.vmem [shape: f32[16,1], index: 9, kind: output, shape index: {}]  }
   0x1   :  { %v14_v0 = vstv %s4819_s8 }
   0x2   :  { %15 = vst [vmem:[#allocation2] sm:$0x1] %v14_v0 }
   0x3   :  { %16 = vsyncpa [#allocation4], 0 }
   0x4   :  { %17 = vsyncpa [#allocation6], 0 }
   0x5   :  { %18 = vsyncpa [#allocation9], 0  ;;  %s4627_s11 = smov [#allocation5]  }
   0x6   :  { %s36_s12 = sshll.u32 %s4627_s11, 4  ;;  %s37_s12 = int_to_ptr.vmem [resolvable:$true] %s36_s12 }
   0x7   :  { %s4529_s13 = scalar_lea.vmem %s37_s12, 16384  ;;  %p4534_p1 = scmp.lt.s32.totalorder %s37_s12, %s37_s12 }
   0x8   :  { %p4530_p0 = scmp.ne.s32.totalorder %s37_s12, %s4529_s13  ;;  %p4535_p2 = scmp.lt.s32.totalorder %s4529_s13, %s4529_s13 }
   0xa   :  { %p4536_p3 = por %p4535_p2, %p4534_p1 }
   0xc   :  { %p4537_p4 = pnand %p4536_p3, %p4530_p0 }
   0xe   :  { %4540 = shalt.err (!%p4537_p4)
}
   0xf   :  { %s4628_s14 = smov 512   ;;  %s4629_s15 = smov 32  }
  0x10   :  { %42 = dma.hbm_to_vmem [thread:$0]  %s4812_s1, 16384, %s37_s12, [#allocation6], %s4628_s14, %s4628_s14, %s4629_s15  }
  0x11   :  { %s4630_s8 = smov [#allocation8]   ;;  %s4631_s19 = smov [#allocation3]  }
  0x12   :  { %s58_s18 = sshll.u32 %s4630_s8, 4  ;;  %s24_s20 = sshll.u32 %s4631_s19, 4  ;;  %s59_s18 = int_to_ptr.vmem [resolvable:$true] %s58_s18  ;;  %s25_s20 = int_to_ptr.vmem [resolvable:$true] %s24_s20 }
  0x13   :  { %s4549_s21 = scalar_lea.vmem %s59_s18, 32768  ;;  %p4554_p6 = scmp.lt.s32.totalorder %s59_s18, %s59_s18 }
  0x14   :  { %p4550_p5 = scmp.ne.s32.totalorder %s59_s18, %s4549_s21  ;;  %p4555_p7 = scmp.lt.s32.totalorder %s4549_s21, %s4549_s21 }
  0x16   :  { %p4556_p8 = por %p4555_p7, %p4554_p6 }
  0x18   :  { %p4557_p9 = pnand %p4556_p8, %p4550_p5 }
  0x1a   :  { %4560 = shalt.err (!%p4557_p9)
}
  0x1b   :  { %s4632_s22 = smov 256   ;;  %s4633_s23 = smov 16  }
  0x1c   :  { %64 = dma.hbm_to_vmem [thread:$0]  %s4814_s3, 32768, %s59_s18, [#allocation9], %s4632_s22, %s4632_s22, %s4633_s23  }
  0x1d   :  { %s4569_s1 = scalar_lea.vmem %s25_s20, 512  ;;  %p4574_p11 = scmp.lt.s32.totalorder %s25_s20, %s25_s20 }
  0x1e   :  { %p4570_p10 = scmp.ne.s32.totalorder %s25_s20, %s4569_s1  ;;  %p4575_p12 = scmp.lt.s32.totalorder %s4569_s1, %s4569_s1 }
  0x20   :  { %p4576_p13 = por %p4575_p12, %p4574_p11 }
  0x22   :  { %p4577_p0 = pnand %p4576_p13, %p4570_p10 }
  0x24   :  { %4580 = shalt.err (!%p4577_p0)
}
  0x25   :  { %30 = dma.hbm_to_vmem [thread:$0]  %s4811_s0, 512, %s25_s20, [#allocation4], %s4632_s22, %s4632_s22, %s4633_s23  }
  0x26   :  { %s4634_s28 = smov [#allocation7]   ;;  %s4635_s30 = smov [#allocation10]  }
  0x27   :  { %s49_s29 = sshll.u32 %s4634_s28, 4  ;;  %s72_s10 = sshll.u32 %s4635_s30, 4  ;;  %s50_s29 = int_to_ptr.vmem [resolvable:$true] %s49_s29  ;;  %s73_s10 = int_to_ptr.vmem [resolvable:$true] %s72_s10 }
  0x28   :  { %s4589_s11 = scalar_lea.vmem %s50_s29, 128  ;;  %p4594_p2 = scmp.lt.s32.totalorder %s50_s29, %s50_s29 }
  0x29   :  { %p4590_p1 = scmp.ne.s32.totalorder %s50_s29, %s4589_s11  ;;  %p4595_p3 = scmp.lt.s32.totalorder %s4589_s11, %s4589_s11 }
  0x2b   :  { %p4596_p4 = por %p4595_p3, %p4594_p2 }
  0x2d   :  { %p4597_p5 = pnand %p4596_p4, %p4590_p1 }
  0x2f   :  { %4600 = shalt.err (!%p4597_p5)
}
  0x30   :  { %52 = dma.hbm_to_vmem [thread:$0]  %s4813_s2, 128, %s50_s29, [#allocation6]  }
  0x31   :  { %s4609_s13 = scalar_lea.vmem %s73_s10, 8192  ;;  %p4614_p7 = scmp.lt.s32.totalorder %s73_s10, %s73_s10 }
  0x32   :  { %p4610_p6 = scmp.ne.s32.totalorder %s73_s10, %s4609_s13  ;;  %p4615_p8 = scmp.lt.s32.totalorder %s4609_s13, %s4609_s13 }
  0x34   :  { %p4616_p9 = por %p4615_p8, %p4614_p7 }
  0x36   :  { %p4617_p10 = pnand %p4616_p9, %p4610_p6 }
  0x38   :  { %4620 = shalt.err (!%p4617_p10)
}
  0x39   :  { %s4636_s0 = smov 128   ;;  %s4637_s14 = smov 8  }
  0x3a   :  { %78 = dma.hbm_to_vmem [thread:$0]  %s4816_s5, 8192, %s73_s10, [#allocation9], %s4636_s0, %s4636_s0, %s4637_s14  }
  0x3b   :  { %4621 = dma.done.wait [#allocation4], 512  }
  0x3c   :  { %4622 = vsyncadd [#allocation4], 4294966784 }
  0x3d   :  { %4623 = dma.done.wait [#allocation6], 16512  }
  0x3e   :  { %4624 = vsyncadd [#allocation6], 4294950784 }
  0x3f   :  { %4625 = dma.done.wait [#allocation9], 40960  }
  0x40   :  { %4626 = vsyncadd [#allocation9], 4294926336  ;;  %v162_v1 = vld [vmem:[#allocation5 + $0x1c0] sm:$0xff]  ;;  %v163_v3 = vld [vmem:[#allocation5 + $0x1c8] sm:$0xff]  ;;  %vm3571_vm0 = vcmask 7168  }
  0x41   :  { %v166_v2 = vld [vmem:[#allocation5 + $0x1e0] sm:$0xff]  ;;  %v167_v5 = vld [vmem:[#allocation5 + $0x1e8] sm:$0xff]  ;;  %v103_v55 = vld [vmem:[#allocation3 + $0x18] sm:$0xff] }
  0x42   :  { %v3638_v4 = vcombine.high %v162_v1, %v166_v2  ;;  %v3637_v6 = vcombine.low %v162_v1, %v166_v2  ;;  %v154_v7 = vld [vmem:[#allocation5 + $0x180] sm:$0xff]  ;;  %v3640_v9 = vcombine.high %v163_v3, %v167_v5  ;;  %v3639_v10 = vcombine.low %v163_v3, %v167_v5  ;;  %v155_v12 = vld [vmem:[#allocation5 + $0x188] sm:$0xff] }
  0x43   :  { %v158_v8 = vld [vmem:[#allocation5 + $0x1a0] sm:$0xff]  ;;  %v159_v13 = vld [vmem:[#allocation5 + $0x1a8] sm:$0xff] }
  0x44   :  { %v3630_v11 = vcombine.high %v154_v7, %v158_v8  ;;  %v146_v14 = vld [vmem:[#allocation5 + $0x140] sm:$0xff]  ;;  %916 = vmatprep.subr.bf16.mxu0 %v3638_v4  ;;  %v3632_v15 = vcombine.high %v155_v12, %v159_v13  ;;  %v147_v17 = vld [vmem:[#allocation5 + $0x148] sm:$0xff]  ;;  %959 = vmatprep.subr.bf16.mxu1 %v3640_v9  ;;  %v3629_v19 = vcombine.low %v154_v7, %v158_v8 }
  0x45   :  { %v150_v16 = vld [vmem:[#allocation5 + $0x160] sm:$0xff]  ;;  %v151_v18 = vld [vmem:[#allocation5 + $0x168] sm:$0xff]  ;;  %917 = vmatpush1.bf16.msra.mxu0 %v3637_v6  ;;  %960 = vmatpush1.bf16.msra.mxu1 %v3639_v10  ;;  %v3631_v20 = vcombine.low %v155_v12, %v159_v13 }
  0x46   :  { %918 = vmatprep.subr.bf16.mxu0 %v3630_v11  ;;  %v3622_v21 = vcombine.high %v146_v14, %v150_v16  ;;  %961 = vmatprep.subr.bf16.mxu1 %v3632_v15  ;;  %v3624_v22 = vcombine.high %v147_v17, %v151_v18  ;;  %v138_v23 = vld [vmem:[#allocation5 + $0x100] sm:$0xff]  ;;  %v139_v25 = vld [vmem:[#allocation5 + $0x108] sm:$0xff]  ;;  %v3621_v27 = vcombine.low %v146_v14, %v150_v16 }
  0x47   :  { %v142_v24 = vld [vmem:[#allocation5 + $0x120] sm:$0xff]  ;;  %v143_v26 = vld [vmem:[#allocation5 + $0x128] sm:$0xff]  ;;  %v3623_v28 = vcombine.low %v147_v17, %v151_v18 }
  0x48   :  { %v3614_v29 = vcombine.high %v138_v23, %v142_v24  ;;  %v3616_v30 = vcombine.high %v139_v25, %v143_v26  ;;  %v130_v31 = vld [vmem:[#allocation5 + $0xc0] sm:$0xff]  ;;  %v131_v33 = vld [vmem:[#allocation5 + $0xc8] sm:$0xff]  ;;  %v3613_v35 = vcombine.low %v138_v23, %v142_v24  ;;  %v3615_v36 = vcombine.low %v139_v25, %v143_v26 }
  0x49   :  { %919 = vmatpush1.bf16.msra.mxu0 %v3629_v19  ;;  %962 = vmatpush1.bf16.msra.mxu1 %v3631_v20  ;;  %v134_v32 = vld [vmem:[#allocation5 + $0xe0] sm:$0xff]  ;;  %v135_v34 = vld [vmem:[#allocation5 + $0xe8] sm:$0xff] }
  0x4a   :  { %920 = vmatprep.subr.bf16.mxu0 %v3622_v21  ;;  %963 = vmatprep.subr.bf16.mxu1 %v3624_v22  ;;  %v3606_v37 = vcombine.high %v130_v31, %v134_v32  ;;  %v3608_v38 = vcombine.high %v131_v33, %v135_v34  ;;  %v122_v39 = vld [vmem:[#allocation5 + $0x80] sm:$0xff]  ;;  %v123_v41 = vld [vmem:[#allocation5 + $0x88] sm:$0xff]  ;;  %v3605_v43 = vcombine.low %v130_v31, %v134_v32 }
  0x4b   :  { %v126_v40 = vld [vmem:[#allocation5 + $0xa0] sm:$0xff]  ;;  %v127_v42 = vld [vmem:[#allocation5 + $0xa8] sm:$0xff]  ;;  %v3607_v44 = vcombine.low %v131_v33, %v135_v34 }
  0x4c   :  { %v3598_v45 = vcombine.high %v122_v39, %v126_v40  ;;  %v3600_v46 = vcombine.high %v123_v41, %v127_v42  ;;  %v114_v47 = vld [vmem:[#allocation5 + $0x40] sm:$0xff]  ;;  %v115_v49 = vld [vmem:[#allocation5 + $0x48] sm:$0xff]  ;;  %v3597_v51 = vcombine.low %v122_v39, %v126_v40  ;;  %v3599_v52 = vcombine.low %v123_v41, %v127_v42 }
  0x4d   :  { %921 = vmatpush1.bf16.msra.mxu0 %v3621_v27  ;;  %964 = vmatpush1.bf16.msra.mxu1 %v3623_v28  ;;  %v118_v48 = vld [vmem:[#allocation5 + $0x60] sm:$0xff]  ;;  %v119_v50 = vld [vmem:[#allocation5 + $0x68] sm:$0xff] }
  0x4e   :  { %922 = vmatprep.subr.bf16.mxu0 %v3614_v29  ;;  %965 = vmatprep.subr.bf16.mxu1 %v3616_v30  ;;  %v3590_v53 = vcombine.high %v114_v47, %v118_v48  ;;  %v101_v54 = vld [vmem:[#allocation3 + $0x8] sm:$0xff]  ;;  %v3592_v56 = vcombine.high %v115_v49, %v119_v50  ;;  %v106_v57 = vld [vmem:[#allocation5] sm:$0xff]  ;;  %v3589_v62 = vcombine.low %v114_v47, %v118_v48 }
  0x4f   :  { %v110_v58 = vld [vmem:[#allocation5 + $0x20] sm:$0xff]  ;;  %v4706_v59 = vpack.c.bf16 %v103_v55, %v101_v54  ;;  %v107_v60 = vld [vmem:[#allocation5 + $0x8] sm:$0xff]  ;;  %v3591_v63 = vcombine.low %v115_v49, %v119_v50 }
  0x50   :  { %v111_v61 = vld [vmem:[#allocation5 + $0x28] sm:$0xff]  ;;  %v3582_v0 = vcombine.high %v106_v57, %v110_v58  ;;  %v226_v2 = vld [vmem:[#allocation5 + $0x3c0] sm:$0xff]  ;;  %v3581_v6 = vcombine.low %v106_v57, %v110_v58 }
  0x51   :  { %923 = vmatpush1.bf16.msra.mxu0 %v3613_v35  ;;  %966 = vmatpush1.bf16.msra.mxu1 %v3615_v36  ;;  %v3584_v1 = vcombine.high %v107_v60, %v111_v61  ;;  %v230_v3 = vld [vmem:[#allocation5 + $0x3e0] sm:$0xff]  ;;  %v227_v4 = vld [vmem:[#allocation5 + $0x3c8] sm:$0xff]  ;;  %v3583_v7 = vcombine.low %v107_v60, %v111_v61 }
  0x52   :  { %924 = vmatprep.subr.bf16.mxu0 %v3606_v37  ;;  %967 = vmatprep.subr.bf16.mxu1 %v3608_v38  ;;  %v231_v5 = vld [vmem:[#allocation5 + $0x3e8] sm:$0xff]  ;;  %v3702_v8 = vcombine.high %v226_v2, %v230_v3  ;;  %v218_v10 = vld [vmem:[#allocation5 + $0x380] sm:$0xff]  ;;  %v3701_v14 = vcombine.low %v226_v2, %v230_v3 }
  0x53   :  { %948 = vmatprep.mubr.bf16.mxu0 %v4706_v59  ;;  %991 = vmatprep.mubr.bf16.mxu1 %v4706_v59  ;;  %v3704_v9 = vcombine.high %v227_v4, %v231_v5  ;;  %v222_v11 = vld [vmem:[#allocation5 + $0x3a0] sm:$0xff]  ;;  %v219_v12 = vld [vmem:[#allocation5 + $0x388] sm:$0xff]  ;;  %v3703_v15 = vcombine.low %v227_v4, %v231_v5  ;;  %v164_v4 = vld [vmem:[#allocation5 + $0x1d0] sm:$0xff] }
  0x54   :  { %v223_v13 = vld [vmem:[#allocation5 + $0x3a8] sm:$0xff]  ;;  %v3694_v16 = vcombine.high %v218_v10, %v222_v11  ;;  %v210_v18 = vld [vmem:[#allocation5 + $0x340] sm:$0xff]  ;;  %v3693_v22 = vcombine.low %v218_v10, %v222_v11  ;;  %v168_v5 = vld [vmem:[#allocation5 + $0x1f0] sm:$0xff] }
  0x55   :  { %925 = vmatpush1.bf16.msra.mxu0 %v3605_v43  ;;  %968 = vmatpush1.bf16.msra.mxu1 %v3607_v44  ;;  %v3696_v17 = vcombine.high %v219_v12, %v223_v13  ;;  %v214_v19 = vld [vmem:[#allocation5 + $0x360] sm:$0xff]  ;;  %v211_v20 = vld [vmem:[#allocation5 + $0x348] sm:$0xff]  ;;  %v3695_v23 = vcombine.low %v219_v12, %v223_v13  ;;  %v3642_v11 = vcombine.high %v164_v4, %v168_v5  ;;  %v156_v13 = vld [vmem:[#allocation5 + $0x190] sm:$0xff] }
  0x56   :  { %926 = vmatprep.subr.bf16.mxu0 %v3598_v45  ;;  %969 = vmatprep.subr.bf16.mxu1 %v3600_v46  ;;  %v215_v21 = vld [vmem:[#allocation5 + $0x368] sm:$0xff]  ;;  %v3686_v24 = vcombine.high %v210_v18, %v214_v19  ;;  %v202_v26 = vld [vmem:[#allocation5 + $0x300] sm:$0xff]  ;;  %v3685_v30 = vcombine.low %v210_v18, %v214_v19  ;;  %v3641_v18 = vcombine.low %v164_v4, %v168_v5  ;;  %v232_v4 = vld [vmem:[#allocation5 + $0x3f0] sm:$0xff] }
  0x57   :  { %v3688_v25 = vcombine.high %v211_v20, %v215_v21  ;;  %v206_v27 = vld [vmem:[#allocation5 + $0x320] sm:$0xff]  ;;  %v203_v28 = vld [vmem:[#allocation5 + $0x308] sm:$0xff]  ;;  %v3687_v31 = vcombine.low %v211_v20, %v215_v21 }
  0x58   :  { %v207_v29 = vld [vmem:[#allocation5 + $0x328] sm:$0xff]  ;;  %v3678_v32 = vcombine.high %v202_v26, %v206_v27  ;;  %v194_v34 = vld [vmem:[#allocation5 + $0x2c0] sm:$0xff]  ;;  %v3677_v38 = vcombine.low %v202_v26, %v206_v27 }
  0x59   :  { %927 = vmatpush1.bf16.msra.mxu0 %v3597_v51  ;;  %970 = vmatpush1.bf16.msra.mxu1 %v3599_v52  ;;  %v3680_v33 = vcombine.high %v203_v28, %v207_v29  ;;  %v198_v35 = vld [vmem:[#allocation5 + $0x2e0] sm:$0xff]  ;;  %v195_v36 = vld [vmem:[#allocation5 + $0x2c8] sm:$0xff]  ;;  %v3679_v39 = vcombine.low %v203_v28, %v207_v29 }
  0x5a   :  { %928 = vmatprep.subr.bf16.mxu0 %v3590_v53  ;;  %971 = vmatprep.subr.bf16.mxu1 %v3592_v56  ;;  %v199_v37 = vld [vmem:[#allocation5 + $0x2e8] sm:$0xff]  ;;  %v3670_v40 = vcombine.high %v194_v34, %v198_v35  ;;  %v186_v42 = vld [vmem:[#allocation5 + $0x280] sm:$0xff]  ;;  %v3669_v46 = vcombine.low %v194_v34, %v198_v35 }
  0x5b   :  { %v3672_v41 = vcombine.high %v195_v36, %v199_v37  ;;  %v190_v43 = vld [vmem:[#allocation5 + $0x2a0] sm:$0xff]  ;;  %v187_v44 = vld [vmem:[#allocation5 + $0x288] sm:$0xff]  ;;  %v3671_v47 = vcombine.low %v195_v36, %v199_v37 }
  0x5c   :  { %v191_v45 = vld [vmem:[#allocation5 + $0x2a8] sm:$0xff]  ;;  %v3662_v48 = vcombine.high %v186_v42, %v190_v43  ;;  %v178_v50 = vld [vmem:[#allocation5 + $0x240] sm:$0xff]  ;;  %v3661_v54 = vcombine.low %v186_v42, %v190_v43 }
  0x5d   :  { %929 = vmatpush1.bf16.msra.mxu0 %v3589_v62  ;;  %972 = vmatpush1.bf16.msra.mxu1 %v3591_v63  ;;  %v3664_v49 = vcombine.high %v187_v44, %v191_v45  ;;  %v182_v51 = vld [vmem:[#allocation5 + $0x260] sm:$0xff]  ;;  %v179_v52 = vld [vmem:[#allocation5 + $0x248] sm:$0xff]  ;;  %v3663_v55 = vcombine.low %v187_v44, %v191_v45  ;;  %v124_v45 = vld [vmem:[#allocation5 + $0x90] sm:$0xff] }
  0x5e   :  { %930 = vmatprep.subr.bf16.mxu0 %v3582_v0  ;;  %973 = vmatprep.subr.bf16.mxu1 %v3584_v1  ;;  %v183_v53 = vld [vmem:[#allocation5 + $0x268] sm:$0xff]  ;;  %v3654_v56 = vcombine.high %v178_v50, %v182_v51  ;;  %v170_v58 = vld [vmem:[#allocation5 + $0x200] sm:$0xff]  ;;  %v3653_v63 = vcombine.low %v178_v50, %v182_v51  ;;  %v116_v50 = vld [vmem:[#allocation5 + $0x50] sm:$0xff] }
  0x5f   :  { %v3656_v57 = vcombine.high %v179_v52, %v183_v53  ;;  %v174_v60 = vld [vmem:[#allocation5 + $0x220] sm:$0xff]  ;;  %v171_v61 = vld [vmem:[#allocation5 + $0x208] sm:$0xff]  ;;  %v3655_v0 = vcombine.low %v179_v52, %v183_v53  ;;  %v120_v51 = vld [vmem:[#allocation5 + $0x70] sm:$0xff] }
  0x60   :  { %v175_v62 = vld [vmem:[#allocation5 + $0x228] sm:$0xff]  ;;  %v3646_v1 = vcombine.high %v170_v58, %v174_v60  ;;  %v100_v3 = vld [vmem:[#allocation3] sm:$0xff] }
  0x61   :  { %931 = vmatpush1.bf16.msra.mxu0 %v3581_v6  ;;  %974 = vmatpush1.bf16.msra.mxu1 %v3583_v7  ;;  %v3648_v2 = vcombine.high %v171_v61, %v175_v62  ;;  %v165_v6 = vld [vmem:[#allocation5 + $0x1d8] sm:$0xff]  ;;  %v3647_v10 = vcombine.low %v171_v61, %v175_v62  ;;  %v3594_v62 = vcombine.high %v116_v50, %v120_v51 }
  0x62   :  { %932 = vmatprep.subr.bf16.mxu0 %v3702_v8  ;;  %975 = vmatprep.subr.bf16.mxu1 %v3704_v9  ;;  %v169_v7 = vld [vmem:[#allocation5 + $0x1f8] sm:$0xff]  ;;  %v3645_v8 = vcombine.low %v170_v58, %v174_v60  ;;  %v102_v9 = vld [vmem:[#allocation3 + $0x10] sm:$0xff] }
  0x63   :  { %v3644_v12 = vcombine.high %v165_v6, %v169_v7  ;;  %v3643_v19 = vcombine.low %v165_v6, %v169_v7  ;;  %v108_v58 = vld [vmem:[#allocation5 + $0x10] sm:$0xff]  ;;  %v229_v7 = vld [vmem:[#allocation5 + $0x3d8] sm:$0xff] }
  0x64   :  { %v112_v60 = vld [vmem:[#allocation5 + $0x30] sm:$0xff] }
  0x65   :  { %933 = vmatpush2.bf16.msra.mxu0 %v3701_v14  ;;  %976 = vmatpush2.bf16.msra.mxu1 %v3703_v15  ;;  %v160_v14 = vld [vmem:[#allocation5 + $0x1b0] sm:$0xff]  ;;  %v4710_v15 = vpack.c.bf16 %v102_v9, %v100_v3  ;;  %v3586_v6 = vcombine.high %v108_v58, %v112_v60 }
  0x66   :  { %934 = vmatprep.subr.bf16.mxu0 %v3694_v16  ;;  %977 = vmatprep.subr.bf16.mxu1 %v3696_v17  ;;  %v157_v16 = vld [vmem:[#allocation5 + $0x198] sm:$0xff]  ;;  %v3634_v20 = vcombine.high %v156_v13, %v160_v14  ;;  %v3633_v26 = vcombine.low %v156_v13, %v160_v14  ;;  %v228_v3 = vld [vmem:[#allocation5 + $0x3d0] sm:$0xff] }
  0x67   :  { %v161_v17 = vld [vmem:[#allocation5 + $0x1b8] sm:$0xff]  ;;  %v3706_v14 = vcombine.high %v228_v3, %v232_v4 }
  0x68   :  { %v3636_v21 = vcombine.high %v157_v16, %v161_v17  ;;  %v3635_v27 = vcombine.low %v157_v16, %v161_v17  ;;  %v221_v16 = vld [vmem:[#allocation5 + $0x398] sm:$0xff] }
  0x69   :  { %935 = vmatpush2.bf16.msra.mxu0 %v3693_v22  ;;  %978 = vmatpush2.bf16.msra.mxu1 %v3695_v23  ;;  %v148_v22 = vld [vmem:[#allocation5 + $0x150] sm:$0xff]  ;;  %v225_v17 = vld [vmem:[#allocation5 + $0x3b8] sm:$0xff] }
  0x6a   :  { %936 = vmatprep.subr.bf16.mxu0 %v3686_v24  ;;  %979 = vmatprep.subr.bf16.mxu1 %v3688_v25  ;;  %v152_v23 = vld [vmem:[#allocation5 + $0x170] sm:$0xff]  ;;  %v149_v24 = vld [vmem:[#allocation5 + $0x158] sm:$0xff] }
  0x6b   :  { %v153_v25 = vld [vmem:[#allocation5 + $0x178] sm:$0xff]  ;;  %v3626_v28 = vcombine.high %v148_v22, %v152_v23  ;;  %v3625_v34 = vcombine.low %v148_v22, %v152_v23 }
  0x6c   :  { %v3628_v29 = vcombine.high %v149_v24, %v153_v25  ;;  %v3627_v35 = vcombine.low %v149_v24, %v153_v25  ;;  %v213_v24 = vld [vmem:[#allocation5 + $0x358] sm:$0xff] }
  0x6d   :  { %937 = vmatpush2.bf16.msra.mxu0 %v3685_v30  ;;  %980 = vmatpush2.bf16.msra.mxu1 %v3687_v31  ;;  %v140_v30 = vld [vmem:[#allocation5 + $0x110] sm:$0xff]  ;;  %v217_v25 = vld [vmem:[#allocation5 + $0x378] sm:$0xff] }
  0x6e   :  { %938 = vmatprep.subr.bf16.mxu0 %v3678_v32  ;;  %981 = vmatprep.subr.bf16.mxu1 %v3680_v33  ;;  %v144_v31 = vld [vmem:[#allocation5 + $0x130] sm:$0xff]  ;;  %v141_v32 = vld [vmem:[#allocation5 + $0x118] sm:$0xff] }
  0x6f   :  { %v145_v33 = vld [vmem:[#allocation5 + $0x138] sm:$0xff]  ;;  %v3618_v36 = vcombine.high %v140_v30, %v144_v31  ;;  %v3617_v42 = vcombine.low %v140_v30, %v144_v31  ;;  %v3699_v30 = vcombine.low %v221_v16, %v225_v17 }
  0x70   :  { %v3620_v37 = vcombine.high %v141_v32, %v145_v33  ;;  %v3619_v43 = vcombine.low %v141_v32, %v145_v33  ;;  %v205_v32 = vld [vmem:[#allocation5 + $0x318] sm:$0xff] }
  0x71   :  { %939 = vmatpush2.bf16.msra.mxu0 %v3677_v38  ;;  %982 = vmatpush2.bf16.msra.mxu1 %v3679_v39  ;;  %v132_v38 = vld [vmem:[#allocation5 + $0xd0] sm:$0xff]  ;;  %v209_v33 = vld [vmem:[#allocation5 + $0x338] sm:$0xff] }
  0x72   :  { %940 = vmatprep.subr.bf16.mxu0 %v3670_v40  ;;  %983 = vmatprep.subr.bf16.mxu1 %v3672_v41  ;;  %v136_v39 = vld [vmem:[#allocation5 + $0xf0] sm:$0xff]  ;;  %v133_v40 = vld [vmem:[#allocation5 + $0xd8] sm:$0xff] }
  0x73   :  { %v137_v41 = vld [vmem:[#allocation5 + $0xf8] sm:$0xff]  ;;  %v3610_v44 = vcombine.high %v132_v38, %v136_v39 }
  0x74   :  { %v3611_v52 = vcombine.low %v133_v40, %v137_v41 }
  0x75   :  { %941 = vmatpush2.bf16.msra.mxu0 %v3669_v46  ;;  %984 = vmatpush2.bf16.msra.mxu1 %v3671_v47  ;;  %v128_v46 = vld [vmem:[#allocation5 + $0xb0] sm:$0xff]  ;;  %v125_v47 = vld [vmem:[#allocation5 + $0x98] sm:$0xff] }
  0x76   :  { %942 = vmatprep.subr.bf16.mxu0 %v3662_v48  ;;  %985 = vmatprep.subr.bf16.mxu1 %v3664_v49  ;;  %v129_v48 = vld [vmem:[#allocation5 + $0xb8] sm:$0xff]  ;;  %v3609_v49 = vcombine.low %v132_v38, %v136_v39  ;;  %v3602_v53 = vcombine.high %v124_v45, %v128_v46  ;;  %v3691_v38 = vcombine.low %v213_v24, %v217_v25 }
  0x77   :  { %v3603_v61 = vcombine.low %v125_v47, %v129_v48 }
  0x79   :  { %943 = vmatpush2.bf16.msra.mxu0 %v3661_v54  ;;  %986 = vmatpush2.bf16.msra.mxu1 %v3663_v55  ;;  %v117_v54 = vld [vmem:[#allocation5 + $0x58] sm:$0xff] }
  0x7a   :  { %944 = vmatprep.subr.bf16.mxu0 %v3654_v56  ;;  %987 = vmatprep.subr.bf16.mxu1 %v3656_v57  ;;  %v121_v55 = vld [vmem:[#allocation5 + $0x78] sm:$0xff]  ;;  %v3604_v56 = vcombine.high %v125_v47, %v129_v48  ;;  %v3601_v57 = vcombine.low %v124_v45, %v128_v46  ;;  %v192_v45 = vld [vmem:[#allocation5 + $0x2b0] sm:$0xff] }
  0x7b   :  { %v3595_v5 = vcombine.low %v117_v54, %v121_v55  ;;  %v189_v47 = vld [vmem:[#allocation5 + $0x298] sm:$0xff] }
  0x7c   :  { %v193_v48 = vld [vmem:[#allocation5 + $0x2b8] sm:$0xff] }
  0x7d   :  { %945 = vmatpush2.bf16.msra.mxu0 %v3653_v63  ;;  %988 = vmatpush2.bf16.msra.mxu1 %v3655_v0  ;;  %v109_v63 = vld [vmem:[#allocation5 + $0x18] sm:$0xff] }
  0x7e   :  { %946 = vmatprep.subr.bf16.mxu0 %v3646_v1  ;;  %989 = vmatprep.subr.bf16.mxu1 %v3648_v2  ;;  %v113_v0 = vld [vmem:[#allocation5 + $0x38] sm:$0xff]  ;;  %v3596_v1 = vcombine.high %v117_v54, %v121_v55  ;;  %v3593_v2 = vcombine.low %v116_v50, %v120_v51  ;;  %v180_v51 = vld [vmem:[#allocation5 + $0x250] sm:$0xff] }
  0x7f   :  { %v3588_v9 = vcombine.high %v109_v63, %v113_v0  ;;  %v3587_v13 = vcombine.low %v109_v63, %v113_v0  ;;  %v181_v55 = vld [vmem:[#allocation5 + $0x258] sm:$0xff] }
  0x80   :  { %v173_v0 = vld [vmem:[#allocation5 + $0x218] sm:$0xff] }
  0x81   :  { %947 = vmatpush2.bf16.msra.mxu0 %v3645_v8  ;;  %990 = vmatpush2.bf16.msra.mxu1 %v3647_v10  ;;  %v233_v8 = vld [vmem:[#allocation5 + $0x3f8] sm:$0xff]  ;;  %v3585_v10 = vcombine.low %v108_v58, %v112_v60  ;;  %v172_v60 = vld [vmem:[#allocation5 + $0x210] sm:$0xff] }
  0x82   :  { %1002 = vmatprep.subr.bf16.mxu0 %v3642_v11  ;;  %1045 = vmatprep.subr.bf16.mxu1 %v3644_v12  ;;  %v220_v11 = vld [vmem:[#allocation5 + $0x390] sm:$0xff]  ;;  %v3707_v22 = vcombine.low %v229_v7, %v233_v8 }
  0x83   :  { %v224_v12 = vld [vmem:[#allocation5 + $0x3b0] sm:$0xff] }
  0x84   :  { %949 = vmatmul.mubr.bf16.vlgmr.msra.gmra.mxu0 %v4710_v15  ;;  %992 = vmatmul.mubr.bf16.vlgmr.msra.gmra.mxu1 %v4710_v15  ;;  %v3698_v23 = vcombine.high %v220_v11, %v224_v12 }
  0x85   :  { %1003 = vmatpush1.bf16.msra.mxu0 %v3641_v18  ;;  %1046 = vmatpush1.bf16.msra.mxu1 %v3643_v19  ;;  %v3708_v18 = vcombine.high %v229_v7, %v233_v8  ;;  %v3705_v19 = vcombine.low %v228_v3, %v232_v4  ;;  %v4043_v7 = vld [vmem:[#allocation8 + $0xe4] ss:$16 sps:$4 sm:$0xff]  }
  0x86   :  { %1004 = vmatprep.subr.bf16.mxu0 %v3634_v20  ;;  %1047 = vmatprep.subr.bf16.mxu1 %v3636_v21  ;;  %v212_v20 = vld [vmem:[#allocation5 + $0x350] sm:$0xff] }
  0x87   :  { %1034 = vmatprep.mubr.bf16.mxu0 %v4706_v59  ;;  %1077 = vmatprep.mubr.bf16.mxu1 %v4706_v59  ;;  %v3612_v59 = vcombine.high %v133_v40, %v137_v41  ;;  %v216_v21 = vld [vmem:[#allocation5 + $0x370] sm:$0xff]  ;;  %v197_v40 = vld [vmem:[#allocation5 + $0x2d8] sm:$0xff] }
  0x88   :  { %v3690_v31 = vcombine.high %v212_v20, %v216_v21  ;;  %v201_v41 = vld [vmem:[#allocation5 + $0x2f8] sm:$0xff] }
  0x89   :  { %1005 = vmatpush1.bf16.msra.mxu0 %v3633_v26  ;;  %1048 = vmatpush1.bf16.msra.mxu1 %v3635_v27  ;;  %v3700_v26 = vcombine.high %v221_v16, %v225_v17  ;;  %v3697_v27 = vcombine.low %v220_v11, %v224_v12  ;;  %v4041_v11 = vld [vmem:[#allocation8 + $0xe0] ss:$16 sps:$4 sm:$0xff]  }
  0x8a   :  { %1006 = vmatprep.subr.bf16.mxu0 %v3626_v28  ;;  %1049 = vmatprep.subr.bf16.mxu1 %v3628_v29  ;;  %v204_v28 = vld [vmem:[#allocation5 + $0x310] sm:$0xff]  ;;  %v4044_v12 = vld [vmem:[#allocation8 + $0x2e0] ss:$16 sps:$4 sm:$0xff]  }
  0x8b   :  { %v208_v29 = vld [vmem:[#allocation5 + $0x330] sm:$0xff]  ;;  %v4047_v16 = vld [vmem:[#allocation8 + $0xc0] ss:$16 sps:$4 sm:$0xff]  }
  0x8c   :  { %v3682_v39 = vcombine.high %v204_v28, %v208_v29  ;;  %v4050_v17 = vld [vmem:[#allocation8 + $0x2c0] ss:$16 sps:$4 sm:$0xff]  }
  0x8d   :  { %1007 = vmatpush1.bf16.msra.mxu0 %v3625_v34  ;;  %1050 = vmatpush1.bf16.msra.mxu1 %v3627_v35  ;;  %v3692_v34 = vcombine.high %v213_v24, %v217_v25  ;;  %v3689_v35 = vcombine.low %v212_v20, %v216_v21  ;;  %v4058_v20 = vld [vmem:[#allocation8 + $0x2a4] ss:$16 sps:$4 sm:$0xff]   ;;  %v4056_v21 = vld [vmem:[#allocation8 + $0x2a0] ss:$16 sps:$4 sm:$0xff]  }
  0x8e   :  { %1008 = vmatprep.subr.bf16.mxu0 %v3618_v36  ;;  %1051 = vmatprep.subr.bf16.mxu1 %v3620_v37  ;;  %v196_v36 = vld [vmem:[#allocation5 + $0x2d0] sm:$0xff]  ;;  %v4064_v24 = vld [vmem:[#allocation8 + $0x284] ss:$16 sps:$4 sm:$0xff]  }
  0x8f   :  { %v200_v37 = vld [vmem:[#allocation5 + $0x2f0] sm:$0xff]  ;;  %v4067_v25 = vld [vmem:[#allocation8 + $0x64] ss:$16 sps:$4 sm:$0xff]  }
  0x90   :  { %v3674_v46 = vcombine.high %v196_v36, %v200_v37  ;;  %v3673_v50 = vcombine.low %v196_v36, %v200_v37  ;;  %v4080_v36 = vld [vmem:[#allocation8 + $0x220] ss:$16 sps:$4 sm:$0xff]   ;;  %v4085_v37 = vld [vmem:[#allocation8 + $0x4] ss:$16 sps:$4 sm:$0xff]  }
  0x91   :  { %1009 = vmatpush1.bf16.msra.mxu0 %v3617_v42  ;;  %1052 = vmatpush1.bf16.msra.mxu1 %v3619_v43  ;;  %v3684_v42 = vcombine.high %v205_v32, %v209_v33  ;;  %v3681_v43 = vcombine.low %v204_v28, %v208_v29  ;;  %v4068_v28 = vld [vmem:[#allocation8 + $0x260] ss:$16 sps:$4 sm:$0xff]   ;;  %v4073_v29 = vld [vmem:[#allocation8 + $0x44] ss:$16 sps:$4 sm:$0xff]  }
  0x92   :  { %1010 = vmatprep.subr.bf16.mxu0 %v3610_v44  ;;  %1053 = vmatprep.subr.bf16.mxu1 %v3612_v59  ;;  %v188_v44 = vld [vmem:[#allocation5 + $0x290] sm:$0xff]  ;;  %v3683_v59 = vcombine.low %v205_v32, %v209_v33  ;;  %v4074_v32 = vld [vmem:[#allocation8 + $0x240] ss:$16 sps:$4 sm:$0xff]   ;;  %v4079_v33 = vld [vmem:[#allocation8 + $0x24] ss:$16 sps:$4 sm:$0xff]  }
  0x93   :  { %v3666_v54 = vcombine.high %v188_v44, %v192_v45  ;;  %v3665_v58 = vcombine.low %v188_v44, %v192_v45  ;;  %v4092_v44 = vld [vmem:[#allocation8 + $0x3e0] ss:$16 sps:$4 sm:$0xff]   ;;  %v4097_v45 = vld [vmem:[#allocation8 + $0x1c4] ss:$16 sps:$4 sm:$0xff]  }
  0x95   :  { %1011 = vmatpush1.bf16.msra.mxu0 %v3609_v49  ;;  %1054 = vmatpush1.bf16.msra.mxu1 %v3611_v52  ;;  %v3676_v49 = vcombine.high %v197_v40, %v201_v41  ;;  %v184_v52 = vld [vmem:[#allocation5 + $0x270] sm:$0xff] }
  0x96   :  { %1012 = vmatprep.subr.bf16.mxu0 %v3602_v53  ;;  %1055 = vmatprep.subr.bf16.mxu1 %v3604_v56  ;;  %v3675_v53 = vcombine.low %v197_v40, %v201_v41  ;;  %v185_v56 = vld [vmem:[#allocation5 + $0x278] sm:$0xff]  ;;  %v3658_v63 = vcombine.high %v180_v51, %v184_v52  ;;  %v3657_v3 = vcombine.low %v180_v51, %v184_v52 }
  0x97   :  { %v3659_v4 = vcombine.low %v181_v55, %v185_v56  ;;  %v4086_v40 = vld [vmem:[#allocation8 + $0x200] ss:$16 sps:$4 sm:$0xff]   ;;  %v4091_v41 = vld [vmem:[#allocation8 + $0x1e4] ss:$16 sps:$4 sm:$0xff]  }
  0x98   :  { %v4104_v51 = vld [vmem:[#allocation8 + $0x3a0] ss:$16 sps:$4 sm:$0xff]   ;;  %v4109_v52 = vld [vmem:[#allocation8 + $0x184] ss:$16 sps:$4 sm:$0xff]  }
  0x99   :  { %1013 = vmatpush1.bf16.msra.mxu0 %v3601_v57  ;;  %1056 = vmatpush1.bf16.msra.mxu1 %v3603_v61  ;;  %v3668_v57 = vcombine.high %v189_v47, %v193_v48  ;;  %v176_v61 = vld [vmem:[#allocation5 + $0x230] sm:$0xff] }
  0x9a   :  { %1014 = vmatprep.subr.bf16.mxu0 %v3594_v62  ;;  %1057 = vmatprep.subr.bf16.mxu1 %v3596_v1  ;;  %v3667_v62 = vcombine.low %v189_v47, %v193_v48  ;;  %v177_v1 = vld [vmem:[#allocation5 + $0x238] sm:$0xff]  ;;  %v3649_v8 = vcombine.low %v172_v60, %v176_v61 }
  0x9b   :  { %v4098_v47 = vld [vmem:[#allocation8 + $0x3c0] ss:$16 sps:$4 sm:$0xff]   ;;  %v4103_v48 = vld [vmem:[#allocation8 + $0x1a4] ss:$16 sps:$4 sm:$0xff]  }
  0x9d   :  { %1015 = vmatpush1.bf16.msra.mxu0 %v3593_v2  ;;  %1058 = vmatpush1.bf16.msra.mxu1 %v3595_v5  ;;  %v3660_v2 = vcombine.high %v181_v55, %v185_v56  ;;  %v3650_v5 = vcombine.high %v172_v60, %v176_v61  ;;  %v4110_v55 = vld [vmem:[#allocation8 + $0x380] ss:$16 sps:$4 sm:$0xff]   ;;  %v4115_v56 = vld [vmem:[#allocation8 + $0x164] ss:$16 sps:$4 sm:$0xff]  }
  0x9e   :  { %1016 = vmatprep.subr.bf16.mxu0 %v3586_v6  ;;  %1059 = vmatprep.subr.bf16.mxu1 %v3588_v9  ;;  %v3652_v6 = vcombine.high %v173_v0, %v177_v1  ;;  %v4046_v9 = vld [vmem:[#allocation8 + $0x2e4] ss:$16 sps:$4 sm:$0xff]   ;;  %v4116_v60 = vld [vmem:[#allocation8 + $0x360] ss:$16 sps:$4 sm:$0xff]  }
  0x9f   :  { %v4121_v61 = vld [vmem:[#allocation8 + $0x144] ss:$16 sps:$4 sm:$0xff]  }
  0xa1   :  { %1017 = vmatpush1.bf16.msra.mxu0 %v3585_v10  ;;  %1060 = vmatpush1.bf16.msra.mxu1 %v3587_v13  ;;  %v3651_v10 = vcombine.low %v173_v0, %v177_v1  ;;  %v4049_v13 = vld [vmem:[#allocation8 + $0xc4] ss:$16 sps:$4 sm:$0xff]   ;;  %v4122_v0 = vld [vmem:[#allocation8 + $0x340] ss:$16 sps:$4 sm:$0xff]  }
  0xa2   :  { %1018 = vmatprep.subr.bf16.mxu0 %v3706_v14  ;;  %1061 = vmatprep.subr.bf16.mxu1 %v3708_v18  ;;  %v4052_v14 = vld [vmem:[#allocation8 + $0x2c4] ss:$16 sps:$4 sm:$0xff]  }
  0xa3   :  { %v4055_v18 = vld [vmem:[#allocation8 + $0xa4] ss:$16 sps:$4 sm:$0xff]  }
  0xa4   :  { %v4127_v1 = vld [vmem:[#allocation8 + $0x124] ss:$16 sps:$4 sm:$0xff]  }
  0xa5   :  { %1019 = vmatpush2.bf16.msra.mxu0 %v3705_v19  ;;  %1062 = vmatpush2.bf16.msra.mxu1 %v3707_v22  ;;  %v4053_v19 = vld [vmem:[#allocation8 + $0xa0] ss:$16 sps:$4 sm:$0xff]   ;;  %v4061_v22 = vld [vmem:[#allocation8 + $0x84] ss:$16 sps:$4 sm:$0xff]  }
  0xa6   :  { %1020 = vmatprep.subr.bf16.mxu0 %v3698_v23  ;;  %1063 = vmatprep.subr.bf16.mxu1 %v3700_v26  ;;  %v4059_v23 = vld [vmem:[#allocation8 + $0x80] ss:$16 sps:$4 sm:$0xff]  }
  0xa7   :  { %v4065_v26 = vld [vmem:[#allocation8 + $0x60] ss:$16 sps:$4 sm:$0xff]  }
  0xa9   :  { %1021 = vmatpush2.bf16.msra.mxu0 %v3697_v27  ;;  %1064 = vmatpush2.bf16.msra.mxu1 %v3699_v30  ;;  %v4070_v27 = vld [vmem:[#allocation8 + $0x264] ss:$16 sps:$4 sm:$0xff]   ;;  %v4071_v30 = vld [vmem:[#allocation8 + $0x40] ss:$16 sps:$4 sm:$0xff]  }
  0xaa   :  { %1022 = vmatprep.subr.bf16.mxu0 %v3690_v31  ;;  %1065 = vmatprep.subr.bf16.mxu1 %v3692_v34  ;;  %v4076_v31 = vld [vmem:[#allocation8 + $0x244] ss:$16 sps:$4 sm:$0xff]   ;;  %v4077_v34 = vld [vmem:[#allocation8 + $0x20] ss:$16 sps:$4 sm:$0xff]  }
  0xad   :  { %1023 = vmatpush2.bf16.msra.mxu0 %v3689_v35  ;;  %1066 = vmatpush2.bf16.msra.mxu1 %v3691_v38  ;;  %v4082_v35 = vld [vmem:[#allocation8 + $0x224] ss:$16 sps:$4 sm:$0xff]   ;;  %v4083_v38 = vld [vmem:[#allocation8] ss:$16 sps:$4 sm:$0xff]  }
  0xae   :  { %1024 = vmatprep.subr.bf16.mxu0 %v3682_v39  ;;  %1067 = vmatprep.subr.bf16.mxu1 %v3684_v42  ;;  %v4088_v39 = vld [vmem:[#allocation8 + $0x204] ss:$16 sps:$4 sm:$0xff]   ;;  %v4089_v42 = vld [vmem:[#allocation8 + $0x1e0] ss:$16 sps:$4 sm:$0xff]  }
  0xb1   :  { %1025 = vmatpush2.bf16.msra.mxu0 %v3681_v43  ;;  %1068 = vmatpush2.bf16.msra.mxu1 %v3683_v59  ;;  %v4094_v43 = vld [vmem:[#allocation8 + $0x3e4] ss:$16 sps:$4 sm:$0xff]   ;;  %v4095_v59 = vld [vmem:[#allocation8 + $0x1c0] ss:$16 sps:$4 sm:$0xff]  }
  0xb2   :  { %1026 = vmatprep.subr.bf16.mxu0 %v3674_v46  ;;  %1069 = vmatprep.subr.bf16.mxu1 %v3676_v49  ;;  %v4100_v46 = vld [vmem:[#allocation8 + $0x3c4] ss:$16 sps:$4 sm:$0xff]   ;;  %v4101_v49 = vld [vmem:[#allocation8 + $0x1a0] ss:$16 sps:$4 sm:$0xff]  }
  0xb5   :  { %1027 = vmatpush2.bf16.msra.mxu0 %v3673_v50  ;;  %1070 = vmatpush2.bf16.msra.mxu1 %v3675_v53  ;;  %v4106_v50 = vld [vmem:[#allocation8 + $0x3a4] ss:$16 sps:$4 sm:$0xff]   ;;  %v4107_v53 = vld [vmem:[#allocation8 + $0x180] ss:$16 sps:$4 sm:$0xff]  }
  0xb6   :  { %1028 = vmatprep.subr.bf16.mxu0 %v3666_v54  ;;  %1071 = vmatprep.subr.bf16.mxu1 %v3668_v57  ;;  %v4112_v54 = vld [vmem:[#allocation8 + $0x384] ss:$16 sps:$4 sm:$0xff]   ;;  %v4113_v57 = vld [vmem:[#allocation8 + $0x160] ss:$16 sps:$4 sm:$0xff]  }
  0xb9   :  { %1029 = vmatpush2.bf16.msra.mxu0 %v3665_v58  ;;  %1072 = vmatpush2.bf16.msra.mxu1 %v3667_v62  ;;  %v4118_v58 = vld [vmem:[#allocation8 + $0x364] ss:$16 sps:$4 sm:$0xff]  }
  0xba   :  { %1030 = vmatprep.subr.bf16.mxu0 %v3658_v63  ;;  %1073 = vmatprep.subr.bf16.mxu1 %v3660_v2  ;;  %v4124_v62 = vld [vmem:[#allocation8 + $0x344] ss:$16 sps:$4 sm:$0xff]   ;;  %v4119_v63 = vld [vmem:[#allocation8 + $0x140] ss:$16 sps:$4 sm:$0xff]  }
  0xbb   :  { %v4130_v2 = vld [vmem:[#allocation8 + $0x324] ss:$16 sps:$4 sm:$0xff]  }
  0xbd   :  { %1031 = vmatpush2.bf16.msra.mxu0 %v3657_v3  ;;  %1074 = vmatpush2.bf16.msra.mxu1 %v3659_v4  ;;  %v4125_v3 = vld [vmem:[#allocation8 + $0x120] ss:$16 sps:$4 sm:$0xff]  }
  0xbe   :  { %1032 = vmatprep.subr.bf16.mxu0 %v3650_v5  ;;  %1075 = vmatprep.subr.bf16.mxu1 %v3652_v6  ;;  %v4128_v4 = vld [vmem:[#allocation8 + $0x320] ss:$16 sps:$4 sm:$0xff]   ;;  %v4133_v5 = vld [vmem:[#allocation8 + $0x104] ss:$16 sps:$4 sm:$0xff]  }
  0xbf   :  { %v4136_v6 = vld [vmem:[#allocation8 + $0x304] ss:$16 sps:$4 sm:$0xff]  }
  0xc1   :  { %1033 = vmatpush2.bf16.msra.mxu0 %v3649_v8  ;;  %1076 = vmatpush2.bf16.msra.mxu1 %v3651_v10  ;;  %v4134_v8 = vld [vmem:[#allocation8 + $0x300] ss:$16 sps:$4 sm:$0xff]   ;;  %v4142_v10 = vld [vmem:[#allocation8 + $0x6e4] ss:$16 sps:$4 sm:$0xff]  }
  0xc2   :  { %2686 = vmatprep.subr.bf16.mxu0 %v4043_v7  ;;  %2729 = vmatprep.subr.bf16.mxu1 %v4046_v9  ;;  %v4131_v7 = vld [vmem:[#allocation8 + $0x100] ss:$16 sps:$4 sm:$0xff]   ;;  %v4139_v9 = vld [vmem:[#allocation8 + $0x4e4] ss:$16 sps:$4 sm:$0xff]  }
  0xc4   :  { %1035 = vmatmul.mubr.bf16.vlgmr.msra.gmra.mxu0 %v4710_v15  ;;  %1078 = vmatmul.mubr.bf16.vlgmr.msra.gmra.mxu1 %v4710_v15  ;;  %v4062_v15 = vld [vmem:[#allocation8 + $0x280] ss:$16 sps:$4 sm:$0xff]  }
  0xc5   :  { %2687 = vmatpush1.bf16.msra.mxu0 %v4041_v11  ;;  %2730 = vmatpush1.bf16.msra.mxu1 %v4044_v12  ;;  %v236_v11 = vlaneseq }
  0xc6   :  { %2688 = vmatprep.subr.bf16.mxu0 %v4049_v13  ;;  %2731 = vmatprep.subr.bf16.mxu1 %v4052_v14 }
  0xc7   :  { %v4718_v12 = vshrl.u32 %v236_v11, 7  ;;  %v4164_v11 = vld [vmem:[#allocation8 + $0x660] ss:$16 sps:$4 sm:$0xff]  }
  0xc9   :  { %2689 = vmatpush1.bf16.msra.mxu0 %v4047_v16  ;;  %2732 = vmatpush1.bf16.msra.mxu1 %v4050_v17  ;;  %v4721_v13 = vsub.s32 1, %v4718_v12  ;;  %v4724_v14 = vsub.s32 0, %v4718_v12  ;;  %v250_v16 = vsub.s32 3, %v4718_v12  ;;  %v4727_v17 = vld [vmem:[#allocation7] sm:$0xff] }
  0xca   :  { %2690 = vmatprep.subr.bf16.mxu0 %v4055_v18  ;;  %2733 = vmatprep.subr.bf16.mxu1 %v4058_v20  ;;  %v246_v18 = vsub.s32 2, %v4718_v12 }
  0xcb   :  { %v239_v20 = vrot.slane %v4727_v17, %v4724_v14 }
  0xcd   :  { %2691 = vmatpush1.bf16.msra.mxu0 %v4053_v19  ;;  %2734 = vmatpush1.bf16.msra.mxu1 %v4056_v21  ;;  %v243_v19 = vrot.slane %v4727_v17, %v4721_v13 }
  0xce   :  { %2692 = vmatprep.subr.bf16.mxu0 %v4061_v22  ;;  %2735 = vmatprep.subr.bf16.mxu1 %v4064_v24  ;;  %v251_v22 = vrot.slane %v4727_v17, %v250_v16 }
  0xd1   :  { %2693 = vmatpush1.bf16.msra.mxu0 %v4059_v23  ;;  %2736 = vmatpush1.bf16.msra.mxu1 %v4062_v15  ;;  %v247_v23 = vrot.slane %v4727_v17, %v246_v18 }
  0xd2   :  { %2694 = vmatprep.subr.bf16.mxu0 %v4067_v25  ;;  %2737 = vmatprep.subr.bf16.mxu1 %v4070_v27 }
  0xd5   :  { %2695 = vmatpush1.bf16.msra.mxu0 %v4065_v26  ;;  %2738 = vmatpush1.bf16.msra.mxu1 %v4068_v28 }
  0xd6   :  { %2696 = vmatprep.subr.bf16.mxu0 %v4073_v29  ;;  %2739 = vmatprep.subr.bf16.mxu1 %v4076_v31 }
  0xd9   :  { %2697 = vmatpush1.bf16.msra.mxu0 %v4071_v30  ;;  %2740 = vmatpush1.bf16.msra.mxu1 %v4074_v32 }
  0xda   :  { %2698 = vmatprep.subr.bf16.mxu0 %v4079_v33  ;;  %2741 = vmatprep.subr.bf16.mxu1 %v4082_v35 }
  0xdd   :  { %2699 = vmatpush1.bf16.msra.mxu0 %v4077_v34  ;;  %2742 = vmatpush1.bf16.msra.mxu1 %v4080_v36 }
  0xde   :  { %2700 = vmatprep.subr.bf16.mxu0 %v4085_v37  ;;  %2743 = vmatprep.subr.bf16.mxu1 %v4088_v39 }
  0xe1   :  { %2701 = vmatpush1.bf16.msra.mxu0 %v4083_v38  ;;  %2744 = vmatpush1.bf16.msra.mxu1 %v4086_v40 }
  0xe2   :  { %2702 = vmatprep.subr.bf16.mxu0 %v4091_v41  ;;  %2745 = vmatprep.subr.bf16.mxu1 %v4094_v43 }
  0xe5   :  { %2703 = vmatpush2.bf16.msra.mxu0 %v4089_v42  ;;  %2746 = vmatpush2.bf16.msra.mxu1 %v4092_v44 }
  0xe6   :  { %2704 = vmatprep.subr.bf16.mxu0 %v4097_v45  ;;  %2747 = vmatprep.subr.bf16.mxu1 %v4100_v46 }
  0xe9   :  { %2705 = vmatpush2.bf16.msra.mxu0 %v4095_v59  ;;  %2748 = vmatpush2.bf16.msra.mxu1 %v4098_v47 }
  0xea   :  { %2706 = vmatprep.subr.bf16.mxu0 %v4103_v48  ;;  %2749 = vmatprep.subr.bf16.mxu1 %v4106_v50 }
  0xed   :  { %2707 = vmatpush2.bf16.msra.mxu0 %v4101_v49  ;;  %2750 = vmatpush2.bf16.msra.mxu1 %v4104_v51 }
  0xee   :  { %2708 = vmatprep.subr.bf16.mxu0 %v4109_v52  ;;  %2751 = vmatprep.subr.bf16.mxu1 %v4112_v54  ;;  %v4137_v54 = vld [vmem:[#allocation8 + $0x4e0] ss:$16 sps:$4 sm:$0xff]  }
  0xf1   :  { %2709 = vmatpush2.bf16.msra.mxu0 %v4107_v53  ;;  %2752 = vmatpush2.bf16.msra.mxu1 %v4110_v55 }
  0xf2   :  { %2710 = vmatprep.subr.bf16.mxu0 %v4115_v56  ;;  %2753 = vmatprep.subr.bf16.mxu1 %v4118_v58  ;;  %v4145_v58 = vld [vmem:[#allocation8 + $0x4c4] ss:$16 sps:$4 sm:$0xff]  }
  0xf5   :  { %2711 = vmatpush2.bf16.msra.mxu0 %v4113_v57  ;;  %2754 = vmatpush2.bf16.msra.mxu1 %v4116_v60  ;;  %v4140_v57 = vld [vmem:[#allocation8 + $0x6e0] ss:$16 sps:$4 sm:$0xff]  }
  0xf6   :  { %2712 = vmatprep.subr.bf16.mxu0 %v4121_v61  ;;  %2755 = vmatprep.subr.bf16.mxu1 %v4124_v62  ;;  %v4148_v61 = vld [vmem:[#allocation8 + $0x6c4] ss:$16 sps:$4 sm:$0xff]   ;;  %v4143_v62 = vld [vmem:[#allocation8 + $0x4c0] ss:$16 sps:$4 sm:$0xff]  }
  0xf9   :  { %2713 = vmatpush2.bf16.msra.mxu0 %v4119_v63  ;;  %2756 = vmatpush2.bf16.msra.mxu1 %v4122_v0  ;;  %v4146_v63 = vld [vmem:[#allocation8 + $0x6c0] ss:$16 sps:$4 sm:$0xff]   ;;  %v4151_v0 = vld [vmem:[#allocation8 + $0x4a4] ss:$16 sps:$4 sm:$0xff]  }
  0xfa   :  { %2714 = vmatprep.subr.bf16.mxu0 %v4127_v1  ;;  %2757 = vmatprep.subr.bf16.mxu1 %v4130_v2  ;;  %v4154_v1 = vld [vmem:[#allocation8 + $0x6a4] ss:$16 sps:$4 sm:$0xff]   ;;  %v4149_v2 = vld [vmem:[#allocation8 + $0x4a0] ss:$16 sps:$4 sm:$0xff]  }
  0xfd   :  { %2715 = vmatpush2.bf16.msra.mxu0 %v4125_v3  ;;  %2758 = vmatpush2.bf16.msra.mxu1 %v4128_v4  ;;  %v4152_v3 = vld [vmem:[#allocation8 + $0x6a0] ss:$16 sps:$4 sm:$0xff]   ;;  %v4157_v4 = vld [vmem:[#allocation8 + $0x484] ss:$16 sps:$4 sm:$0xff]  }
  0xfe   :  { %2716 = vmatprep.subr.bf16.mxu0 %v4133_v5  ;;  %2759 = vmatprep.subr.bf16.mxu1 %v4136_v6  ;;  %v4160_v5 = vld [vmem:[#allocation8 + $0x684] ss:$16 sps:$4 sm:$0xff]   ;;  %v4155_v6 = vld [vmem:[#allocation8 + $0x480] ss:$16 sps:$4 sm:$0xff]  }
 0x101   :  { %2717 = vmatpush2.bf16.msra.mxu0 %v4131_v7  ;;  %2760 = vmatpush2.bf16.msra.mxu1 %v4134_v8  ;;  %v4158_v7 = vld [vmem:[#allocation8 + $0x680] ss:$16 sps:$4 sm:$0xff]   ;;  %v4163_v8 = vld [vmem:[#allocation8 + $0x464] ss:$16 sps:$4 sm:$0xff]  }
 0x102   :  { %2772 = vmatprep.subr.bf16.mxu0 %v4139_v9  ;;  %2815 = vmatprep.subr.bf16.mxu1 %v4142_v10  ;;  %v4166_v9 = vld [vmem:[#allocation8 + $0x664] ss:$16 sps:$4 sm:$0xff]   ;;  %v4161_v10 = vld [vmem:[#allocation8 + $0x460] ss:$16 sps:$4 sm:$0xff]  }
 0x144   :  { %v950_v21 = vpop.f32.mrf.mxu0  ;;  %v993_v24 = vpop.f32.mrf.mxu1 }
 0x145   :  { %v951_v27 = vadd.f32 %v950_v21, %v239_v20  ;;  %v994_v30 = vadd.f32 %v993_v24, %v247_v23  ;;  %v4167_v21 = vld [vmem:[#allocation8 + $0x440] ss:$16 sps:$4 sm:$0xff]   ;;  %v4178_v24 = vld [vmem:[#allocation8 + $0x624] ss:$16 sps:$4 sm:$0xff]  }
 0x146   :  { %v952_v15 = vpop.f32.mrf.mxu0  ;;  %v995_v26 = vpop.f32.mrf.mxu1 }
 0x147   :  { %v953_v25 = vadd.f32 %v952_v15, %v243_v19  ;;  %v996_v28 = vadd.f32 %v995_v26, %v251_v22  ;;  %v1088_v39 = vmul.f32 0.2, %v951_v27  ;;  %v1090_v43 = vmul.f32 0.2, %v994_v30  ;;  %v4173_v15 = vld [vmem:[#allocation8 + $0x420] ss:$16 sps:$4 sm:$0xff]  }
 0x148   :  { %v954_v29 = vpop.f32.mrf.mxu0  ;;  %v997_v32 = vpop.f32.mrf.mxu1  ;;  %v4181_v26 = vld [vmem:[#allocation8 + $0x404] ss:$16 sps:$4 sm:$0xff]  }
 0x149   :  { %v955_v31 = vadd.f32 %v954_v29, %v239_v20  ;;  %v998_v33 = vadd.f32 %v997_v32, %v247_v23  ;;  %v1089_v35 = vmul.f32 0.2, %v953_v25  ;;  %v1091_v40 = vmul.f32 0.2, %v996_v28  ;;  %v4172_v20 = vld [vmem:[#allocation8 + $0x644] ss:$16 sps:$4 sm:$0xff]  }
 0x14a   :  { %v956_v34 = vpop.f32.mrf.mxu0  ;;  %v999_v38 = vpop.f32.mrf.mxu1  ;;  %v1104_v49 = vmax.f32 %v951_v27, %v1088_v39  ;;  %v1106_v52 = vmax.f32 %v994_v30, %v1090_v43  ;;  %v4175_v23 = vld [vmem:[#allocation8 + $0x424] ss:$16 sps:$4 sm:$0xff]   ;;  %v4182_v29 = vld [vmem:[#allocation8 + $0x600] ss:$16 sps:$4 sm:$0xff]  }
 0x14b   :  { %v1096_v36 = vmul.f32 0.2, %v955_v31  ;;  %v957_v37 = vadd.f32 %v956_v34, %v243_v19  ;;  %v1098_v41 = vmul.f32 0.2, %v998_v33  ;;  %v1000_v42 = vadd.f32 %v999_v38, %v251_v22  ;;  %v4169_v19 = vld [vmem:[#allocation8 + $0x444] ss:$16 sps:$4 sm:$0xff]  }
 0x14c   :  { %v1105_v46 = vmax.f32 %v953_v25, %v1089_v35  ;;  %v1107_v50 = vmax.f32 %v996_v28, %v1091_v40  ;;  %v4170_v22 = vld [vmem:[#allocation8 + $0x640] ss:$16 sps:$4 sm:$0xff]   ;;  %v4184_v27 = vld [vmem:[#allocation8 + $0x604] ss:$16 sps:$4 sm:$0xff]  }
 0x14d   :  { %v1097_v44 = vmul.f32 0.2, %v957_v37  ;;  %v1112_v45 = vmax.f32 %v955_v31, %v1096_v36  ;;  %v1099_v59 = vmul.f32 0.2, %v1000_v42  ;;  %v1114_v47 = vmax.f32 %v998_v33, %v1098_v41  ;;  %v4176_v25 = vld [vmem:[#allocation8 + $0x620] ss:$16 sps:$4 sm:$0xff]  }
 0x14e   :  { %v4179_v28 = vld [vmem:[#allocation8 + $0x400] ss:$16 sps:$4 sm:$0xff]   ;;  %v4187_v30 = vld [vmem:[#allocation8 + $0x5e4] ss:$16 sps:$4 sm:$0xff]  }
 0x14f   :  { %v1113_v48 = vmax.f32 %v957_v37, %v1097_v44  ;;  %v1115_v51 = vmax.f32 %v1000_v42, %v1099_v59  ;;  %v4742_v55 = vpack.c.bf16 %v1112_v45, %v1104_v49  ;;  %v4746_v60 = vpack.c.bf16 %v1114_v47, %v1106_v52  ;;  %v4190_v31 = vld [vmem:[#allocation8 + $0x7e4] ss:$16 sps:$4 sm:$0xff]   ;;  %v4185_v32 = vld [vmem:[#allocation8 + $0x5e0] ss:$16 sps:$4 sm:$0xff]  }
 0x150   :  { %v4188_v33 = vld [vmem:[#allocation8 + $0x7e0] ss:$16 sps:$4 sm:$0xff]   ;;  %v4193_v34 = vld [vmem:[#allocation8 + $0x5c4] ss:$16 sps:$4 sm:$0xff]   ;;  %v258_v47 = vsub.s32 5, %v4718_v12  ;;  %v266_v49 = vsub.s32 7, %v4718_v12 }
 0x151   :  { %v4740_v53 = vpack.c.bf16 %v1113_v48, %v1105_v46  ;;  %v4744_v56 = vpack.c.bf16 %v1115_v51, %v1107_v50  ;;  %v4196_v35 = vld [vmem:[#allocation8 + $0x7c4] ss:$16 sps:$4 sm:$0xff]   ;;  %v4191_v36 = vld [vmem:[#allocation8 + $0x5c0] ss:$16 sps:$4 sm:$0xff]   ;;  %v254_v48 = vsub.s32 4, %v4718_v12  ;;  %v262_v51 = vsub.s32 6, %v4718_v12 }
 0x152   :  { %v4194_v37 = vld [vmem:[#allocation8 + $0x7c0] ss:$16 sps:$4 sm:$0xff]   ;;  %v4199_v38 = vld [vmem:[#allocation8 + $0x5a4] ss:$16 sps:$4 sm:$0xff]  }
 0x153   :  { %2718 = vmatprep.mubr.bf16.mxu0 %v4740_v53  ;;  %2761 = vmatprep.mubr.bf16.mxu1 %v4744_v56  ;;  %v4202_v39 = vld [vmem:[#allocation8 + $0x7a4] ss:$16 sps:$4 sm:$0xff]   ;;  %v4197_v40 = vld [vmem:[#allocation8 + $0x5a0] ss:$16 sps:$4 sm:$0xff]  }
 0x154   :  { %2719 = vmatmul.mubr.bf16.vlgmr.msra.gmra.mxu0 %v4742_v55  ;;  %2762 = vmatmul.mubr.bf16.vlgmr.msra.gmra.mxu1 %v4746_v60  ;;  %v4200_v41 = vld [vmem:[#allocation8 + $0x7a0] ss:$16 sps:$4 sm:$0xff]   ;;  %v4205_v42 = vld [vmem:[#allocation8 + $0x584] ss:$16 sps:$4 sm:$0xff]  }
 0x155   :  { %2773 = vmatpush1.bf16.msra.mxu0 %v4137_v54  ;;  %2816 = vmatpush1.bf16.msra.mxu1 %v4140_v57  ;;  %v4208_v43 = vld [vmem:[#allocation8 + $0x784] ss:$16 sps:$4 sm:$0xff]   ;;  %v4203_v44 = vld [vmem:[#allocation8 + $0x580] ss:$16 sps:$4 sm:$0xff]   ;;  %v259_v57 = vrot.slane %v4727_v17, %v258_v47 }
 0x156   :  { %2774 = vmatprep.subr.bf16.mxu0 %v4145_v58  ;;  %2817 = vmatprep.subr.bf16.mxu1 %v4148_v61  ;;  %v4206_v45 = vld [vmem:[#allocation8 + $0x780] ss:$16 sps:$4 sm:$0xff]   ;;  %v4211_v59 = vld [vmem:[#allocation8 + $0x564] ss:$16 sps:$4 sm:$0xff]   ;;  %v255_v61 = vrot.slane %v4727_v17, %v254_v48 }
 0x157   :  { %v4214_v46 = vld [vmem:[#allocation8 + $0x764] ss:$16 sps:$4 sm:$0xff]   ;;  %v4209_v50 = vld [vmem:[#allocation8 + $0x560] ss:$16 sps:$4 sm:$0xff]  }
 0x158   :  { %v4212_v52 = vld [vmem:[#allocation8 + $0x760] ss:$16 sps:$4 sm:$0xff]   ;;  %v4217_v54 = vld [vmem:[#allocation8 + $0x544] ss:$16 sps:$4 sm:$0xff]  }
 0x159   :  { %2775 = vmatpush1.bf16.msra.mxu0 %v4143_v62  ;;  %2818 = vmatpush1.bf16.msra.mxu1 %v4146_v63  ;;  %v4220_v58 = vld [vmem:[#allocation8 + $0x744] ss:$16 sps:$4 sm:$0xff]   ;;  %v267_v63 = vrot.slane %v4727_v17, %v266_v49  ;;  %v4233_v49 = vld [vmem:[#allocation8 + $0xe8] ss:$16 sps:$4 sm:$0xff]  }
 0x15a   :  { %2776 = vmatprep.subr.bf16.mxu0 %v4151_v0  ;;  %2819 = vmatprep.subr.bf16.mxu1 %v4154_v1  ;;  %v263_v0 = vrot.slane %v4727_v17, %v262_v51  ;;  %v4221_v17 = vld [vmem:[#allocation8 + $0x520] ss:$16 sps:$4 sm:$0xff]  }
 0x15d   :  { %2777 = vmatpush1.bf16.msra.mxu0 %v4149_v2  ;;  %2820 = vmatpush1.bf16.msra.mxu1 %v4152_v3  ;;  %v4215_v2 = vld [vmem:[#allocation8 + $0x540] ss:$16 sps:$4 sm:$0xff]  }
 0x15e   :  { %2778 = vmatprep.subr.bf16.mxu0 %v4157_v4  ;;  %2821 = vmatprep.subr.bf16.mxu1 %v4160_v5  ;;  %v4218_v4 = vld [vmem:[#allocation8 + $0x740] ss:$16 sps:$4 sm:$0xff]   ;;  %v4223_v5 = vld [vmem:[#allocation8 + $0x524] ss:$16 sps:$4 sm:$0xff]  }
 0x161   :  { %2779 = vmatpush1.bf16.msra.mxu0 %v4155_v6  ;;  %2822 = vmatpush1.bf16.msra.mxu1 %v4158_v7 }
 0x162   :  { %2780 = vmatprep.subr.bf16.mxu0 %v4163_v8  ;;  %2823 = vmatprep.subr.bf16.mxu1 %v4166_v9  ;;  %v4226_v8 = vld [vmem:[#allocation8 + $0x724] ss:$16 sps:$4 sm:$0xff]  }
 0x165   :  { %2781 = vmatpush1.bf16.msra.mxu0 %v4161_v10  ;;  %2824 = vmatpush1.bf16.msra.mxu1 %v4164_v11 }
 0x166   :  { %2782 = vmatprep.subr.bf16.mxu0 %v4169_v19  ;;  %2825 = vmatprep.subr.bf16.mxu1 %v4172_v20 }
 0x169   :  { %2783 = vmatpush1.bf16.msra.mxu0 %v4167_v21  ;;  %2826 = vmatpush1.bf16.msra.mxu1 %v4170_v22 }
 0x16a   :  { %2784 = vmatprep.subr.bf16.mxu0 %v4175_v23  ;;  %2827 = vmatprep.subr.bf16.mxu1 %v4178_v24  ;;  %v4224_v24 = vld [vmem:[#allocation8 + $0x720] ss:$16 sps:$4 sm:$0xff]  }
 0x16d   :  { %2785 = vmatpush1.bf16.msra.mxu0 %v4173_v15  ;;  %2828 = vmatpush1.bf16.msra.mxu1 %v4176_v25  ;;  %v4229_v15 = vld [vmem:[#allocation8 + $0x504] ss:$16 sps:$4 sm:$0xff]  }
 0x16e   :  { %2786 = vmatprep.subr.bf16.mxu0 %v4181_v26  ;;  %2829 = vmatprep.subr.bf16.mxu1 %v4184_v27 }
 0x171   :  { %2787 = vmatpush1.bf16.msra.mxu0 %v4179_v28  ;;  %2830 = vmatpush1.bf16.msra.mxu1 %v4182_v29  ;;  %v4232_v29 = vld [vmem:[#allocation8 + $0x704] ss:$16 sps:$4 sm:$0xff]  }
 0x172   :  { %2788 = vmatprep.subr.bf16.mxu0 %v4187_v30  ;;  %2831 = vmatprep.subr.bf16.mxu1 %v4190_v31 }
 0x175   :  { %2789 = vmatpush2.bf16.msra.mxu0 %v4185_v32  ;;  %2832 = vmatpush2.bf16.msra.mxu1 %v4188_v33 }
 0x176   :  { %2790 = vmatprep.subr.bf16.mxu0 %v4193_v34  ;;  %2833 = vmatprep.subr.bf16.mxu1 %v4196_v35 }
 0x179   :  { %2791 = vmatpush2.bf16.msra.mxu0 %v4191_v36  ;;  %2834 = vmatpush2.bf16.msra.mxu1 %v4194_v37  ;;  %v4227_v36 = vld [vmem:[#allocation8 + $0x500] ss:$16 sps:$4 sm:$0xff]  }
 0x17a   :  { %2792 = vmatprep.subr.bf16.mxu0 %v4199_v38  ;;  %2835 = vmatprep.subr.bf16.mxu1 %v4202_v39  ;;  %v4230_v39 = vld [vmem:[#allocation8 + $0x700] ss:$16 sps:$4 sm:$0xff]  }
 0x17d   :  { %2793 = vmatpush2.bf16.msra.mxu0 %v4197_v40  ;;  %2836 = vmatpush2.bf16.msra.mxu1 %v4200_v41  ;;  %v4235_v40 = vld [vmem:[#allocation8 + $0xec] ss:$16 sps:$4 sm:$0xff]  }
 0x17e   :  { %2794 = vmatprep.subr.bf16.mxu0 %v4205_v42  ;;  %2837 = vmatprep.subr.bf16.mxu1 %v4208_v43 }
 0x181   :  { %2795 = vmatpush2.bf16.msra.mxu0 %v4203_v44  ;;  %2838 = vmatpush2.bf16.msra.mxu1 %v4206_v45  ;;  %v4238_v44 = vld [vmem:[#allocation8 + $0x2ec] ss:$16 sps:$4 sm:$0xff]  }
 0x182   :  { %2796 = vmatprep.subr.bf16.mxu0 %v4211_v59  ;;  %2839 = vmatprep.subr.bf16.mxu1 %v4214_v46 }
 0x184   :  { %v1036_v62 = vpop.f32.mrf.mxu0  ;;  %v1079_v1 = vpop.f32.mrf.mxu1 }
 0x185   :  { %2797 = vmatpush2.bf16.msra.mxu0 %v4209_v50  ;;  %2840 = vmatpush2.bf16.msra.mxu1 %v4212_v52  ;;  %v1037_v9 = vadd.f32 %v1036_v62, %v255_v61  ;;  %v1080_v19 = vadd.f32 %v1079_v1, %v263_v0  ;;  %v4236_v52 = vld [vmem:[#allocation8 + $0x2e8] ss:$16 sps:$4 sm:$0xff]  }
 0x186   :  { %v1038_v3 = vpop.f32.mrf.mxu0  ;;  %2798 = vmatprep.subr.bf16.mxu0 %v4217_v54  ;;  %v1081_v7 = vpop.f32.mrf.mxu1  ;;  %2841 = vmatprep.subr.bf16.mxu1 %v4220_v58  ;;  %v4244_v58 = vld [vmem:[#allocation8 + $0x2cc] ss:$16 sps:$4 sm:$0xff]   ;;  %v4242_v62 = vld [vmem:[#allocation8 + $0x2c8] ss:$16 sps:$4 sm:$0xff]  }
 0x187   :  { %v1039_v6 = vadd.f32 %v1038_v3, %v259_v57  ;;  %v1082_v10 = vadd.f32 %v1081_v7, %v267_v63  ;;  %v1092_v30 = vmul.f32 0.2, %v1037_v9  ;;  %v1094_v34 = vmul.f32 0.2, %v1080_v19  ;;  %v4245_v1 = vld [vmem:[#allocation8 + $0xa8] ss:$16 sps:$4 sm:$0xff]  }
 0x188   :  { %v1040_v11 = vpop.f32.mrf.mxu0  ;;  %v1083_v21 = vpop.f32.mrf.mxu1  ;;  %v4253_v3 = vld [vmem:[#allocation8 + $0x8c] ss:$16 sps:$4 sm:$0xff]  }
 0x189   :  { %v1041_v20 = vadd.f32 %v1040_v11, %v255_v61  ;;  %2799 = vmatpush2.bf16.msra.mxu0 %v4215_v2  ;;  %v1084_v22 = vadd.f32 %v1083_v21, %v263_v0  ;;  %2842 = vmatpush2.bf16.msra.mxu1 %v4218_v4  ;;  %v1093_v25 = vmul.f32 0.2, %v1039_v6  ;;  %v1095_v31 = vmul.f32 0.2, %v1082_v10  ;;  %v4239_v61 = vld [vmem:[#allocation8 + $0xc8] ss:$16 sps:$4 sm:$0xff]  }
 0x18a   :  { %v1042_v23 = vpop.f32.mrf.mxu0  ;;  %2800 = vmatprep.subr.bf16.mxu0 %v4223_v5  ;;  %v1085_v28 = vpop.f32.mrf.mxu1  ;;  %2843 = vmatprep.subr.bf16.mxu1 %v4226_v8  ;;  %v1108_v45 = vmax.f32 %v1037_v9, %v1092_v30  ;;  %v1110_v47 = vmax.f32 %v1080_v19, %v1094_v34  ;;  %v4250_v0 = vld [vmem:[#allocation8 + $0x2ac] ss:$16 sps:$4 sm:$0xff]   ;;  %v4248_v2 = vld [vmem:[#allocation8 + $0x2a8] ss:$16 sps:$4 sm:$0xff]  }
 0x18b   :  { %v1100_v26 = vmul.f32 0.2, %v1041_v20  ;;  %v1043_v27 = vadd.f32 %v1042_v23, %v259_v57  ;;  %v1102_v32 = vmul.f32 0.2, %v1084_v22  ;;  %v1086_v33 = vadd.f32 %v1085_v28, %v267_v63  ;;  %v4241_v57 = vld [vmem:[#allocation8 + $0xcc] ss:$16 sps:$4 sm:$0xff]  }
 0x18c   :  { %v1109_v41 = vmax.f32 %v1039_v6, %v1093_v25  ;;  %v1111_v59 = vmax.f32 %v1082_v10, %v1095_v31  ;;  %v4247_v63 = vld [vmem:[#allocation8 + $0xac] ss:$16 sps:$4 sm:$0xff]   ;;  %v4251_v5 = vld [vmem:[#allocation8 + $0x88] ss:$16 sps:$4 sm:$0xff]  }
 0x18d   :  { %v1101_v35 = vmul.f32 0.2, %v1043_v27  ;;  %2801 = vmatpush2.bf16.msra.mxu0 %v4221_v17  ;;  %v1116_v37 = vmax.f32 %v1041_v20, %v1100_v26  ;;  %v1103_v38 = vmul.f32 0.2, %v1086_v33  ;;  %2844 = vmatpush2.bf16.msra.mxu1 %v4224_v24  ;;  %v1118_v42 = vmax.f32 %v1084_v22, %v1102_v32  ;;  %v4256_v4 = vld [vmem:[#allocation8 + $0x28c] ss:$16 sps:$4 sm:$0xff]  }
 0x18e   :  { %2802 = vmatprep.subr.bf16.mxu0 %v4229_v15  ;;  %2845 = vmatprep.subr.bf16.mxu1 %v4232_v29  ;;  %v4259_v6 = vld [vmem:[#allocation8 + $0x6c] ss:$16 sps:$4 sm:$0xff]   ;;  %v4260_v8 = vld [vmem:[#allocation8 + $0x268] ss:$16 sps:$4 sm:$0xff]  }
 0x18f   :  { %v1117_v43 = vmax.f32 %v1043_v27, %v1101_v35  ;;  %v1119_v46 = vmax.f32 %v1086_v33, %v1103_v38  ;;  %v4762_v50 = vpack.c.bf16 %v1116_v37, %v1108_v45  ;;  %v4766_v54 = vpack.c.bf16 %v1118_v42, %v1110_v47  ;;  %v4262_v7 = vld [vmem:[#allocation8 + $0x26c] ss:$16 sps:$4 sm:$0xff]   ;;  %v4263_v11 = vld [vmem:[#allocation8 + $0x48] ss:$16 sps:$4 sm:$0xff]  }
 0x190   :  { %v4265_v9 = vld [vmem:[#allocation8 + $0x4c] ss:$16 sps:$4 sm:$0xff]   ;;  %v4266_v19 = vld [vmem:[#allocation8 + $0x248] ss:$16 sps:$4 sm:$0xff]  }
 0x191   :  { %2803 = vmatpush2.bf16.msra.mxu0 %v4227_v36  ;;  %v4760_v48 = vpack.c.bf16 %v1117_v43, %v1109_v41  ;;  %2846 = vmatpush2.bf16.msra.mxu1 %v4230_v39  ;;  %v4764_v51 = vpack.c.bf16 %v1119_v46, %v1111_v59  ;;  %v4268_v10 = vld [vmem:[#allocation8 + $0x24c] ss:$16 sps:$4 sm:$0xff]   ;;  %v4269_v17 = vld [vmem:[#allocation8 + $0x28] ss:$16 sps:$4 sm:$0xff]  }
 0x192   :  { %2858 = vmatprep.subr.bf16.mxu0 %v4235_v40  ;;  %2901 = vmatprep.subr.bf16.mxu1 %v4238_v44  ;;  %v4271_v20 = vld [vmem:[#allocation8 + $0x2c] ss:$16 sps:$4 sm:$0xff]   ;;  %v4272_v22 = vld [vmem:[#allocation8 + $0x228] ss:$16 sps:$4 sm:$0xff]  }
 0x193   :  { %2804 = vmatprep.mubr.bf16.mxu0 %v4760_v48  ;;  %2847 = vmatprep.mubr.bf16.mxu1 %v4764_v51  ;;  %v4274_v21 = vld [vmem:[#allocation8 + $0x22c] ss:$16 sps:$4 sm:$0xff]   ;;  %v4275_v15 = vld [vmem:[#allocation8 + $0x8] ss:$16 sps:$4 sm:$0xff]  }
 0x194   :  { %2805 = vmatmul.mubr.bf16.vlgmr.msra.gmra.mxu0 %v4762_v50  ;;  %2848 = vmatmul.mubr.bf16.vlgmr.msra.gmra.mxu1 %v4766_v54  ;;  %v4277_v23 = vld [vmem:[#allocation8 + $0xc] ss:$16 sps:$4 sm:$0xff]   ;;  %v4278_v25 = vld [vmem:[#allocation8 + $0x208] ss:$16 sps:$4 sm:$0xff]  }
 0x195   :  { %2859 = vmatpush1.bf16.msra.mxu0 %v4233_v49  ;;  %2902 = vmatpush1.bf16.msra.mxu1 %v4236_v52  ;;  %v4280_v24 = vld [vmem:[#allocation8 + $0x20c] ss:$16 sps:$4 sm:$0xff]   ;;  %v4281_v28 = vld [vmem:[#allocation8 + $0x1e8] ss:$16 sps:$4 sm:$0xff]  }
 0x196   :  { %2890 = vmatprep.mubr.bf16.mxu0 %v4740_v53  ;;  %2933 = vmatprep.mubr.bf16.mxu1 %v4744_v56  ;;  %v4254_v53 = vld [vmem:[#allocation8 + $0x288] ss:$16 sps:$4 sm:$0xff]   ;;  %v4283_v26 = vld [vmem:[#allocation8 + $0x1ec] ss:$16 sps:$4 sm:$0xff]  }
 0x197   :  { %2860 = vmatprep.subr.bf16.mxu0 %v4241_v57  ;;  %2903 = vmatprep.subr.bf16.mxu1 %v4244_v58  ;;  %v4257_v56 = vld [vmem:[#allocation8 + $0x68] ss:$16 sps:$4 sm:$0xff]   ;;  %v4286_v27 = vld [vmem:[#allocation8 + $0x3ec] ss:$16 sps:$4 sm:$0xff]  }
 0x198   :  { %v4284_v29 = vld [vmem:[#allocation8 + $0x3e8] ss:$16 sps:$4 sm:$0xff]   ;;  %v4289_v30 = vld [vmem:[#allocation8 + $0x1cc] ss:$16 sps:$4 sm:$0xff]  }
 0x199   :  { %2861 = vmatpush1.bf16.msra.mxu0 %v4239_v61  ;;  %2904 = vmatpush1.bf16.msra.mxu1 %v4242_v62  ;;  %v4292_v31 = vld [vmem:[#allocation8 + $0x3cc] ss:$16 sps:$4 sm:$0xff]   ;;  %v4287_v32 = vld [vmem:[#allocation8 + $0x1c8] ss:$16 sps:$4 sm:$0xff]  }
 0x19a   :  { %2862 = vmatprep.subr.bf16.mxu0 %v4247_v63  ;;  %2905 = vmatprep.subr.bf16.mxu1 %v4250_v0  ;;  %v4290_v33 = vld [vmem:[#allocation8 + $0x3c8] ss:$16 sps:$4 sm:$0xff]   ;;  %v4295_v34 = vld [vmem:[#allocation8 + $0x1ac] ss:$16 sps:$4 sm:$0xff]  }
 0x19b   :  { %v4298_v35 = vld [vmem:[#allocation8 + $0x3ac] ss:$16 sps:$4 sm:$0xff]   ;;  %v4293_v36 = vld [vmem:[#allocation8 + $0x1a8] ss:$16 sps:$4 sm:$0xff]  }
 0x19c   :  { %v4296_v37 = vld [vmem:[#allocation8 + $0x3a8] ss:$16 sps:$4 sm:$0xff]   ;;  %v4301_v38 = vld [vmem:[#allocation8 + $0x18c] ss:$16 sps:$4 sm:$0xff]  }
 0x19d   :  { %2863 = vmatpush1.bf16.msra.mxu0 %v4245_v1  ;;  %2906 = vmatpush1.bf16.msra.mxu1 %v4248_v2  ;;  %v4304_v39 = vld [vmem:[#allocation8 + $0x38c] ss:$16 sps:$4 sm:$0xff]   ;;  %v4299_v40 = vld [vmem:[#allocation8 + $0x188] ss:$16 sps:$4 sm:$0xff]  }
 0x19e   :  { %2864 = vmatprep.subr.bf16.mxu0 %v4253_v3  ;;  %2907 = vmatprep.subr.bf16.mxu1 %v4256_v4  ;;  %v4302_v41 = vld [vmem:[#allocation8 + $0x388] ss:$16 sps:$4 sm:$0xff]   ;;  %v4307_v42 = vld [vmem:[#allocation8 + $0x16c] ss:$16 sps:$4 sm:$0xff]  }
 0x19f   :  { %v4310_v43 = vld [vmem:[#allocation8 + $0x36c] ss:$16 sps:$4 sm:$0xff]   ;;  %v4305_v44 = vld [vmem:[#allocation8 + $0x168] ss:$16 sps:$4 sm:$0xff]  }
 0x1a0   :  { %v4308_v45 = vld [vmem:[#allocation8 + $0x368] ss:$16 sps:$4 sm:$0xff]   ;;  %v4313_v59 = vld [vmem:[#allocation8 + $0x14c] ss:$16 sps:$4 sm:$0xff]  }
 0x1a1   :  { %2865 = vmatpush1.bf16.msra.mxu0 %v4251_v5  ;;  %2908 = vmatpush1.bf16.msra.mxu1 %v4254_v53  ;;  %v4316_v46 = vld [vmem:[#allocation8 + $0x34c] ss:$16 sps:$4 sm:$0xff]   ;;  %v4311_v47 = vld [vmem:[#allocation8 + $0x148] ss:$16 sps:$4 sm:$0xff]  }
 0x1a2   :  { %2866 = vmatprep.subr.bf16.mxu0 %v4259_v6  ;;  %2909 = vmatprep.subr.bf16.mxu1 %v4262_v7  ;;  %v4314_v49 = vld [vmem:[#allocation8 + $0x348] ss:$16 sps:$4 sm:$0xff]   ;;  %v4319_v52 = vld [vmem:[#allocation8 + $0x12c] ss:$16 sps:$4 sm:$0xff]  }
 0x1a3   :  { %v4322_v57 = vld [vmem:[#allocation8 + $0x32c] ss:$16 sps:$4 sm:$0xff]   ;;  %v4317_v58 = vld [vmem:[#allocation8 + $0x128] ss:$16 sps:$4 sm:$0xff]  }
 0x1a4   :  { %v4320_v61 = vld [vmem:[#allocation8 + $0x328] ss:$16 sps:$4 sm:$0xff]   ;;  %v4325_v62 = vld [vmem:[#allocation8 + $0x10c] ss:$16 sps:$4 sm:$0xff]  }
 0x1a5   :  { %2867 = vmatpush1.bf16.msra.mxu0 %v4257_v56  ;;  %2910 = vmatpush1.bf16.msra.mxu1 %v4260_v8  ;;  %v4328_v63 = vld [vmem:[#allocation8 + $0x30c] ss:$16 sps:$4 sm:$0xff]   ;;  %v4323_v0 = vld [vmem:[#allocation8 + $0x108] ss:$16 sps:$4 sm:$0xff]  }
 0x1a6   :  { %2868 = vmatprep.subr.bf16.mxu0 %v4265_v9  ;;  %2911 = vmatprep.subr.bf16.mxu1 %v4268_v10  ;;  %v4326_v1 = vld [vmem:[#allocation8 + $0x308] ss:$16 sps:$4 sm:$0xff]   ;;  %v4331_v2 = vld [vmem:[#allocation8 + $0x4ec] ss:$16 sps:$4 sm:$0xff]  }
 0x1a7   :  { %v4334_v3 = vld [vmem:[#allocation8 + $0x6ec] ss:$16 sps:$4 sm:$0xff]   ;;  %v4329_v4 = vld [vmem:[#allocation8 + $0x4e8] ss:$16 sps:$4 sm:$0xff]  }
 0x1a8   :  { %v4332_v5 = vld [vmem:[#allocation8 + $0x6e8] ss:$16 sps:$4 sm:$0xff]   ;;  %v4337_v53 = vld [vmem:[#allocation8 + $0x4cc] ss:$16 sps:$4 sm:$0xff]  }
 0x1a9   :  { %2869 = vmatpush1.bf16.msra.mxu0 %v4263_v11  ;;  %2912 = vmatpush1.bf16.msra.mxu1 %v4266_v19  ;;  %v4340_v6 = vld [vmem:[#allocation8 + $0x6cc] ss:$16 sps:$4 sm:$0xff]   ;;  %v4335_v7 = vld [vmem:[#allocation8 + $0x4c8] ss:$16 sps:$4 sm:$0xff]  }
 0x1aa   :  { %2870 = vmatprep.subr.bf16.mxu0 %v4271_v20  ;;  %2913 = vmatprep.subr.bf16.mxu1 %v4274_v21  ;;  %v4338_v56 = vld [vmem:[#allocation8 + $0x6c8] ss:$16 sps:$4 sm:$0xff]   ;;  %v4343_v8 = vld [vmem:[#allocation8 + $0x4ac] ss:$16 sps:$4 sm:$0xff]  }
 0x1ab   :  { %v4346_v9 = vld [vmem:[#allocation8 + $0x6ac] ss:$16 sps:$4 sm:$0xff]   ;;  %v4341_v10 = vld [vmem:[#allocation8 + $0x4a8] ss:$16 sps:$4 sm:$0xff]  }
 0x1ac   :  { %v4349_v11 = vld [vmem:[#allocation8 + $0x48c] ss:$16 sps:$4 sm:$0xff]   ;;  %v4347_v19 = vld [vmem:[#allocation8 + $0x488] ss:$16 sps:$4 sm:$0xff]  }
 0x1ad   :  { %2871 = vmatpush1.bf16.msra.mxu0 %v4269_v17  ;;  %2914 = vmatpush1.bf16.msra.mxu1 %v4272_v22  ;;  %v4355_v20 = vld [vmem:[#allocation8 + $0x46c] ss:$16 sps:$4 sm:$0xff]   ;;  %v4356_v17 = vld [vmem:[#allocation8 + $0x668] ss:$16 sps:$4 sm:$0xff]  }
 0x1ae   :  { %2872 = vmatprep.subr.bf16.mxu0 %v4277_v23  ;;  %2915 = vmatprep.subr.bf16.mxu1 %v4280_v24  ;;  %v4358_v21 = vld [vmem:[#allocation8 + $0x66c] ss:$16 sps:$4 sm:$0xff]   ;;  %v4359_v24 = vld [vmem:[#allocation8 + $0x448] ss:$16 sps:$4 sm:$0xff]  }
 0x1af   :  { %v4361_v22 = vld [vmem:[#allocation8 + $0x44c] ss:$16 sps:$4 sm:$0xff]  }
 0x1b0   :  { %v4364_v23 = vld [vmem:[#allocation8 + $0x64c] ss:$16 sps:$4 sm:$0xff]  }
 0x1b1   :  { %2873 = vmatpush1.bf16.msra.mxu0 %v4275_v15  ;;  %2916 = vmatpush1.bf16.msra.mxu1 %v4278_v25  ;;  %v4362_v15 = vld [vmem:[#allocation8 + $0x648] ss:$16 sps:$4 sm:$0xff]   ;;  %v4367_v25 = vld [vmem:[#allocation8 + $0x42c] ss:$16 sps:$4 sm:$0xff]  }
 0x1b2   :  { %2874 = vmatprep.subr.bf16.mxu0 %v4283_v26  ;;  %2917 = vmatprep.subr.bf16.mxu1 %v4286_v27  ;;  %v4370_v26 = vld [vmem:[#allocation8 + $0x62c] ss:$16 sps:$4 sm:$0xff]   ;;  %v4365_v27 = vld [vmem:[#allocation8 + $0x428] ss:$16 sps:$4 sm:$0xff]  }
 0x1b5   :  { %2875 = vmatpush2.bf16.msra.mxu0 %v4281_v28  ;;  %2918 = vmatpush2.bf16.msra.mxu1 %v4284_v29  ;;  %v4368_v28 = vld [vmem:[#allocation8 + $0x628] ss:$16 sps:$4 sm:$0xff]   ;;  %v4373_v29 = vld [vmem:[#allocation8 + $0x40c] ss:$16 sps:$4 sm:$0xff]  }
 0x1b6   :  { %2876 = vmatprep.subr.bf16.mxu0 %v4289_v30  ;;  %2919 = vmatprep.subr.bf16.mxu1 %v4292_v31  ;;  %v4376_v30 = vld [vmem:[#allocation8 + $0x60c] ss:$16 sps:$4 sm:$0xff]   ;;  %v4371_v31 = vld [vmem:[#allocation8 + $0x408] ss:$16 sps:$4 sm:$0xff]  }
 0x1b9   :  { %2877 = vmatpush2.bf16.msra.mxu0 %v4287_v32  ;;  %2920 = vmatpush2.bf16.msra.mxu1 %v4290_v33  ;;  %v4374_v32 = vld [vmem:[#allocation8 + $0x608] ss:$16 sps:$4 sm:$0xff]   ;;  %v4379_v33 = vld [vmem:[#allocation8 + $0x5ec] ss:$16 sps:$4 sm:$0xff]  }
 0x1ba   :  { %2878 = vmatprep.subr.bf16.mxu0 %v4295_v34  ;;  %2921 = vmatprep.subr.bf16.mxu1 %v4298_v35  ;;  %v4382_v34 = vld [vmem:[#allocation8 + $0x7ec] ss:$16 sps:$4 sm:$0xff]   ;;  %v4377_v35 = vld [vmem:[#allocation8 + $0x5e8] ss:$16 sps:$4 sm:$0xff]  }
 0x1bd   :  { %2879 = vmatpush2.bf16.msra.mxu0 %v4293_v36  ;;  %2922 = vmatpush2.bf16.msra.mxu1 %v4296_v37  ;;  %v4380_v36 = vld [vmem:[#allocation8 + $0x7e8] ss:$16 sps:$4 sm:$0xff]   ;;  %v4385_v37 = vld [vmem:[#allocation8 + $0x5cc] ss:$16 sps:$4 sm:$0xff]  }
 0x1be   :  { %2880 = vmatprep.subr.bf16.mxu0 %v4301_v38  ;;  %2923 = vmatprep.subr.bf16.mxu1 %v4304_v39  ;;  %v4388_v38 = vld [vmem:[#allocation8 + $0x7cc] ss:$16 sps:$4 sm:$0xff]   ;;  %v4383_v39 = vld [vmem:[#allocation8 + $0x5c8] ss:$16 sps:$4 sm:$0xff]  }
 0x1c1   :  { %2881 = vmatpush2.bf16.msra.mxu0 %v4299_v40  ;;  %2924 = vmatpush2.bf16.msra.mxu1 %v4302_v41  ;;  %v4386_v40 = vld [vmem:[#allocation8 + $0x7c8] ss:$16 sps:$4 sm:$0xff]   ;;  %v4391_v41 = vld [vmem:[#allocation8 + $0x5ac] ss:$16 sps:$4 sm:$0xff]  }
 0x1c2   :  { %2882 = vmatprep.subr.bf16.mxu0 %v4307_v42  ;;  %2925 = vmatprep.subr.bf16.mxu1 %v4310_v43  ;;  %v4394_v42 = vld [vmem:[#allocation8 + $0x7ac] ss:$16 sps:$4 sm:$0xff]   ;;  %v4389_v43 = vld [vmem:[#allocation8 + $0x5a8] ss:$16 sps:$4 sm:$0xff]  }
 0x1c5   :  { %2883 = vmatpush2.bf16.msra.mxu0 %v4305_v44  ;;  %2926 = vmatpush2.bf16.msra.mxu1 %v4308_v45  ;;  %v4392_v44 = vld [vmem:[#allocation8 + $0x7a8] ss:$16 sps:$4 sm:$0xff]   ;;  %v4397_v45 = vld [vmem:[#allocation8 + $0x58c] ss:$16 sps:$4 sm:$0xff]  }
 0x1c6   :  { %2884 = vmatprep.subr.bf16.mxu0 %v4313_v59  ;;  %2927 = vmatprep.subr.bf16.mxu1 %v4316_v46  ;;  %v4400_v59 = vld [vmem:[#allocation8 + $0x78c] ss:$16 sps:$4 sm:$0xff]   ;;  %v4395_v46 = vld [vmem:[#allocation8 + $0x588] ss:$16 sps:$4 sm:$0xff]  }
 0x1c9   :  { %2885 = vmatpush2.bf16.msra.mxu0 %v4311_v47  ;;  %2928 = vmatpush2.bf16.msra.mxu1 %v4314_v49  ;;  %v4398_v47 = vld [vmem:[#allocation8 + $0x788] ss:$16 sps:$4 sm:$0xff]   ;;  %v4403_v49 = vld [vmem:[#allocation8 + $0x56c] ss:$16 sps:$4 sm:$0xff]  }
 0x1ca   :  { %2886 = vmatprep.subr.bf16.mxu0 %v4319_v52  ;;  %2929 = vmatprep.subr.bf16.mxu1 %v4322_v57  ;;  %v4406_v52 = vld [vmem:[#allocation8 + $0x76c] ss:$16 sps:$4 sm:$0xff]   ;;  %v4401_v57 = vld [vmem:[#allocation8 + $0x568] ss:$16 sps:$4 sm:$0xff]  }
 0x1cd   :  { %2887 = vmatpush2.bf16.msra.mxu0 %v4317_v58  ;;  %2930 = vmatpush2.bf16.msra.mxu1 %v4320_v61  ;;  %v4404_v58 = vld [vmem:[#allocation8 + $0x768] ss:$16 sps:$4 sm:$0xff]   ;;  %v4409_v61 = vld [vmem:[#allocation8 + $0x54c] ss:$16 sps:$4 sm:$0xff]  }
 0x1ce   :  { %2888 = vmatprep.subr.bf16.mxu0 %v4325_v62  ;;  %2931 = vmatprep.subr.bf16.mxu1 %v4328_v63  ;;  %v4412_v62 = vld [vmem:[#allocation8 + $0x74c] ss:$16 sps:$4 sm:$0xff]   ;;  %v4407_v63 = vld [vmem:[#allocation8 + $0x548] ss:$16 sps:$4 sm:$0xff]  }
 0x1d1   :  { %2889 = vmatpush2.bf16.msra.mxu0 %v4323_v0  ;;  %2932 = vmatpush2.bf16.msra.mxu1 %v4326_v1  ;;  %v4410_v0 = vld [vmem:[#allocation8 + $0x748] ss:$16 sps:$4 sm:$0xff]   ;;  %v4415_v1 = vld [vmem:[#allocation8 + $0x52c] ss:$16 sps:$4 sm:$0xff]  }
 0x1d2   :  { %2944 = vmatprep.subr.bf16.mxu0 %v4331_v2  ;;  %2987 = vmatprep.subr.bf16.mxu1 %v4334_v3  ;;  %v4418_v2 = vld [vmem:[#allocation8 + $0x72c] ss:$16 sps:$4 sm:$0xff]   ;;  %v4413_v3 = vld [vmem:[#allocation8 + $0x528] ss:$16 sps:$4 sm:$0xff]  }
 0x1d4   :  { %2891 = vmatmul.mubr.bf16.vlgmr.msra.gmra.mxu0 %v4742_v55  ;;  %2934 = vmatmul.mubr.bf16.vlgmr.msra.gmra.mxu1 %v4746_v60  ;;  %v4344_v55 = vld [vmem:[#allocation8 + $0x6a8] ss:$16 sps:$4 sm:$0xff]   ;;  %v4352_v60 = vld [vmem:[#allocation8 + $0x68c] ss:$16 sps:$4 sm:$0xff]  }
 0x1d5   :  { %2945 = vmatpush1.bf16.msra.mxu0 %v4329_v4  ;;  %2976 = vmatprep.mubr.bf16.mxu0 %v4760_v48  ;;  %v4350_v48 = vld [vmem:[#allocation8 + $0x688] ss:$16 sps:$4 sm:$0xff]  }
 0x1d6   :  { %2988 = vmatpush1.bf16.msra.mxu1 %v4332_v5  ;;  %3019 = vmatprep.mubr.bf16.mxu1 %v4764_v51  ;;  %v4353_v51 = vld [vmem:[#allocation8 + $0x468] ss:$16 sps:$4 sm:$0xff]   ;;  %v4421_v5 = vld [vmem:[#allocation8 + $0x50c] ss:$16 sps:$4 sm:$0xff]  }
 0x1d7   :  { %2946 = vmatprep.subr.bf16.mxu0 %v4337_v53  ;;  %2989 = vmatprep.subr.bf16.mxu1 %v4340_v6  ;;  %v4416_v4 = vld [vmem:[#allocation8 + $0x728] ss:$16 sps:$4 sm:$0xff]   ;;  %v4424_v53 = vld [vmem:[#allocation8 + $0x70c] ss:$16 sps:$4 sm:$0xff]  }
 0x1d8   :  { %v4419_v6 = vld [vmem:[#allocation8 + $0x508] ss:$16 sps:$4 sm:$0xff]  }
 0x1d9   :  { %2947 = vmatpush1.bf16.msra.mxu0 %v4335_v7  ;;  %v4422_v7 = vld [vmem:[#allocation8 + $0x708] ss:$16 sps:$4 sm:$0xff]  }
 0x1da   :  { %2990 = vmatpush1.bf16.msra.mxu1 %v4338_v56  ;;  %2948 = vmatprep.subr.bf16.mxu0 %v4343_v8  ;;  %v4427_v56 = vld [vmem:[#allocation10 + $0x74] ss:$8 sps:$4 sm:$0xff]   ;;  %v4425_v8 = vld [vmem:[#allocation10 + $0x70] ss:$8 sps:$4 sm:$0xff]  }
 0x1db   :  { %2991 = vmatprep.subr.bf16.mxu1 %v4346_v9  ;;  %v4430_v9 = vld [vmem:[#allocation10 + $0x64] ss:$8 sps:$4 sm:$0xff]  }
 0x1dd   :  { %2949 = vmatpush1.bf16.msra.mxu0 %v4341_v10  ;;  %v4428_v10 = vld [vmem:[#allocation10 + $0x60] ss:$8 sps:$4 sm:$0xff]  }
 0x1de   :  { %2992 = vmatpush1.bf16.msra.mxu1 %v4344_v55  ;;  %2950 = vmatprep.subr.bf16.mxu0 %v4349_v11  ;;  %v4433_v55 = vld [vmem:[#allocation10 + $0x54] ss:$8 sps:$4 sm:$0xff]   ;;  %v4431_v11 = vld [vmem:[#allocation10 + $0x50] ss:$8 sps:$4 sm:$0xff]  }
 0x1df   :  { %2993 = vmatprep.subr.bf16.mxu1 %v4352_v60  ;;  %v4436_v60 = vld [vmem:[#allocation10 + $0x44] ss:$8 sps:$4 sm:$0xff]  }
 0x1e1   :  { %2951 = vmatpush1.bf16.msra.mxu0 %v4347_v19  ;;  %v4434_v19 = vld [vmem:[#allocation10 + $0x40] ss:$8 sps:$4 sm:$0xff]  }
 0x1e2   :  { %2994 = vmatpush1.bf16.msra.mxu1 %v4350_v48  ;;  %2952 = vmatprep.subr.bf16.mxu0 %v4355_v20  ;;  %v4473_v48 = vld [vmem:[#allocation10 + $0x170] ss:$8 sps:$4 sm:$0xff]   ;;  %v4475_v20 = vld [vmem:[#allocation10 + $0x174] ss:$8 sps:$4 sm:$0xff]  }
 0x1e3   :  { %2995 = vmatprep.subr.bf16.mxu1 %v4358_v21  ;;  %v4439_v21 = vld [vmem:[#allocation10 + $0x34] ss:$8 sps:$4 sm:$0xff]  }
 0x1e5   :  { %2953 = vmatpush1.bf16.msra.mxu0 %v4353_v51  ;;  %v4478_v51 = vld [vmem:[#allocation10 + $0x164] ss:$8 sps:$4 sm:$0xff]  }
 0x1e6   :  { %2996 = vmatpush1.bf16.msra.mxu1 %v4356_v17  ;;  %2954 = vmatprep.subr.bf16.mxu0 %v4361_v22  ;;  %v4481_v17 = vld [vmem:[#allocation10 + $0x154] ss:$8 sps:$4 sm:$0xff]   ;;  %v4442_v22 = vld [vmem:[#allocation10 + $0x24] ss:$8 sps:$4 sm:$0xff]  }
 0x1e7   :  { %2997 = vmatprep.subr.bf16.mxu1 %v4364_v23  ;;  %v4479_v23 = vld [vmem:[#allocation10 + $0x150] ss:$8 sps:$4 sm:$0xff]  }
 0x1e9   :  { %2955 = vmatpush1.bf16.msra.mxu0 %v4359_v24  ;;  %v4440_v24 = vld [vmem:[#allocation10 + $0x20] ss:$8 sps:$4 sm:$0xff]  }
 0x1ea   :  { %2998 = vmatpush1.bf16.msra.mxu1 %v4362_v15  ;;  %2956 = vmatprep.subr.bf16.mxu0 %v4367_v25  ;;  %v4484_v15 = vld [vmem:[#allocation10 + $0x144] ss:$8 sps:$4 sm:$0xff]   ;;  %v4445_v25 = vld [vmem:[#allocation10 + $0x14] ss:$8 sps:$4 sm:$0xff]  }
 0x1eb   :  { %2999 = vmatprep.subr.bf16.mxu1 %v4370_v26  ;;  %v4482_v26 = vld [vmem:[#allocation10 + $0x140] ss:$8 sps:$4 sm:$0xff]  }
 0x1ed   :  { %2957 = vmatpush1.bf16.msra.mxu0 %v4365_v27  ;;  %v4443_v27 = vld [vmem:[#allocation10 + $0x10] ss:$8 sps:$4 sm:$0xff]  }
 0x1ee   :  { %3000 = vmatpush1.bf16.msra.mxu1 %v4368_v28  ;;  %2958 = vmatprep.subr.bf16.mxu0 %v4373_v29  ;;  %v4487_v28 = vld [vmem:[#allocation10 + $0x134] ss:$8 sps:$4 sm:$0xff]   ;;  %v4448_v29 = vld [vmem:[#allocation10 + $0x4] ss:$8 sps:$4 sm:$0xff]  }
 0x1ef   :  { %3001 = vmatprep.subr.bf16.mxu1 %v4376_v30  ;;  %v4485_v30 = vld [vmem:[#allocation10 + $0x130] ss:$8 sps:$4 sm:$0xff]  }
 0x1f1   :  { %2959 = vmatpush1.bf16.msra.mxu0 %v4371_v31  ;;  %v4446_v31 = vld [vmem:[#allocation10] ss:$8 sps:$4 sm:$0xff]  }
 0x1f2   :  { %3002 = vmatpush1.bf16.msra.mxu1 %v4374_v32  ;;  %2960 = vmatprep.subr.bf16.mxu0 %v4379_v33  ;;  %v4490_v32 = vld [vmem:[#allocation10 + $0x124] ss:$8 sps:$4 sm:$0xff]   ;;  %v4451_v33 = vld [vmem:[#allocation10 + $0xf4] ss:$8 sps:$4 sm:$0xff]  }
 0x1f3   :  { %3003 = vmatprep.subr.bf16.mxu1 %v4382_v34  ;;  %v4488_v34 = vld [vmem:[#allocation10 + $0x120] ss:$8 sps:$4 sm:$0xff]  }
 0x1f5   :  { %2961 = vmatpush2.bf16.msra.mxu0 %v4377_v35  ;;  %v4449_v35 = vld [vmem:[#allocation10 + $0xf0] ss:$8 sps:$4 sm:$0xff]  }
 0x1f6   :  { %3004 = vmatpush2.bf16.msra.mxu1 %v4380_v36  ;;  %2962 = vmatprep.subr.bf16.mxu0 %v4385_v37  ;;  %v4493_v36 = vld [vmem:[#allocation10 + $0x114] ss:$8 sps:$4 sm:$0xff]   ;;  %v4454_v37 = vld [vmem:[#allocation10 + $0xe4] ss:$8 sps:$4 sm:$0xff]  }
 0x1f7   :  { %3005 = vmatprep.subr.bf16.mxu1 %v4388_v38  ;;  %v4491_v38 = vld [vmem:[#allocation10 + $0x110] ss:$8 sps:$4 sm:$0xff]  }
 0x1f9   :  { %2963 = vmatpush2.bf16.msra.mxu0 %v4383_v39  ;;  %v4452_v39 = vld [vmem:[#allocation10 + $0xe0] ss:$8 sps:$4 sm:$0xff]  }
 0x1fa   :  { %3006 = vmatpush2.bf16.msra.mxu1 %v4386_v40  ;;  %2964 = vmatprep.subr.bf16.mxu0 %v4391_v41  ;;  %v4496_v40 = vld [vmem:[#allocation10 + $0x104] ss:$8 sps:$4 sm:$0xff]   ;;  %v4457_v41 = vld [vmem:[#allocation10 + $0xd4] ss:$8 sps:$4 sm:$0xff]  }
 0x1fb   :  { %3007 = vmatprep.subr.bf16.mxu1 %v4394_v42  ;;  %v4494_v42 = vld [vmem:[#allocation10 + $0x100] ss:$8 sps:$4 sm:$0xff]  }
 0x1fd   :  { %2965 = vmatpush2.bf16.msra.mxu0 %v4389_v43  ;;  %v4455_v43 = vld [vmem:[#allocation10 + $0xd0] ss:$8 sps:$4 sm:$0xff]  }
 0x1fe   :  { %3008 = vmatpush2.bf16.msra.mxu1 %v4392_v44  ;;  %2966 = vmatprep.subr.bf16.mxu0 %v4397_v45  ;;  %v4499_v44 = vld [vmem:[#allocation10 + $0x1f4] ss:$8 sps:$4 sm:$0xff]   ;;  %v4460_v45 = vld [vmem:[#allocation10 + $0xc4] ss:$8 sps:$4 sm:$0xff]  }
 0x1ff   :  { %3009 = vmatprep.subr.bf16.mxu1 %v4400_v59  ;;  %v4497_v59 = vld [vmem:[#allocation10 + $0x1f0] ss:$8 sps:$4 sm:$0xff]  }
 0x201   :  { %2967 = vmatpush2.bf16.msra.mxu0 %v4395_v46  ;;  %v4458_v46 = vld [vmem:[#allocation10 + $0xc0] ss:$8 sps:$4 sm:$0xff]  }
 0x202   :  { %3010 = vmatpush2.bf16.msra.mxu1 %v4398_v47  ;;  %2968 = vmatprep.subr.bf16.mxu0 %v4403_v49  ;;  %v4502_v47 = vld [vmem:[#allocation10 + $0x1e4] ss:$8 sps:$4 sm:$0xff]   ;;  %v4463_v49 = vld [vmem:[#allocation10 + $0xb4] ss:$8 sps:$4 sm:$0xff]  }
 0x203   :  { %3011 = vmatprep.subr.bf16.mxu1 %v4406_v52  ;;  %v4500_v52 = vld [vmem:[#allocation10 + $0x1e0] ss:$8 sps:$4 sm:$0xff]  }
 0x205   :  { %2969 = vmatpush2.bf16.msra.mxu0 %v4401_v57  ;;  %v4461_v57 = vld [vmem:[#allocation10 + $0xb0] ss:$8 sps:$4 sm:$0xff]  }
 0x206   :  { %3012 = vmatpush2.bf16.msra.mxu1 %v4404_v58  ;;  %2970 = vmatprep.subr.bf16.mxu0 %v4409_v61  ;;  %v4505_v58 = vld [vmem:[#allocation10 + $0x1d4] ss:$8 sps:$4 sm:$0xff]   ;;  %v4466_v61 = vld [vmem:[#allocation10 + $0xa4] ss:$8 sps:$4 sm:$0xff]  }
 0x207   :  { %3013 = vmatprep.subr.bf16.mxu1 %v4412_v62  ;;  %v4503_v62 = vld [vmem:[#allocation10 + $0x1d0] ss:$8 sps:$4 sm:$0xff]  }
 0x209   :  { %2971 = vmatpush2.bf16.msra.mxu0 %v4407_v63  ;;  %v4464_v63 = vld [vmem:[#allocation10 + $0xa0] ss:$8 sps:$4 sm:$0xff]  }
 0x20a   :  { %3014 = vmatpush2.bf16.msra.mxu1 %v4410_v0  ;;  %2972 = vmatprep.subr.bf16.mxu0 %v4415_v1  ;;  %v4508_v0 = vld [vmem:[#allocation10 + $0x1c4] ss:$8 sps:$4 sm:$0xff]  }
 0x20b   :  { %3015 = vmatprep.subr.bf16.mxu1 %v4418_v2  ;;  %v4469_v2 = vld [vmem:[#allocation10 + $0x94] ss:$8 sps:$4 sm:$0xff]  }
 0x20d   :  { %2973 = vmatpush2.bf16.msra.mxu0 %v4413_v3 }
 0x20e   :  { %3016 = vmatpush2.bf16.msra.mxu1 %v4416_v4  ;;  %2974 = vmatprep.subr.bf16.mxu0 %v4421_v5  ;;  %v4506_v4 = vld [vmem:[#allocation10 + $0x1c0] ss:$8 sps:$4 sm:$0xff]   ;;  %v4783_v5 = vld [vmem:[%s4815_s4] sm:$0xf] }
 0x20f   :  { %3017 = vmatprep.subr.bf16.mxu1 %v4424_v53  ;;  %v4467_v53 = vld [vmem:[#allocation10 + $0x90] ss:$8 sps:$4 sm:$0xff]  }
 0x211   :  { %2975 = vmatpush2.bf16.msra.mxu0 %v4419_v6 }
 0x212   :  { %3018 = vmatpush2.bf16.msra.mxu1 %v4422_v7  ;;  %3446 = vmatprep.subr.bf16.mxu0 %v4427_v56  ;;  %v4472_v7 = vld [vmem:[#allocation10 + $0x84] ss:$8 sps:$4 sm:$0xff]  }
 0x213   :  { %3489 = vmatprep.subr.bf16.mxu1 %v4475_v20 }
 0x214   :  { %2977 = vmatmul.mubr.bf16.vlgmr.msra.gmra.mxu0 %v4762_v50  ;;  %v4476_v50 = vld [vmem:[#allocation10 + $0x160] ss:$8 sps:$4 sm:$0xff]   ;;  %v2720_v1 = vpop.f32.mrf.mxu0  ;;  %v2763_v3 = vpop.f32.mrf.mxu1 }
 0x215   :  { %3020 = vmatmul.mubr.bf16.vlgmr.msra.gmra.mxu1 %v4766_v54  ;;  %3447 = vmatpush1.bf16.msra.mxu0 %v4425_v8  ;;  %v4437_v54 = vld [vmem:[#allocation10 + $0x30] ss:$8 sps:$4 sm:$0xff]   ;;  %v1389_v8 = vrot.slane %v4783_v5, %v4724_v14 }
 0x216   :  { %3448 = vmatprep.subr.bf16.mxu0 %v4430_v9  ;;  %3490 = vmatpush1.bf16.msra.mxu1 %v4473_v48  ;;  %v2722_v6 = vpop.f32.mrf.mxu0  ;;  %v2765_v56 = vpop.f32.mrf.mxu1  ;;  %v1393_v9 = vrot.slane %v4783_v5, %v4721_v13 }
 0x217   :  { %3491 = vmatprep.subr.bf16.mxu1 %v4478_v51 }
 0x219   :  { %3449 = vmatpush1.bf16.msra.mxu0 %v4428_v10  ;;  %v4470_v10 = vld [vmem:[#allocation10 + $0x80] ss:$8 sps:$4 sm:$0xff]  }
 0x21a   :  { %3450 = vmatprep.subr.bf16.mxu0 %v4433_v55  ;;  %3492 = vmatpush1.bf16.msra.mxu1 %v4476_v50  ;;  %v2724_v55 = vpop.f32.mrf.mxu0 }
 0x21b   :  { %3493 = vmatprep.subr.bf16.mxu1 %v4481_v17  ;;  %v2725_v20 = vadd.f32 %v2724_v55, %v1389_v8 }
 0x21c   :  { %v2726_v48 = vpop.f32.mrf.mxu0 }
 0x21d   :  { %3451 = vmatpush1.bf16.msra.mxu0 %v4431_v11  ;;  %v2767_v11 = vpop.f32.mrf.mxu1  ;;  %v2727_v17 = vadd.f32 %v2726_v48, %v1393_v9 }
 0x21e   :  { %3452 = vmatprep.subr.bf16.mxu0 %v4436_v60  ;;  %3494 = vmatpush1.bf16.msra.mxu1 %v4479_v23  ;;  %v2721_v60 = vadd.f32 %v2720_v1, %v1389_v8 }
 0x21f   :  { %3495 = vmatprep.subr.bf16.mxu1 %v4484_v15  ;;  %v4511_v15 = vld [vmem:[#allocation10 + $0x1b4] ss:$8 sps:$4 sm:$0xff]  }
 0x220   :  { %v2764_v51 = vadd.f32 %v2763_v3, %v2721_v60 }
 0x221   :  { %3453 = vmatpush1.bf16.msra.mxu0 %v4434_v19  ;;  %v2723_v19 = vadd.f32 %v2722_v6, %v1393_v9 }
 0x222   :  { %3454 = vmatprep.subr.bf16.mxu0 %v4439_v21  ;;  %3496 = vmatpush1.bf16.msra.mxu1 %v4482_v26  ;;  %v2769_v21 = vpop.f32.mrf.mxu1 }
 0x223   :  { %3497 = vmatprep.subr.bf16.mxu1 %v4487_v28  ;;  %v4509_v28 = vld [vmem:[#allocation10 + $0x1b0] ss:$8 sps:$4 sm:$0xff]  }
 0x225   :  { %3455 = vmatpush1.bf16.msra.mxu0 %v4437_v54  ;;  %v2766_v54 = vadd.f32 %v2765_v56, %v2723_v19 }
 0x226   :  { %3456 = vmatprep.subr.bf16.mxu0 %v4442_v22  ;;  %3498 = vmatpush1.bf16.msra.mxu1 %v4485_v30  ;;  %v2770_v30 = vadd.f32 %v2769_v21, %v2727_v17 }
 0x227   :  { %3499 = vmatprep.subr.bf16.mxu1 %v4490_v32 }
 0x229   :  { %3457 = vmatpush1.bf16.msra.mxu0 %v4440_v24 }
 0x22a   :  { %3458 = vmatprep.subr.bf16.mxu0 %v4445_v25  ;;  %3500 = vmatpush1.bf16.msra.mxu1 %v4488_v34  ;;  %v2768_v25 = vadd.f32 %v2767_v11, %v2725_v20 }
 0x22b   :  { %3501 = vmatprep.subr.bf16.mxu1 %v4493_v36  ;;  %v4514_v36 = vld [vmem:[#allocation10 + $0x1a4] ss:$8 sps:$4 sm:$0xff]  }
 0x22d   :  { %3459 = vmatpush1.bf16.msra.mxu0 %v4443_v27 }
 0x22e   :  { %3460 = vmatprep.subr.bf16.mxu0 %v4448_v29  ;;  %3502 = vmatpush1.bf16.msra.mxu1 %v4491_v38 }
 0x22f   :  { %3503 = vmatprep.subr.bf16.mxu1 %v4496_v40 }
 0x231   :  { %3461 = vmatpush1.bf16.msra.mxu0 %v4446_v31 }
 0x232   :  { %3462 = vmatprep.subr.bf16.mxu0 %v4451_v33  ;;  %3504 = vmatpush1.bf16.msra.mxu1 %v4494_v42 }
 0x233   :  { %3505 = vmatprep.subr.bf16.mxu1 %v4499_v44 }
 0x235   :  { %3463 = vmatpush2.bf16.msra.mxu0 %v4449_v35 }
 0x236   :  { %3464 = vmatprep.subr.bf16.mxu0 %v4454_v37  ;;  %3506 = vmatpush2.bf16.msra.mxu1 %v4497_v59 }
 0x237   :  { %3507 = vmatprep.subr.bf16.mxu1 %v4502_v47 }
 0x239   :  { %3465 = vmatpush2.bf16.msra.mxu0 %v4452_v39  ;;  %v4512_v39 = vld [vmem:[#allocation10 + $0x1a0] ss:$8 sps:$4 sm:$0xff]  }
 0x23a   :  { %3466 = vmatprep.subr.bf16.mxu0 %v4457_v41  ;;  %3508 = vmatpush2.bf16.msra.mxu1 %v4500_v52 }
 0x23b   :  { %3509 = vmatprep.subr.bf16.mxu1 %v4505_v58  ;;  %v4520_v58 = vld [vmem:[#allocation10 + $0x184] ss:$8 sps:$4 sm:$0xff]  }
 0x23d   :  { %3467 = vmatpush2.bf16.msra.mxu0 %v4455_v43 }
 0x23e   :  { %3468 = vmatprep.subr.bf16.mxu0 %v4460_v45  ;;  %3510 = vmatpush2.bf16.msra.mxu1 %v4503_v62  ;;  %v4517_v45 = vld [vmem:[#allocation10 + $0x194] ss:$8 sps:$4 sm:$0xff]  }
 0x23f   :  { %3511 = vmatprep.subr.bf16.mxu1 %v4508_v0 }
 0x241   :  { %3469 = vmatpush2.bf16.msra.mxu0 %v4458_v46  ;;  %v4515_v46 = vld [vmem:[#allocation10 + $0x190] ss:$8 sps:$4 sm:$0xff]  }
 0x242   :  { %3470 = vmatprep.subr.bf16.mxu0 %v4463_v49  ;;  %3512 = vmatpush2.bf16.msra.mxu1 %v4506_v4  ;;  %v1397_v4 = vrot.slane %v4783_v5, %v246_v18 }
 0x243   :  { %3513 = vmatprep.subr.bf16.mxu1 %v4511_v15 }
 0x245   :  { %3471 = vmatpush2.bf16.msra.mxu0 %v4461_v57  ;;  %v4518_v57 = vld [vmem:[#allocation10 + $0x180] ss:$8 sps:$4 sm:$0xff]  }
 0x246   :  { %3472 = vmatprep.subr.bf16.mxu0 %v4466_v61  ;;  %3514 = vmatpush2.bf16.msra.mxu1 %v4509_v28 }
 0x247   :  { %3515 = vmatprep.subr.bf16.mxu1 %v4514_v36 }
 0x249   :  { %3473 = vmatpush2.bf16.msra.mxu0 %v4464_v63 }
 0x24a   :  { %3474 = vmatprep.subr.bf16.mxu0 %v4469_v2  ;;  %3516 = vmatpush2.bf16.msra.mxu1 %v4512_v39  ;;  %v3114_v39 = vld [vmem:[%s4817_s6] sm:$0x3] }
 0x24b   :  { %3517 = vmatprep.subr.bf16.mxu1 %v4517_v45 }
 0x24d   :  { %3475 = vmatpush2.bf16.msra.mxu0 %v4467_v53  ;;  %v1401_v53 = vrot.slane %v4783_v5, %v250_v16 }
 0x24e   :  { %3476 = vmatprep.subr.bf16.mxu0 %v4472_v7  ;;  %3518 = vmatpush2.bf16.msra.mxu1 %v4515_v46 }
 0x24f   :  { %3519 = vmatprep.subr.bf16.mxu1 %v4520_v58 }
 0x251   :  { %3477 = vmatpush2.bf16.msra.mxu0 %v4470_v10 }
 0x252   :  { %3520 = vmatpush2.bf16.msra.mxu1 %v4518_v57 }
 0x254   :  { %v2806_v50 = vpop.f32.mrf.mxu0  ;;  %v2849_v22 = vpop.f32.mrf.mxu1 }
 0x255   :  { %v2807_v23 = vadd.f32 %v2806_v50, %v2764_v51 }
 0x256   :  { %v2808_v24 = vpop.f32.mrf.mxu0  ;;  %v2851_v27 = vpop.f32.mrf.mxu1 }
 0x257   :  { %v2809_v26 = vadd.f32 %v2808_v24, %v2766_v54  ;;  %v2850_v34 = vadd.f32 %v2849_v22, %v2807_v23 }
 0x258   :  { %v2810_v29 = vpop.f32.mrf.mxu0  ;;  %v2853_v33 = vpop.f32.mrf.mxu1 }
 0x259   :  { %v2852_v31 = vadd.f32 %v2851_v27, %v2809_v26  ;;  %v2811_v32 = vadd.f32 %v2810_v29, %v2768_v25  ;;  %v3030_v44 = vmul.f32 0.2, %v2850_v34 }
 0x25a   :  { %v2812_v35 = vpop.f32.mrf.mxu0  ;;  %v2855_v40 = vpop.f32.mrf.mxu1 }
 0x25b   :  { %v2854_v37 = vadd.f32 %v2853_v33, %v2811_v32  ;;  %v2813_v38 = vadd.f32 %v2812_v35, %v2770_v30  ;;  %v3031_v41 = vmul.f32 0.2, %v2852_v31  ;;  %v3038_v61 = vmax.f32 %v2850_v34, %v3030_v44 }
 0x25d   :  { %v3034_v42 = vmul.f32 0.2, %v2854_v37  ;;  %v2856_v43 = vadd.f32 %v2855_v40, %v2813_v38  ;;  %v3039_v49 = vmax.f32 %v2852_v31, %v3031_v41  ;;  %v3119_v41 = vrot.slane %v3114_v39, %v4724_v14 }
 0x25f   :  { %v3035_v59 = vmul.f32 0.2, %v2856_v43  ;;  %v3042_v47 = vmax.f32 %v2854_v37, %v3034_v42  ;;  %v3123_v42 = vrot.slane %v3114_v39, %v4721_v13 }
 0x261   :  { %v3043_v52 = vmax.f32 %v2856_v43, %v3035_v59  ;;  %v3046_v63 = vpack.c.bf16 %v3042_v47, %v3038_v61 }
 0x263   :  { %v3047_v62 = vpack.c.bf16 %v3043_v52, %v3039_v49  ;;  %v3540_v49 = vld [vmem:[%s4818_s7] sm:$0x3] }
 0x265   :  { %3478 = vmatprep.mubr.bf16.mxu0 %v3047_v62 }
 0x266   :  { %3479 = vmatmul.mubr.bf16.vlgmr.msra.gmra.mxu0 %v3046_v63 }
 0x294   :  { %v2892_v0 = vpop.f32.mrf.mxu0  ;;  %v2935_v1 = vpop.f32.mrf.mxu1 }
 0x295   :  { %v2893_v56 = vadd.f32 %v2892_v0, %v1397_v4  ;;  %v3545_v0 = vrot.slane %v3540_v49, %v4724_v14  ;;  %v4029_v14 = vld [vmem:[#allocation2] ss:$0 sm:$0xff] }
 0x296   :  { %v2894_v2 = vpop.f32.mrf.mxu0  ;;  %v2937_v3 = vpop.f32.mrf.mxu1 }
 0x297   :  { %v2895_v8 = vadd.f32 %v2894_v2, %v1401_v53  ;;  %v2936_v11 = vadd.f32 %v2935_v1, %v2893_v56 }
 0x298   :  { %v2896_v6 = vpop.f32.mrf.mxu0  ;;  %v2939_v7 = vpop.f32.mrf.mxu1 }
 0x299   :  { %v2897_v10 = vadd.f32 %v2896_v6, %v1397_v4  ;;  %v2938_v19 = vadd.f32 %v2937_v3, %v2895_v8  ;;  %v3549_v4 = vrot.slane %v3540_v49, %v4721_v13 }
 0x29a   :  { %v2898_v9 = vpop.f32.mrf.mxu0  ;;  %v2941_v55 = vpop.f32.mrf.mxu1 }
 0x29b   :  { %v2899_v48 = vadd.f32 %v2898_v9, %v1401_v53  ;;  %v2940_v50 = vadd.f32 %v2939_v7, %v2897_v10 }
 0x29d   :  { %v2942_v17 = vadd.f32 %v2941_v55, %v2899_v48 }
 0x2d4   :  { %v2978_v60 = vpop.f32.mrf.mxu0 }
 0x2d5   :  { %v3021_v20 = vpop.f32.mrf.mxu1  ;;  %v2979_v21 = vadd.f32 %v2978_v60, %v2936_v11 }
 0x2d6   :  { %v2980_v51 = vpop.f32.mrf.mxu0 }
 0x2d7   :  { %v2981_v18 = vadd.f32 %v2980_v51, %v2938_v19  ;;  %v3023_v54 = vpop.f32.mrf.mxu1  ;;  %v3022_v23 = vadd.f32 %v3021_v20, %v2979_v21 }
 0x2d8   :  { %v2982_v12 = vpop.f32.mrf.mxu0 }
 0x2d9   :  { %v3024_v16 = vadd.f32 %v3023_v54, %v2981_v18  ;;  %v2983_v5 = vadd.f32 %v2982_v12, %v2940_v50  ;;  %v3025_v22 = vpop.f32.mrf.mxu1  ;;  %v3032_v30 = vmul.f32 0.2, %v3022_v23 }
 0x2da   :  { %v2984_v24 = vpop.f32.mrf.mxu0 }
 0x2db   :  { %v3026_v15 = vadd.f32 %v3025_v22, %v2983_v5  ;;  %v2985_v25 = vadd.f32 %v2984_v24, %v2942_v17  ;;  %v3027_v26 = vpop.f32.mrf.mxu1  ;;  %v3033_v27 = vmul.f32 0.2, %v3024_v16  ;;  %v3040_v35 = vmax.f32 %v3022_v23, %v3032_v30 }
 0x2dd   :  { %v3036_v28 = vmul.f32 0.2, %v3026_v15  ;;  %v3028_v29 = vadd.f32 %v3027_v26, %v2985_v25  ;;  %v3041_v33 = vmax.f32 %v3024_v16, %v3033_v27 }
 0x2df   :  { %v3037_v31 = vmul.f32 0.2, %v3028_v29  ;;  %v3044_v32 = vmax.f32 %v3026_v15, %v3036_v28 }
 0x2e1   :  { %v3045_v34 = vmax.f32 %v3028_v29, %v3037_v31  ;;  %v3048_v37 = vpack.c.bf16 %v3044_v32, %v3040_v35 }
 0x2e3   :  { %v3049_v36 = vpack.c.bf16 %v3045_v34, %v3041_v33 }
 0x2e5   :  { %3521 = vmatprep.mubr.bf16.mxu1 %v3049_v36 }
 0x2e6   :  { %3522 = vmatmul.mubr.bf16.vlgmr.msra.gmra.mxu1 %v3048_v37 }
 0x326   :  { %v3480_v38 = vpop.f32.mrf.mxu0 }
 0x327   :  { %v3481_v44 = vadd.f32 %v3480_v38, %v3119_v41 }
 0x328   :  { %v3482_v40 = vpop.f32.mrf.mxu0 }
 0x329   :  { %v3483_v59 = vadd.f32 %v3482_v40, %v3123_v42 }
 0x32a   :  { %v3484_v43 = vpop.f32.mrf.mxu0 }
 0x32b   :  { %v3485_v57 = vadd.f32 %v3484_v43, %v3119_v41 }
 0x32c   :  { %v3486_v46 = vpop.f32.mrf.mxu0 }
 0x32d   :  { %v3487_v62 = vadd.f32 %v3486_v46, %v3123_v42 }
 0x3a6   :  { %v3523_v45 = vpop.f32.mrf.mxu1 }
 0x3a7   :  { %v3524_v47 = vadd.f32 %v3523_v45, %v3481_v44 }
 0x3a8   :  { %v3525_v52 = vpop.f32.mrf.mxu1 }
 0x3a9   :  { %v3532_v58 = vmul.f32 0.2, %v3524_v47  ;;  %v3526_v61 = vadd.f32 %v3525_v52, %v3483_v59 }
 0x3aa   :  { %v3527_v63 = vpop.f32.mrf.mxu1 }
 0x3ab   :  { %v3536_v1 = vmax.f32 %v3524_v47, %v3532_v58  ;;  %v3533_v2 = vmul.f32 0.2, %v3526_v61  ;;  %v3528_v3 = vadd.f32 %v3527_v63, %v3485_v57 }
 0x3ac   :  { %v3529_v53 = vpop.f32.mrf.mxu1 }
 0x3ad   :  { %v3537_v6 = vmax.f32 %v3526_v61, %v3533_v2  ;;  %v3534_v7 = vmul.f32 0.2, %v3528_v3  ;;  %v3530_v56 = vadd.f32 %v3529_v53, %v3487_v62  ;;  %v3552_v10 = vmul.f32 %v3545_v0, %v3536_v1 }
 0x3af   :  { %v3538_v8 = vmax.f32 %v3528_v3, %v3534_v7  ;;  %v3535_v9 = vmul.f32 0.2, %v3530_v56  ;;  %v3553_v55 = vmul.f32 %v3549_v4, %v3537_v6 }
 0x3b1   :  { %v3539_v11 = vmax.f32 %v3530_v56, %v3535_v9  ;;  %v3556_v60 = vadd.f32 %v3553_v55, %v3552_v10  ;;  %v3554_v19 = vmul.f32 %v3545_v0, %v3538_v8 }
 0x3b3   :  { %3557 = vadd.xlane.f32.xlu0 %v3556_v60  ;;  %v3555_v48 = vmul.f32 %v3549_v4, %v3539_v11 }
 0x3b5   :  { %v3559_v20 = vadd.f32 %v3555_v48, %v3554_v19 }
 0x3b7   :  { %3560 = vadd.xlane.f32.xlu0 %v3559_v20 }
 0x43c   :  { %v3558_v21 = vpop.xlane.xlu0 %3557 }
 0x43d   :  { %v3569_v51 = vadd.f32 %v4029_v14, %v3558_v21 }
 0x43f   :  { %3572 = vst.msk [vmem:[%s4820_s9] sm:$0xff] %vm3571_vm0, %v3569_v51 }
 0x440   :  { %v3561_v13 = vpop.xlane.xlu0 %3560 }
 0x441   :  { %v3570_v50 = vadd.f32 %v4029_v14, %v3561_v13 }
 0x443   :  { %3573 = vst.msk [vmem:[%s4820_s9 + $0x8] sm:$0xff] %vm3571_vm0, %v3570_v50 }
 0x444   :  { %3578 = vsyncpa [#allocation4], 1 }
 0x445   :  { %3579 = vsyncpa [#allocation6], 1 }
 0x446   :  { %3580 = vsyncpa [#allocation9], 1 }

// kernel: tpu_custom_call.1
= control target key start
LH: loop header
LB: loop body
LE: loop exit
PB: predicated region body
PF: predicated region fallthrough
CT: control target
= control target key end

     0   :  { %s4811_s0 = inlined_call_operand.hbm [shape: f32[16,256], index: 0, kind: input, shape index: {}]   ;;  %s4812_s1 = inlined_call_operand.hbm [shape: bf16[256,1024], index: 1, kind: input, shape index: {}]   ;;  %s4813_s2 = inlined_call_operand.hbm [shape: f32[1,1024], index: 2, kind: input, shape index: {}]   ;;  %s4814_s3 = inlined_call_operand.hbm [shape: bf16[1024,512], index: 3, kind: input, shape index: {}]   ;;  %s4815_s4 = inlined_call_operand.vmem [shape: f32[1,512], index: 4, kind: input, shape index: {}]   ;;  %s4816_s5 = inlined_call_operand.hbm [shape: bf16[512,256], index: 5, kind: input, shape index: {}]   ;;  %s4817_s6 = inlined_call_operand.vmem [shape: f32[1,256], index: 6, kind: input, shape index: {}]   ;;  %s4818_s7 = inlined_call_operand.vmem [shape: f32[1,256], index: 7, kind: input, shape index: {}]   ;;  %s4819_s8 = inlined_call_operand.<no memory space> [shape: f32[1,1], index: 8, kind: input, shape index: {}]   ;;  %s4820_s9 = inlined_call_operand.vmem [shape: f32[16,1], index: 9, kind: output, shape index: {}]  }
   0x1   :  { %v14_v0 = vstv %s4819_s8 }
   0x2   :  { %15 = vst [vmem:[#allocation2] sm:$0x1] %v14_v0 }
   0x3   :  { %16 = vsyncpa [#allocation4], 0 }
   0x4   :  { %17 = vsyncpa [#allocation6], 0 }
   0x5   :  { %18 = vsyncpa [#allocation9], 0  ;;  %s4627_s11 = smov [#allocation5]  }
   0x6   :  { %s36_s12 = sshll.u32 %s4627_s11, 4  ;;  %s37_s12 = int_to_ptr.vmem [resolvable:$true] %s36_s12 }
   0x7   :  { %s4529_s13 = scalar_lea.vmem %s37_s12, 16384  ;;  %p4534_p1 = scmp.lt.s32.totalorder %s37_s12, %s37_s12 }
   0x8   :  { %p4530_p0 = scmp.ne.s32.totalorder %s37_s12, %s4529_s13  ;;  %p4535_p2 = scmp.lt.s32.totalorder %s4529_s13, %s4529_s13 }
   0xa   :  { %p4536_p3 = por %p4535_p2, %p4534_p1 }
   0xc   :  { %p4537_p4 = pnand %p4536_p3, %p4530_p0 }
   0xe   :  { %4540 = shalt.err (!%p4537_p4)
}
   0xf   :  { %s4628_s14 = smov 512   ;;  %s4629_s15 = smov 32  }
  0x10   :  { %42 = dma.hbm_to_vmem [thread:$0]  %s4812_s1, 16384, %s37_s12, [#allocation6], %s4628_s14, %s4628_s14, %s4629_s15  }
  0x11   :  { %s4630_s8 = smov [#allocation8]   ;;  %s4631_s19 = smov [#allocation3]  }
  0x12   :  { %s58_s18 = sshll.u32 %s4630_s8, 4  ;;  %s24_s20 = sshll.u32 %s4631_s19, 4  ;;  %s59_s18 = int_to_ptr.vmem [resolvable:$true] %s58_s18  ;;  %s25_s20 = int_to_ptr.vmem [resolvable:$true] %s24_s20 }
  0x13   :  { %s4549_s21 = scalar_lea.vmem %s59_s18, 32768  ;;  %p4554_p6 = scmp.lt.s32.totalorder %s59_s18, %s59_s18 }
  0x14   :  { %p4550_p5 = scmp.ne.s32.totalorder %s59_s18, %s4549_s21  ;;  %p4555_p7 = scmp.lt.s32.totalorder %s4549_s21, %s4549_s21 }
  0x16   :  { %p4556_p8 = por %p4555_p7, %p4554_p6 }
  0x18   :  { %p4557_p9 = pnand %p4556_p8, %p4550_p5 }
  0x1a   :  { %4560 = shalt.err (!%p4557_p9)
}
  0x1b   :  { %s4632_s22 = smov 256   ;;  %s4633_s23 = smov 16  }
  0x1c   :  { %64 = dma.hbm_to_vmem [thread:$0]  %s4814_s3, 32768, %s59_s18, [#allocation9], %s4632_s22, %s4632_s22, %s4633_s23  }
  0x1d   :  { %s4569_s1 = scalar_lea.vmem %s25_s20, 512  ;;  %p4574_p11 = scmp.lt.s32.totalorder %s25_s20, %s25_s20 }
  0x1e   :  { %p4570_p10 = scmp.ne.s32.totalorder %s25_s20, %s4569_s1  ;;  %p4575_p12 = scmp.lt.s32.totalorder %s4569_s1, %s4569_s1 }
  0x20   :  { %p4576_p13 = por %p4575_p12, %p4574_p11 }
  0x22   :  { %p4577_p0 = pnand %p4576_p13, %p4570_p10 }
  0x24   :  { %4580 = shalt.err (!%p4577_p0)
}
  0x25   :  { %30 = dma.hbm_to_vmem [thread:$0]  %s4811_s0, 512, %s25_s20, [#allocation4], %s4632_s22, %s4632_s22, %s4633_s23  }
  0x26   :  { %s4634_s28 = smov [#allocation7]   ;;  %s4635_s30 = smov [#allocation10]  }
  0x27   :  { %s49_s29 = sshll.u32 %s4634_s28, 4  ;;  %s72_s10 = sshll.u32 %s4635_s30, 4  ;;  %s50_s29 = int_to_ptr.vmem [resolvable:$true] %s49_s29  ;;  %s73_s10 = int_to_ptr.vmem [resolvable:$true] %s72_s10 }
  0x28   :  { %s4589_s11 = scalar_lea.vmem %s50_s29, 128  ;;  %p4594_p2 = scmp.lt.s32.totalorder %s50_s29, %s50_s29 }
  0x29   :  { %p4590_p1 = scmp.ne.s32.totalorder %s50_s29, %s4589_s11  ;;  %p4595_p3 = scmp.lt.s32.totalorder %s4589_s11, %s4589_s11 }
  0x2b   :  { %p4596_p4 = por %p4595_p3, %p4594_p2 }
  0x2d   :  { %p4597_p5 = pnand %p4596_p4, %p4590_p1 }
  0x2f   :  { %4600 = shalt.err (!%p4597_p5)
}
  0x30   :  { %52 = dma.hbm_to_vmem [thread:$0]  %s4813_s2, 128, %s50_s29, [#allocation6]  }
  0x31   :  { %s4609_s13 = scalar_lea.vmem %s73_s10, 8192  ;;  %p4614_p7 = scmp.lt.s32.totalorder %s73_s10, %s73_s10 }
  0x32   :  { %p4610_p6 = scmp.ne.s32.totalorder %s73_s10, %s4609_s13  ;;  %p4615_p8 = scmp.lt.s32.totalorder %s4609_s13, %s4609_s13 }
  0x34   :  { %p4616_p9 = por %p4615_p8, %p4614_p7 }
  0x36   :  { %p4617_p10 = pnand %p4616_p9, %p4610_p6 }
  0x38   :  { %4620 = shalt.err (!%p4617_p10)
}
  0x39   :  { %s4636_s0 = smov 128   ;;  %s4637_s14 = smov 8  }
  0x3a   :  { %78 = dma.hbm_to_vmem [thread:$0]  %s4816_s5, 8192, %s73_s10, [#allocation9], %s4636_s0, %s4636_s0, %s4637_s14  }
  0x3b   :  { %4621 = dma.done.wait [#allocation4], 512  }
  0x3c   :  { %4622 = vsyncadd [#allocation4], 4294966784 }
  0x3d   :  { %4623 = dma.done.wait [#allocation6], 16512  }
  0x3e   :  { %4624 = vsyncadd [#allocation6], 4294950784 }
  0x3f   :  { %4625 = dma.done.wait [#allocation9], 40960  }
  0x40   :  { %4626 = vsyncadd [#allocation9], 4294926336  ;;  %v162_v1 = vld [vmem:[#allocation5 + $0x1c0] sm:$0xff]  ;;  %v163_v3 = vld [vmem:[#allocation5 + $0x1c8] sm:$0xff]  ;;  %vm3571_vm0 = vcmask 7168  }
  0x41   :  { %v166_v2 = vld [vmem:[#allocation5 + $0x1e0] sm:$0xff]  ;;  %v167_v5 = vld [vmem:[#allocation5 + $0x1e8] sm:$0xff]  ;;  %v103_v55 = vld [vmem:[#allocation3 + $0x18] sm:$0xff] }
  0x42   :  { %v3638_v4 = vcombine.high %v162_v1, %v166_v2  ;;  %v3637_v6 = vcombine.low %v162_v1, %v166_v2  ;;  %v154_v7 = vld [vmem:[#allocation5 + $0x180] sm:$0xff]  ;;  %v3640_v9 = vcombine.high %v163_v3, %v167_v5  ;;  %v3639_v10 = vcombine.low %v163_v3, %v167_v5  ;;  %v155_v12 = vld [vmem:[#allocation5 + $0x188] sm:$0xff] }
  0x43   :  { %v158_v8 = vld [vmem:[#allocation5 + $0x1a0] sm:$0xff]  ;;  %v159_v13 = vld [vmem:[#allocation5 + $0x1a8] sm:$0xff] }
  0x44   :  { %v3630_v11 = vcombine.high %v154_v7, %v158_v8  ;;  %v146_v14 = vld [vmem:[#allocation5 + $0x140] sm:$0xff]  ;;  %916 = vmatprep.subr.bf16.mxu0 %v3638_v4  ;;  %v3632_v15 = vcombine.high %v155_v12, %v159_v13  ;;  %v147_v17 = vld [vmem:[#allocation5 + $0x148] sm:$0xff]  ;;  %959 = vmatprep.subr.bf16.mxu1 %v3640_v9  ;;  %v3629_v19 = vcombine.low %v154_v7, %v158_v8 }
  0x45   :  { %v150_v16 = vld [vmem:[#allocation5 + $0x160] sm:$0xff]  ;;  %v151_v18 = vld [vmem:[#allocation5 + $0x168] sm:$0xff]  ;;  %917 = vmatpush1.bf16.msra.mxu0 %v3637_v6  ;;  %960 = vmatpush1.bf16.msra.mxu1 %v3639_v10  ;;  %v3631_v20 = vcombine.low %v155_v12, %v159_v13 }
  0x46   :  { %918 = vmatprep.subr.bf16.mxu0 %v3630_v11  ;;  %v3622_v21 = vcombine.high %v146_v14, %v150_v16  ;;  %961 = vmatprep.subr.bf16.mxu1 %v3632_v15  ;;  %v3624_v22 = vcombine.high %v147_v17, %v151_v18  ;;  %v138_v23 = vld [vmem:[#allocation5 + $0x100] sm:$0xff]  ;;  %v139_v25 = vld [vmem:[#allocation5 + $0x108] sm:$0xff]  ;;  %v3621_v27 = vcombine.low %v146_v14, %v150_v16 }
  0x47   :  { %v142_v24 = vld [vmem:[#allocation5 + $0x120] sm:$0xff]  ;;  %v143_v26 = vld [vmem:[#allocation5 + $0x128] sm:$0xff]  ;;  %v3623_v28 = vcombine.low %v147_v17, %v151_v18 }
  0x48   :  { %v3614_v29 = vcombine.high %v138_v23, %v142_v24  ;;  %v3616_v30 = vcombine.high %v139_v25, %v143_v26  ;;  %v130_v31 = vld [vmem:[#allocation5 + $0xc0] sm:$0xff]  ;;  %v131_v33 = vld [vmem:[#allocation5 + $0xc8] sm:$0xff]  ;;  %v3613_v35 = vcombine.low %v138_v23, %v142_v24  ;;  %v3615_v36 = vcombine.low %v139_v25, %v143_v26 }
  0x49   :  { %919 = vmatpush1.bf16.msra.mxu0 %v3629_v19  ;;  %962 = vmatpush1.bf16.msra.mxu1 %v3631_v20  ;;  %v134_v32 = vld [vmem:[#allocation5 + $0xe0] sm:$0xff]  ;;  %v135_v34 = vld [vmem:[#allocation5 + $0xe8] sm:$0xff] }
  0x4a   :  { %920 = vmatprep.subr.bf16.mxu0 %v3622_v21  ;;  %963 = vmatprep.subr.bf16.mxu1 %v3624_v22  ;;  %v3606_v37 = vcombine.high %v130_v31, %v134_v32  ;;  %v3608_v38 = vcombine.high %v131_v33, %v135_v34  ;;  %v122_v39 = vld [vmem:[#allocation5 + $0x80] sm:$0xff]  ;;  %v123_v41 = vld [vmem:[#allocation5 + $0x88] sm:$0xff]  ;;  %v3605_v43 = vcombine.low %v130_v31, %v134_v32 }
  0x4b   :  { %v126_v40 = vld [vmem:[#allocation5 + $0xa0] sm:$0xff]  ;;  %v127_v42 = vld [vmem:[#allocation5 + $0xa8] sm:$0xff]  ;;  %v3607_v44 = vcombine.low %v131_v33, %v135_v34 }
  0x4c   :  { %v3598_v45 = vcombine.high %v122_v39, %v126_v40  ;;  %v3600_v46 = vcombine.high %v123_v41, %v127_v42  ;;  %v114_v47 = vld [vmem:[#allocation5 + $0x40] sm:$0xff]  ;;  %v115_v49 = vld [vmem:[#allocation5 + $0x48] sm:$0xff]  ;;  %v3597_v51 = vcombine.low %v122_v39, %v126_v40  ;;  %v3599_v52 = vcombine.low %v123_v41, %v127_v42 }
  0x4d   :  { %921 = vmatpush1.bf16.msra.mxu0 %v3621_v27  ;;  %964 = vmatpush1.bf16.msra.mxu1 %v3623_v28  ;;  %v118_v48 = vld [vmem:[#allocation5 + $0x60] sm:$0xff]  ;;  %v119_v50 = vld [vmem:[#allocation5 + $0x68] sm:$0xff] }
  0x4e   :  { %922 = vmatprep.subr.bf16.mxu0 %v3614_v29  ;;  %965 = vmatprep.subr.bf16.mxu1 %v3616_v30  ;;  %v3590_v53 = vcombine.high %v114_v47, %v118_v48  ;;  %v101_v54 = vld [vmem:[#allocation3 + $0x8] sm:$0xff]  ;;  %v3592_v56 = vcombine.high %v115_v49, %v119_v50  ;;  %v106_v57 = vld [vmem:[#allocation5] sm:$0xff]  ;;  %v3589_v62 = vcombine.low %v114_v47, %v118_v48 }
  0x4f   :  { %v110_v58 = vld [vmem:[#allocation5 + $0x20] sm:$0xff]  ;;  %v4706_v59 = vpack.c.bf16 %v103_v55, %v101_v54  ;;  %v107_v60 = vld [vmem:[#allocation5 + $0x8] sm:$0xff]  ;;  %v3591_v63 = vcombine.low %v115_v49, %v119_v50 }
  0x50   :  { %v111_v61 = vld [vmem:[#allocation5 + $0x28] sm:$0xff]  ;;  %v3582_v0 = vcombine.high %v106_v57, %v110_v58  ;;  %v226_v2 = vld [vmem:[#allocation5 + $0x3c0] sm:$0xff]  ;;  %v3581_v6 = vcombine.low %v106_v57, %v110_v58 }
  0x51   :  { %923 = vmatpush1.bf16.msra.mxu0 %v3613_v35  ;;  %966 = vmatpush1.bf16.msra.mxu1 %v3615_v36  ;;  %v3584_v1 = vcombine.high %v107_v60, %v111_v61  ;;  %v230_v3 = vld [vmem:[#allocation5 + $0x3e0] sm:$0xff]  ;;  %v227_v4 = vld [vmem:[#allocation5 + $0x3c8] sm:$0xff]  ;;  %v3583_v7 = vcombine.low %v107_v60, %v111_v61 }
  0x52   :  { %924 = vmatprep.subr.bf16.mxu0 %v3606_v37  ;;  %967 = vmatprep.subr.bf16.mxu1 %v3608_v38  ;;  %v231_v5 = vld [vmem:[#allocation5 + $0x3e8] sm:$0xff]  ;;  %v3702_v8 = vcombine.high %v226_v2, %v230_v3  ;;  %v218_v10 = vld [vmem:[#allocation5 + $0x380] sm:$0xff]  ;;  %v3701_v14 = vcombine.low %v226_v2, %v230_v3 }
  0x53   :  { %948 = vmatprep.mubr.bf16.mxu0 %v4706_v59  ;;  %991 = vmatprep.mubr.bf16.mxu1 %v4706_v59  ;;  %v3704_v9 = vcombine.high %v227_v4, %v231_v5  ;;  %v222_v11 = vld [vmem:[#allocation5 + $0x3a0] sm:$0xff]  ;;  %v219_v12 = vld [vmem:[#allocation5 + $0x388] sm:$0xff]  ;;  %v3703_v15 = vcombine.low %v227_v4, %v231_v5  ;;  %v164_v4 = vld [vmem:[#allocation5 + $0x1d0] sm:$0xff] }
  0x54   :  { %v223_v13 = vld [vmem:[#allocation5 + $0x3a8] sm:$0xff]  ;;  %v3694_v16 = vcombine.high %v218_v10, %v222_v11  ;;  %v210_v18 = vld [vmem:[#allocation5 + $0x340] sm:$0xff]  ;;  %v3693_v22 = vcombine.low %v218_v10, %v222_v11  ;;  %v168_v5 = vld [vmem:[#allocation5 + $0x1f0] sm:$0xff] }
  0x55   :  { %925 = vmatpush1.bf16.msra.mxu0 %v3605_v43  ;;  %968 = vmatpush1.bf16.msra.mxu1 %v3607_v44  ;;  %v3696_v17 = vcombine.high %v219_v12, %v223_v13  ;;  %v214_v19 = vld [vmem:[#allocation5 + $0x360] sm:$0xff]  ;;  %v211_v20 = vld [vmem:[#allocation5 + $0x348] sm:$0xff]  ;;  %v3695_v23 = vcombine.low %v219_v12, %v223_v13  ;;  %v3642_v11 = vcombine.high %v164_v4, %v168_v5  ;;  %v156_v13 = vld [vmem:[#allocation5 + $0x190] sm:$0xff] }
  0x56   :  { %926 = vmatprep.subr.bf16.mxu0 %v3598_v45  ;;  %969 = vmatprep.subr.bf16.mxu1 %v3600_v46  ;;  %v215_v21 = vld [vmem:[#allocation5 + $0x368] sm:$0xff]  ;;  %v3686_v24 = vcombine.high %v210_v18, %v214_v19  ;;  %v202_v26 = vld [vmem:[#allocation5 + $0x300] sm:$0xff]  ;;  %v3685_v30 = vcombine.low %v210_v18, %v214_v19  ;;  %v3641_v18 = vcombine.low %v164_v4, %v168_v5  ;;  %v232_v4 = vld [vmem:[#allocation5 + $0x3f0] sm:$0xff] }
  0x57   :  { %v3688_v25 = vcombine.high %v211_v20, %v215_v21  ;;  %v206_v27 = vld [vmem:[#allocation5 + $0x320] sm:$0xff]  ;;  %v203_v28 = vld [vmem:[#allocation5 + $0x308] sm:$0xff]  ;;  %v3687_v31 = vcombine.low %v211_v20, %v215_v21 }
  0x58   :  { %v207_v29 = vld [vmem:[#allocation5 + $0x328] sm:$0xff]  ;;  %v3678_v32 = vcombine.high %v202_v26, %v206_v27  ;;  %v194_v34 = vld [vmem:[#allocation5 + $0x2c0] sm:$0xff]  ;;  %v3677_v38 = vcombine.low %v202_v26, %v206_v27 }
  0x59   :  { %927 = vmatpush1.bf16.msra.mxu0 %v3597_v51  ;;  %970 = vmatpush1.bf16.msra.mxu1 %v3599_v52  ;;  %v3680_v33 = vcombine.high %v203_v28, %v207_v29  ;;  %v198_v35 = vld [vmem:[#allocation5 + $0x2e0] sm:$0xff]  ;;  %v195_v36 = vld [vmem:[#allocation5 + $0x2c8] sm:$0xff]  ;;  %v3679_v39 = vcombine.low %v203_v28, %v207_v29 }
  0x5a   :  { %928 = vmatprep.subr.bf16.mxu0 %v3590_v53  ;;  %971 = vmatprep.subr.bf16.mxu1 %v3592_v56  ;;  %v199_v37 = vld [vmem:[#allocation5 + $0x2e8] sm:$0xff]  ;;  %v3670_v40 = vcombine.high %v194_v34, %v198_v35  ;;  %v186_v42 = vld [vmem:[#allocation5 + $0x280] sm:$0xff]  ;;  %v3669_v46 = vcombine.low %v194_v34, %v198_v35 }
  0x5b   :  { %v3672_v41 = vcombine.high %v195_v36, %v199_v37  ;;  %v190_v43 = vld [vmem:[#allocation5 + $0x2a0] sm:$0xff]  ;;  %v187_v44 = vld [vmem:[#allocation5 + $0x288] sm:$0xff]  ;;  %v3671_v47 = vcombine.low %v195_v36, %v199_v37 }
  0x5c   :  { %v191_v45 = vld [vmem:[#allocation5 + $0x2a8] sm:$0xff]  ;;  %v3662_v48 = vcombine.high %v186_v42, %v190_v43  ;;  %v178_v50 = vld [vmem:[#allocation5 + $0x240] sm:$0xff]  ;;  %v3661_v54 = vcombine.low %v186_v42, %v190_v43 }
  0x5d   :  { %929 = vmatpush1.bf16.msra.mxu0 %v3589_v62  ;;  %972 = vmatpush1.bf16.msra.mxu1 %v3591_v63  ;;  %v3664_v49 = vcombine.high %v187_v44, %v191_v45  ;;  %v182_v51 = vld [vmem:[#allocation5 + $0x260] sm:$0xff]  ;;  %v179_v52 = vld [vmem:[#allocation5 + $0x248] sm:$0xff]  ;;  %v3663_v55 = vcombine.low %v187_v44, %v191_v45  ;;  %v124_v45 = vld [vmem:[#allocation5 + $0x90] sm:$0xff] }
  0x5e   :  { %930 = vmatprep.subr.bf16.mxu0 %v3582_v0  ;;  %973 = vmatprep.subr.bf16.mxu1 %v3584_v1  ;;  %v183_v53 = vld [vmem:[#allocation5 + $0x268] sm:$0xff]  ;;  %v3654_v56 = vcombine.high %v178_v50, %v182_v51  ;;  %v170_v58 = vld [vmem:[#allocation5 + $0x200] sm:$0xff]  ;;  %v3653_v63 = vcombine.low %v178_v50, %v182_v51  ;;  %v116_v50 = vld [vmem:[#allocation5 + $0x50] sm:$0xff] }
  0x5f   :  { %v3656_v57 = vcombine.high %v179_v52, %v183_v53  ;;  %v174_v60 = vld [vmem:[#allocation5 + $0x220] sm:$0xff]  ;;  %v171_v61 = vld [vmem:[#allocation5 + $0x208] sm:$0xff]  ;;  %v3655_v0 = vcombine.low %v179_v52, %v183_v53  ;;  %v120_v51 = vld [vmem:[#allocation5 + $0x70] sm:$0xff] }
  0x60   :  { %v175_v62 = vld [vmem:[#allocation5 + $0x228] sm:$0xff]  ;;  %v3646_v1 = vcombine.high %v170_v58, %v174_v60  ;;  %v100_v3 = vld [vmem:[#allocation3] sm:$0xff] }
  0x61   :  { %931 = vmatpush1.bf16.msra.mxu0 %v3581_v6  ;;  %974 = vmatpush1.bf16.msra.mxu1 %v3583_v7  ;;  %v3648_v2 = vcombine.high %v171_v61, %v175_v62  ;;  %v165_v6 = vld [vmem:[#allocation5 + $0x1d8] sm:$0xff]  ;;  %v3647_v10 = vcombine.low %v171_v61, %v175_v62  ;;  %v3594_v62 = vcombine.high %v116_v50, %v120_v51 }
  0x62   :  { %932 = vmatprep.subr.bf16.mxu0 %v3702_v8  ;;  %975 = vmatprep.subr.bf16.mxu1 %v3704_v9  ;;  %v169_v7 = vld [vmem:[#allocation5 + $0x1f8] sm:$0xff]  ;;  %v3645_v8 = vcombine.low %v170_v58, %v174_v60  ;;  %v102_v9 = vld [vmem:[#allocation3 + $0x10] sm:$0xff] }
  0x63   :  { %v3644_v12 = vcombine.high %v165_v6, %v169_v7  ;;  %v3643_v19 = vcombine.low %v165_v6, %v169_v7  ;;  %v108_v58 = vld [vmem:[#allocation5 + $0x10] sm:$0xff]  ;;  %v229_v7 = vld [vmem:[#allocation5 + $0x3d8] sm:$0xff] }
  0x64   :  { %v112_v60 = vld [vmem:[#allocation5 + $0x30] sm:$0xff] }
  0x65   :  { %933 = vmatpush2.bf16.msra.mxu0 %v3701_v14  ;;  %976 = vmatpush2.bf16.msra.mxu1 %v3703_v15  ;;  %v160_v14 = vld [vmem:[#allocation5 + $0x1b0] sm:$0xff]  ;;  %v4710_v15 = vpack.c.bf16 %v102_v9, %v100_v3  ;;  %v3586_v6 = vcombine.high %v108_v58, %v112_v60 }
  0x66   :  { %934 = vmatprep.subr.bf16.mxu0 %v3694_v16  ;;  %977 = vmatprep.subr.bf16.mxu1 %v3696_v17  ;;  %v157_v16 = vld [vmem:[#allocation5 + $0x198] sm:$0xff]  ;;  %v3634_v20 = vcombine.high %v156_v13, %v160_v14  ;;  %v3633_v26 = vcombine.low %v156_v13, %v160_v14  ;;  %v228_v3 = vld [vmem:[#allocation5 + $0x3d0] sm:$0xff] }
  0x67   :  { %v161_v17 = vld [vmem:[#allocation5 + $0x1b8] sm:$0xff]  ;;  %v3706_v14 = vcombine.high %v228_v3, %v232_v4 }
  0x68   :  { %v3636_v21 = vcombine.high %v157_v16, %v161_v17  ;;  %v3635_v27 = vcombine.low %v157_v16, %v161_v17  ;;  %v221_v16 = vld [vmem:[#allocation5 + $0x398] sm:$0xff] }
  0x69   :  { %935 = vmatpush2.bf16.msra.mxu0 %v3693_v22  ;;  %978 = vmatpush2.bf16.msra.mxu1 %v3695_v23  ;;  %v148_v22 = vld [vmem:[#allocation5 + $0x150] sm:$0xff]  ;;  %v225_v17 = vld [vmem:[#allocation5 + $0x3b8] sm:$0xff] }
  0x6a   :  { %936 = vmatprep.subr.bf16.mxu0 %v3686_v24  ;;  %979 = vmatprep.subr.bf16.mxu1 %v3688_v25  ;;  %v152_v23 = vld [vmem:[#allocation5 + $0x170] sm:$0xff]  ;;  %v149_v24 = vld [vmem:[#allocation5 + $0x158] sm:$0xff] }
  0x6b   :  { %v153_v25 = vld [vmem:[#allocation5 + $0x178] sm:$0xff]  ;;  %v3626_v28 = vcombine.high %v148_v22, %v152_v23  ;;  %v3625_v34 = vcombine.low %v148_v22, %v152_v23 }
  0x6c   :  { %v3628_v29 = vcombine.high %v149_v24, %v153_v25  ;;  %v3627_v35 = vcombine.low %v149_v24, %v153_v25  ;;  %v213_v24 = vld [vmem:[#allocation5 + $0x358] sm:$0xff] }
  0x6d   :  { %937 = vmatpush2.bf16.msra.mxu0 %v3685_v30  ;;  %980 = vmatpush2.bf16.msra.mxu1 %v3687_v31  ;;  %v140_v30 = vld [vmem:[#allocation5 + $0x110] sm:$0xff]  ;;  %v217_v25 = vld [vmem:[#allocation5 + $0x378] sm:$0xff] }
  0x6e   :  { %938 = vmatprep.subr.bf16.mxu0 %v3678_v32  ;;  %981 = vmatprep.subr.bf16.mxu1 %v3680_v33  ;;  %v144_v31 = vld [vmem:[#allocation5 + $0x130] sm:$0xff]  ;;  %v141_v32 = vld [vmem:[#allocation5 + $0x118] sm:$0xff] }
  0x6f   :  { %v145_v33 = vld [vmem:[#allocation5 + $0x138] sm:$0xff]  ;;  %v3618_v36 = vcombine.high %v140_v30, %v144_v31  ;;  %v3617_v42 = vcombine.low %v140_v30, %v144_v31  ;;  %v3699_v30 = vcombine.low %v221_v16, %v225_v17 }
  0x70   :  { %v3620_v37 = vcombine.high %v141_v32, %v145_v33  ;;  %v3619_v43 = vcombine.low %v141_v32, %v145_v33  ;;  %v205_v32 = vld [vmem:[#allocation5 + $0x318] sm:$0xff] }
  0x71   :  { %939 = vmatpush2.bf16.msra.mxu0 %v3677_v38  ;;  %982 = vmatpush2.bf16.msra.mxu1 %v3679_v39  ;;  %v132_v38 = vld [vmem:[#allocation5 + $0xd0] sm:$0xff]  ;;  %v209_v33 = vld [vmem:[#allocation5 + $0x338] sm:$0xff] }
  0x72   :  { %940 = vmatprep.subr.bf16.mxu0 %v3670_v40  ;;  %983 = vmatprep.subr.bf16.mxu1 %v3672_v41  ;;  %v136_v39 = vld [vmem:[#allocation5 + $0xf0] sm:$0xff]  ;;  %v133_v40 = vld [vmem:[#allocation5 + $0xd8] sm:$0xff] }
  0x73   :  { %v137_v41 = vld [vmem:[#allocation5 + $0xf8] sm:$0xff]  ;;  %v3610_v44 = vcombine.high %v132_v38, %v136_v39 }
  0x74   :  { %v3611_v52 = vcombine.low %v133_v40, %v137_v41 }
  0x75   :  { %941 = vmatpush2.bf16.msra.mxu0 %v3669_v46  ;;  %984 = vmatpush2.bf16.msra.mxu1 %v3671_v47  ;;  %v128_v46 = vld [vmem:[#allocation5 + $0xb0] sm:$0xff]  ;;  %v125_v47 = vld [vmem:[#allocation5 + $0x98] sm:$0xff] }
  0x76   :  { %942 = vmatprep.subr.bf16.mxu0 %v3662_v48  ;;  %985 = vmatprep.subr.bf16.mxu1 %v3664_v49  ;;  %v129_v48 = vld [vmem:[#allocation5 + $0xb8] sm:$0xff]  ;;  %v3609_v49 = vcombine.low %v132_v38, %v136_v39  ;;  %v3602_v53 = vcombine.high %v124_v45, %v128_v46  ;;  %v3691_v38 = vcombine.low %v213_v24, %v217_v25 }
  0x77   :  { %v3603_v61 = vcombine.low %v125_v47, %v129_v48 }
  0x79   :  { %943 = vmatpush2.bf16.msra.mxu0 %v3661_v54  ;;  %986 = vmatpush2.bf16.msra.mxu1 %v3663_v55  ;;  %v117_v54 = vld [vmem:[#allocation5 + $0x58] sm:$0xff] }
  0x7a   :  { %944 = vmatprep.subr.bf16.mxu0 %v3654_v56  ;;  %987 = vmatprep.subr.bf16.mxu1 %v3656_v57  ;;  %v121_v55 = vld [vmem:[#allocation5 + $0x78] sm:$0xff]  ;;  %v3604_v56 = vcombine.high %v125_v47, %v129_v48  ;;  %v3601_v57 = vcombine.low %v124_v45, %v128_v46  ;;  %v192_v45 = vld [vmem:[#allocation5 + $0x2b0] sm:$0xff] }
  0x7b   :  { %v3595_v5 = vcombine.low %v117_v54, %v121_v55  ;;  %v189_v47 = vld [vmem:[#allocation5 + $0x298] sm:$0xff] }
  0x7c   :  { %v193_v48 = vld [vmem:[#allocation5 + $0x2b8] sm:$0xff] }
  0x7d   :  { %945 = vmatpush2.bf16.msra.mxu0 %v3653_v63  ;;  %988 = vmatpush2.bf16.msra.mxu1 %v3655_v0  ;;  %v109_v63 = vld [vmem:[#allocation5 + $0x18] sm:$0xff] }
  0x7e   :  { %946 = vmatprep.subr.bf16.mxu0 %v3646_v1  ;;  %989 = vmatprep.subr.bf16.mxu1 %v3648_v2  ;;  %v113_v0 = vld [vmem:[#allocation5 + $0x38] sm:$0xff]  ;;  %v3596_v1 = vcombine.high %v117_v54, %v121_v55  ;;  %v3593_v2 = vcombine.low %v116_v50, %v120_v51  ;;  %v180_v51 = vld [vmem:[#allocation5 + $0x250] sm:$0xff] }
  0x7f   :  { %v3588_v9 = vcombine.high %v109_v63, %v113_v0  ;;  %v3587_v13 = vcombine.low %v109_v63, %v113_v0  ;;  %v181_v55 = vld [vmem:[#allocation5 + $0x258] sm:$0xff] }
  0x80   :  { %v173_v0 = vld [vmem:[#allocation5 + $0x218] sm:$0xff] }
  0x81   :  { %947 = vmatpush2.bf16.msra.mxu0 %v3645_v8  ;;  %990 = vmatpush2.bf16.msra.mxu1 %v3647_v10  ;;  %v233_v8 = vld [vmem:[#allocation5 + $0x3f8] sm:$0xff]  ;;  %v3585_v10 = vcombine.low %v108_v58, %v112_v60  ;;  %v172_v60 = vld [vmem:[#allocation5 + $0x210] sm:$0xff] }
  0x82   :  { %1002 = vmatprep.subr.bf16.mxu0 %v3642_v11  ;;  %1045 = vmatprep.subr.bf16.mxu1 %v3644_v12  ;;  %v220_v11 = vld [vmem:[#allocation5 + $0x390] sm:$0xff]  ;;  %v3707_v22 = vcombine.low %v229_v7, %v233_v8 }
  0x83   :  { %v224_v12 = vld [vmem:[#allocation5 + $0x3b0] sm:$0xff] }
  0x84   :  { %949 = vmatmul.mubr.bf16.vlgmr.msra.gmra.mxu0 %v4710_v15  ;;  %992 = vmatmul.mubr.bf16.vlgmr.msra.gmra.mxu1 %v4710_v15  ;;  %v3698_v23 = vcombine.high %v220_v11, %v224_v12 }
  0x85   :  { %1003 = vmatpush1.bf16.msra.mxu0 %v3641_v18  ;;  %1046 = vmatpush1.bf16.msra.mxu1 %v3643_v19  ;;  %v3708_v18 = vcombine.high %v229_v7, %v233_v8  ;;  %v3705_v19 = vcombine.low %v228_v3, %v232_v4  ;;  %v4043_v7 = vld [vmem:[#allocation8 + $0xe4] ss:$16 sps:$4 sm:$0xff]  }
  0x86   :  { %1004 = vmatprep.subr.bf16.mxu0 %v3634_v20  ;;  %1047 = vmatprep.subr.bf16.mxu1 %v3636_v21  ;;  %v212_v20 = vld [vmem:[#allocation5 + $0x350] sm:$0xff] }
  0x87   :  { %1034 = vmatprep.mubr.bf16.mxu0 %v4706_v59  ;;  %1077 = vmatprep.mubr.bf16.mxu1 %v4706_v59  ;;  %v3612_v59 = vcombine.high %v133_v40, %v137_v41  ;;  %v216_v21 = vld [vmem:[#allocation5 + $0x370] sm:$0xff]  ;;  %v197_v40 = vld [vmem:[#allocation5 + $0x2d8] sm:$0xff] }
  0x88   :  { %v3690_v31 = vcombine.high %v212_v20, %v216_v21  ;;  %v201_v41 = vld [vmem:[#allocation5 + $0x2f8] sm:$0xff] }
  0x89   :  { %1005 = vmatpush1.bf16.msra.mxu0 %v3633_v26  ;;  %1048 = vmatpush1.bf16.msra.mxu1 %v3635_v27  ;;  %v3700_v26 = vcombine.high %v221_v16, %v225_v17  ;;  %v3697_v27 = vcombine.low %v220_v11, %v224_v12  ;;  %v4041_v11 = vld [vmem:[#allocation8 + $0xe0] ss:$16 sps:$4 sm:$0xff]  }
  0x8a   :  { %1006 = vmatprep.subr.bf16.mxu0 %v3626_v28  ;;  %1049 = vmatprep.subr.bf16.mxu1 %v3628_v29  ;;  %v204_v28 = vld [vmem:[#allocation5 + $0x310] sm:$0xff]  ;;  %v4044_v12 = vld [vmem:[#allocation8 + $0x2e0] ss:$16 sps:$4 sm:$0xff]  }
  0x8b   :  { %v208_v29 = vld [vmem:[#allocation5 + $0x330] sm:$0xff]  ;;  %v4047_v16 = vld [vmem:[#allocation8 + $0xc0] ss:$16 sps:$4 sm:$0xff]  }
  0x8c   :  { %v3682_v39 = vcombine.high %v204_v28, %v208_v29  ;;  %v4050_v17 = vld [vmem:[#allocation8 + $0x2c0] ss:$16 sps:$4 sm:$0xff]  }
  0x8d   :  { %1007 = vmatpush1.bf16.msra.mxu0 %v3625_v34  ;;  %1050 = vmatpush1.bf16.msra.mxu1 %v3627_v35  ;;  %v3692_v34 = vcombine.high %v213_v24, %v217_v25  ;;  %v3689_v35 = vcombine.low %v212_v20, %v216_v21  ;;  %v4058_v20 = vld [vmem:[#allocation8 + $0x2a4] ss:$16 sps:$4 sm:$0xff]   ;;  %v4056_v21 = vld [vmem:[#allocation8 + $0x2a0] ss:$16 sps:$4 sm:$0xff]  }
  0x8e   :  { %1008 = vmatprep.subr.bf16.mxu0 %v3618_v36  ;;  %1051 = vmatprep.subr.bf16.mxu1 %v3620_v37  ;;  %v196_v36 = vld [vmem:[#allocation5 + $0x2d0] sm:$0xff]  ;;  %v4064_v24 = vld [vmem:[#allocation8 + $0x284] ss:$16 sps:$4 sm:$0xff]  }
  0x8f   :  { %v200_v37 = vld [vmem:[#allocation5 + $0x2f0] sm:$0xff]  ;;  %v4067_v25 = vld [vmem:[#allocation8 + $0x64] ss:$16 sps:$4 sm:$0xff]  }
  0x90   :  { %v3674_v46 = vcombine.high %v196_v36, %v200_v37  ;;  %v3673_v50 = vcombine.low %v196_v36, %v200_v37  ;;  %v4080_v36 = vld [vmem:[#allocation8 + $0x220] ss:$16 sps:$4 sm:$0xff]   ;;  %v4085_v37 = vld [vmem:[#allocation8 + $0x4] ss:$16 sps:$4 sm:$0xff]  }
  0x91   :  { %1009 = vmatpush1.bf16.msra.mxu0 %v3617_v42  ;;  %1052 = vmatpush1.bf16.msra.mxu1 %v3619_v43  ;;  %v3684_v42 = vcombine.high %v205_v32, %v209_v33  ;;  %v3681_v43 = vcombine.low %v204_v28, %v208_v29  ;;  %v4068_v28 = vld [vmem:[#allocation8 + $0x260] ss:$16 sps:$4 sm:$0xff]   ;;  %v4073_v29 = vld [vmem:[#allocation8 + $0x44] ss:$16 sps:$4 sm:$0xff]  }
  0x92   :  { %1010 = vmatprep.subr.bf16.mxu0 %v3610_v44  ;;  %1053 = vmatprep.subr.bf16.mxu1 %v3612_v59  ;;  %v188_v44 = vld [vmem:[#allocation5 + $0x290] sm:$0xff]  ;;  %v3683_v59 = vcombine.low %v205_v32, %v209_v33  ;;  %v4074_v32 = vld [vmem:[#allocation8 + $0x240] ss:$16 sps:$4 sm:$0xff]   ;;  %v4079_v33 = vld [vmem:[#allocation8 + $0x24] ss:$16 sps:$4 sm:$0xff]  }
  0x93   :  { %v3666_v54 = vcombine.high %v188_v44, %v192_v45  ;;  %v3665_v58 = vcombine.low %v188_v44, %v192_v45  ;;  %v4092_v44 = vld [vmem:[#allocation8 + $0x3e0] ss:$16 sps:$4 sm:$0xff]   ;;  %v4097_v45 = vld [vmem:[#allocation8 + $0x1c4] ss:$16 sps:$4 sm:$0xff]  }
  0x95   :  { %1011 = vmatpush1.bf16.msra.mxu0 %v3609_v49  ;;  %1054 = vmatpush1.bf16.msra.mxu1 %v3611_v52  ;;  %v3676_v49 = vcombine.high %v197_v40, %v201_v41  ;;  %v184_v52 = vld [vmem:[#allocation5 + $0x270] sm:$0xff] }
  0x96   :  { %1012 = vmatprep.subr.bf16.mxu0 %v3602_v53  ;;  %1055 = vmatprep.subr.bf16.mxu1 %v3604_v56  ;;  %v3675_v53 = vcombine.low %v197_v40, %v201_v41  ;;  %v185_v56 = vld [vmem:[#allocation5 + $0x278] sm:$0xff]  ;;  %v3658_v63 = vcombine.high %v180_v51, %v184_v52  ;;  %v3657_v3 = vcombine.low %v180_v51, %v184_v52 }
  0x97   :  { %v3659_v4 = vcombine.low %v181_v55, %v185_v56  ;;  %v4086_v40 = vld [vmem:[#allocation8 + $0x200] ss:$16 sps:$4 sm:$0xff]   ;;  %v4091_v41 = vld [vmem:[#allocation8 + $0x1e4] ss:$16 sps:$4 sm:$0xff]  }
  0x98   :  { %v4104_v51 = vld [vmem:[#allocation8 + $0x3a0] ss:$16 sps:$4 sm:$0xff]   ;;  %v4109_v52 = vld [vmem:[#allocation8 + $0x184] ss:$16 sps:$4 sm:$0xff]  }
  0x99   :  { %1013 = vmatpush1.bf16.msra.mxu0 %v3601_v57  ;;  %1056 = vmatpush1.bf16.msra.mxu1 %v3603_v61  ;;  %v3668_v57 = vcombine.high %v189_v47, %v193_v48  ;;  %v176_v61 = vld [vmem:[#allocation5 + $0x230] sm:$0xff] }
  0x9a   :  { %1014 = vmatprep.subr.bf16.mxu0 %v3594_v62  ;;  %1057 = vmatprep.subr.bf16.mxu1 %v3596_v1  ;;  %v3667_v62 = vcombine.low %v189_v47, %v193_v48  ;;  %v177_v1 = vld [vmem:[#allocation5 + $0x238] sm:$0xff]  ;;  %v3649_v8 = vcombine.low %v172_v60, %v176_v61 }
  0x9b   :  { %v4098_v47 = vld [vmem:[#allocation8 + $0x3c0] ss:$16 sps:$4 sm:$0xff]   ;;  %v4103_v48 = vld [vmem:[#allocation8 + $0x1a4] ss:$16 sps:$4 sm:$0xff]  }
  0x9d   :  { %1015 = vmatpush1.bf16.msra.mxu0 %v3593_v2  ;;  %1058 = vmatpush1.bf16.msra.mxu1 %v3595_v5  ;;  %v3660_v2 = vcombine.high %v181_v55, %v185_v56  ;;  %v3650_v5 = vcombine.high %v172_v60, %v176_v61  ;;  %v4110_v55 = vld [vmem:[#allocation8 + $0x380] ss:$16 sps:$4 sm:$0xff]   ;;  %v4115_v56 = vld [vmem:[#allocation8 + $0x164] ss:$16 sps:$4 sm:$0xff]  }
  0x9e   :  { %1016 = vmatprep.subr.bf16.mxu0 %v3586_v6  ;;  %1059 = vmatprep.subr.bf16.mxu1 %v3588_v9  ;;  %v3652_v6 = vcombine.high %v173_v0, %v177_v1  ;;  %v4046_v9 = vld [vmem:[#allocation8 + $0x2e4] ss:$16 sps:$4 sm:$0xff]   ;;  %v4116_v60 = vld [vmem:[#allocation8 + $0x360] ss:$16 sps:$4 sm:$0xff]  }
  0x9f   :  { %v4121_v61 = vld [vmem:[#allocation8 + $0x144] ss:$16 sps:$4 sm:$0xff]  }
  0xa1   :  { %1017 = vmatpush1.bf16.msra.mxu0 %v3585_v10  ;;  %1060 = vmatpush1.bf16.msra.mxu1 %v3587_v13  ;;  %v3651_v10 = vcombine.low %v173_v0, %v177_v1  ;;  %v4049_v13 = vld [vmem:[#allocation8 + $0xc4] ss:$16 sps:$4 sm:$0xff]   ;;  %v4122_v0 = vld [vmem:[#allocation8 + $0x340] ss:$16 sps:$4 sm:$0xff]  }
  0xa2   :  { %1018 = vmatprep.subr.bf16.mxu0 %v3706_v14  ;;  %1061 = vmatprep.subr.bf16.mxu1 %v3708_v18  ;;  %v4052_v14 = vld [vmem:[#allocation8 + $0x2c4] ss:$16 sps:$4 sm:$0xff]  }
  0xa3   :  { %v4055_v18 = vld [vmem:[#allocation8 + $0xa4] ss:$16 sps:$4 sm:$0xff]  }
  0xa4   :  { %v4127_v1 = vld [vmem:[#allocation8 + $0x124] ss:$16 sps:$4 sm:$0xff]  }
  0xa5   :  { %1019 = vmatpush2.bf16.msra.mxu0 %v3705_v19  ;;  %1062 = vmatpush2.bf16.msra.mxu1 %v3707_v22  ;;  %v4053_v19 = vld [vmem:[#allocation8 + $0xa0] ss:$16 sps:$4 sm:$0xff]   ;;  %v4061_v22 = vld [vmem:[#allocation8 + $0x84] ss:$16 sps:$4 sm:$0xff]  }
  0xa6   :  { %1020 = vmatprep.subr.bf16.mxu0 %v3698_v23  ;;  %1063 = vmatprep.subr.bf16.mxu1 %v3700_v26  ;;  %v4059_v23 = vld [vmem:[#allocation8 + $0x80] ss:$16 sps:$4 sm:$0xff]  }
  0xa7   :  { %v4065_v26 = vld [vmem:[#allocation8 + $0x60] ss:$16 sps:$4 sm:$0xff]  }
  0xa9   :  { %1021 = vmatpush2.bf16.msra.mxu0 %v3697_v27  ;;  %1064 = vmatpush2.bf16.msra.mxu1 %v3699_v30  ;;  %v4070_v27 = vld [vmem:[#allocation8 + $0x264] ss:$16 sps:$4 sm:$0xff]   ;;  %v4071_v30 = vld [vmem:[#allocation8 + $0x40] ss:$16 sps:$4 sm:$0xff]  }
  0xaa   :  { %1022 = vmatprep.subr.bf16.mxu0 %v3690_v31  ;;  %1065 = vmatprep.subr.bf16.mxu1 %v3692_v34  ;;  %v4076_v31 = vld [vmem:[#allocation8 + $0x244] ss:$16 sps:$4 sm:$0xff]   ;;  %v4077_v34 = vld [vmem:[#allocation8 + $0x20] ss:$16 sps:$4 sm:$0xff]  }
  0xad   :  { %1023 = vmatpush2.bf16.msra.mxu0 %v3689_v35  ;;  %1066 = vmatpush2.bf16.msra.mxu1 %v3691_v38  ;;  %v4082_v35 = vld [vmem:[#allocation8 + $0x224] ss:$16 sps:$4 sm:$0xff]   ;;  %v4083_v38 = vld [vmem:[#allocation8] ss:$16 sps:$4 sm:$0xff]  }
  0xae   :  { %1024 = vmatprep.subr.bf16.mxu0 %v3682_v39  ;;  %1067 = vmatprep.subr.bf16.mxu1 %v3684_v42  ;;  %v4088_v39 = vld [vmem:[#allocation8 + $0x204] ss:$16 sps:$4 sm:$0xff]   ;;  %v4089_v42 = vld [vmem:[#allocation8 + $0x1e0] ss:$16 sps:$4 sm:$0xff]  }
  0xb1   :  { %1025 = vmatpush2.bf16.msra.mxu0 %v3681_v43  ;;  %1068 = vmatpush2.bf16.msra.mxu1 %v3683_v59  ;;  %v4094_v43 = vld [vmem:[#allocation8 + $0x3e4] ss:$16 sps:$4 sm:$0xff]   ;;  %v4095_v59 = vld [vmem:[#allocation8 + $0x1c0] ss:$16 sps:$4 sm:$0xff]  }
  0xb2   :  { %1026 = vmatprep.subr.bf16.mxu0 %v3674_v46  ;;  %1069 = vmatprep.subr.bf16.mxu1 %v3676_v49  ;;  %v4100_v46 = vld [vmem:[#allocation8 + $0x3c4] ss:$16 sps:$4 sm:$0xff]   ;;  %v4101_v49 = vld [vmem:[#allocation8 + $0x1a0] ss:$16 sps:$4 sm:$0xff]  }
  0xb5   :  { %1027 = vmatpush2.bf16.msra.mxu0 %v3673_v50  ;;  %1070 = vmatpush2.bf16.msra.mxu1 %v3675_v53  ;;  %v4106_v50 = vld [vmem:[#allocation8 + $0x3a4] ss:$16 sps:$4 sm:$0xff]   ;;  %v4107_v53 = vld [vmem:[#allocation8 + $0x180] ss:$16 sps:$4 sm:$0xff]  }
  0xb6   :  { %1028 = vmatprep.subr.bf16.mxu0 %v3666_v54  ;;  %1071 = vmatprep.subr.bf16.mxu1 %v3668_v57  ;;  %v4112_v54 = vld [vmem:[#allocation8 + $0x384] ss:$16 sps:$4 sm:$0xff]   ;;  %v4113_v57 = vld [vmem:[#allocation8 + $0x160] ss:$16 sps:$4 sm:$0xff]  }
  0xb9   :  { %1029 = vmatpush2.bf16.msra.mxu0 %v3665_v58  ;;  %1072 = vmatpush2.bf16.msra.mxu1 %v3667_v62  ;;  %v4118_v58 = vld [vmem:[#allocation8 + $0x364] ss:$16 sps:$4 sm:$0xff]  }
  0xba   :  { %1030 = vmatprep.subr.bf16.mxu0 %v3658_v63  ;;  %1073 = vmatprep.subr.bf16.mxu1 %v3660_v2  ;;  %v4124_v62 = vld [vmem:[#allocation8 + $0x344] ss:$16 sps:$4 sm:$0xff]   ;;  %v4119_v63 = vld [vmem:[#allocation8 + $0x140] ss:$16 sps:$4 sm:$0xff]  }
  0xbb   :  { %v4130_v2 = vld [vmem:[#allocation8 + $0x324] ss:$16 sps:$4 sm:$0xff]  }
  0xbd   :  { %1031 = vmatpush2.bf16.msra.mxu0 %v3657_v3  ;;  %1074 = vmatpush2.bf16.msra.mxu1 %v3659_v4  ;;  %v4125_v3 = vld [vmem:[#allocation8 + $0x120] ss:$16 sps:$4 sm:$0xff]  }
  0xbe   :  { %1032 = vmatprep.subr.bf16.mxu0 %v3650_v5  ;;  %1075 = vmatprep.subr.bf16.mxu1 %v3652_v6  ;;  %v4128_v4 = vld [vmem:[#allocation8 + $0x320] ss:$16 sps:$4 sm:$0xff]   ;;  %v4133_v5 = vld [vmem:[#allocation8 + $0x104] ss:$16 sps:$4 sm:$0xff]  }
  0xbf   :  { %v4136_v6 = vld [vmem:[#allocation8 + $0x304] ss:$16 sps:$4 sm:$0xff]  }
  0xc1   :  { %1033 = vmatpush2.bf16.msra.mxu0 %v3649_v8  ;;  %1076 = vmatpush2.bf16.msra.mxu1 %v3651_v10  ;;  %v4134_v8 = vld [vmem:[#allocation8 + $0x300] ss:$16 sps:$4 sm:$0xff]   ;;  %v4142_v10 = vld [vmem:[#allocation8 + $0x6e4] ss:$16 sps:$4 sm:$0xff]  }
  0xc2   :  { %2686 = vmatprep.subr.bf16.mxu0 %v4043_v7  ;;  %2729 = vmatprep.subr.bf16.mxu1 %v4046_v9  ;;  %v4131_v7 = vld [vmem:[#allocation8 + $0x100] ss:$16 sps:$4 sm:$0xff]   ;;  %v4139_v9 = vld [vmem:[#allocation8 + $0x4e4] ss:$16 sps:$4 sm:$0xff]  }
  0xc4   :  { %1035 = vmatmul.mubr.bf16.vlgmr.msra.gmra.mxu0 %v4710_v15  ;;  %1078 = vmatmul.mubr.bf16.vlgmr.msra.gmra.mxu1 %v4710_v15  ;;  %v4062_v15 = vld [vmem:[#allocation8 + $0x280] ss:$16 sps:$4 sm:$0xff]  }
  0xc5   :  { %2687 = vmatpush1.bf16.msra.mxu0 %v4041_v11  ;;  %2730 = vmatpush1.bf16.msra.mxu1 %v4044_v12  ;;  %v236_v11 = vlaneseq }
  0xc6   :  { %2688 = vmatprep.subr.bf16.mxu0 %v4049_v13  ;;  %2731 = vmatprep.subr.bf16.mxu1 %v4052_v14 }
  0xc7   :  { %v4718_v12 = vshrl.u32 %v236_v11, 7  ;;  %v4164_v11 = vld [vmem:[#allocation8 + $0x660] ss:$16 sps:$4 sm:$0xff]  }
  0xc9   :  { %2689 = vmatpush1.bf16.msra.mxu0 %v4047_v16  ;;  %2732 = vmatpush1.bf16.msra.mxu1 %v4050_v17  ;;  %v4721_v13 = vsub.s32 1, %v4718_v12  ;;  %v4724_v14 = vsub.s32 0, %v4718_v12  ;;  %v250_v16 = vsub.s32 3, %v4718_v12  ;;  %v4727_v17 = vld [vmem:[#allocation7] sm:$0xff] }
  0xca   :  { %2690 = vmatprep.subr.bf16.mxu0 %v4055_v18  ;;  %2733 = vmatprep.subr.bf16.mxu1 %v4058_v20  ;;  %v246_v18 = vsub.s32 2, %v4718_v12 }
  0xcb   :  { %v239_v20 = vrot.slane %v4727_v17, %v4724_v14 }
  0xcd   :  { %2691 = vmatpush1.bf16.msra.mxu0 %v4053_v19  ;;  %2734 = vmatpush1.bf16.msra.mxu1 %v4056_v21  ;;  %v243_v19 = vrot.slane %v4727_v17, %v4721_v13 }
  0xce   :  { %2692 = vmatprep.subr.bf16.mxu0 %v4061_v22  ;;  %2735 = vmatprep.subr.bf16.mxu1 %v4064_v24  ;;  %v251_v22 = vrot.slane %v4727_v17, %v250_v16 }
  0xd1   :  { %2693 = vmatpush1.bf16.msra.mxu0 %v4059_v23  ;;  %2736 = vmatpush1.bf16.msra.mxu1 %v4062_v15  ;;  %v247_v23 = vrot.slane %v4727_v17, %v246_v18 }
  0xd2   :  { %2694 = vmatprep.subr.bf16.mxu0 %v4067_v25  ;;  %2737 = vmatprep.subr.bf16.mxu1 %v4070_v27 }
  0xd5   :  { %2695 = vmatpush1.bf16.msra.mxu0 %v4065_v26  ;;  %2738 = vmatpush1.bf16.msra.mxu1 %v4068_v28 }
  0xd6   :  { %2696 = vmatprep.subr.bf16.mxu0 %v4073_v29  ;;  %2739 = vmatprep.subr.bf16.mxu1 %v4076_v31 }
  0xd9   :  { %2697 = vmatpush1.bf16.msra.mxu0 %v4071_v30  ;;  %2740 = vmatpush1.bf16.msra.mxu1 %v4074_v32 }
  0xda   :  { %2698 = vmatprep.subr.bf16.mxu0 %v4079_v33  ;;  %2741 = vmatprep.subr.bf16.mxu1 %v4082_v35 }
  0xdd   :  { %2699 = vmatpush1.bf16.msra.mxu0 %v4077_v34  ;;  %2742 = vmatpush1.bf16.msra.mxu1 %v4080_v36 }
  0xde   :  { %2700 = vmatprep.subr.bf16.mxu0 %v4085_v37  ;;  %2743 = vmatprep.subr.bf16.mxu1 %v4088_v39 }
  0xe1   :  { %2701 = vmatpush1.bf16.msra.mxu0 %v4083_v38  ;;  %2744 = vmatpush1.bf16.msra.mxu1 %v4086_v40 }
  0xe2   :  { %2702 = vmatprep.subr.bf16.mxu0 %v4091_v41  ;;  %2745 = vmatprep.subr.bf16.mxu1 %v4094_v43 }
  0xe5   :  { %2703 = vmatpush2.bf16.msra.mxu0 %v4089_v42  ;;  %2746 = vmatpush2.bf16.msra.mxu1 %v4092_v44 }
  0xe6   :  { %2704 = vmatprep.subr.bf16.mxu0 %v4097_v45  ;;  %2747 = vmatprep.subr.bf16.mxu1 %v4100_v46 }
  0xe9   :  { %2705 = vmatpush2.bf16.msra.mxu0 %v4095_v59  ;;  %2748 = vmatpush2.bf16.msra.mxu1 %v4098_v47 }
  0xea   :  { %2706 = vmatprep.subr.bf16.mxu0 %v4103_v48  ;;  %2749 = vmatprep.subr.bf16.mxu1 %v4106_v50 }
  0xed   :  { %2707 = vmatpush2.bf16.msra.mxu0 %v4101_v49  ;;  %2750 = vmatpush2.bf16.msra.mxu1 %v4104_v51 }
  0xee   :  { %2708 = vmatprep.subr.bf16.mxu0 %v4109_v52  ;;  %2751 = vmatprep.subr.bf16.mxu1 %v4112_v54  ;;  %v4137_v54 = vld [vmem:[#allocation8 + $0x4e0] ss:$16 sps:$4 sm:$0xff]  }
  0xf1   :  { %2709 = vmatpush2.bf16.msra.mxu0 %v4107_v53  ;;  %2752 = vmatpush2.bf16.msra.mxu1 %v4110_v55 }
  0xf2   :  { %2710 = vmatprep.subr.bf16.mxu0 %v4115_v56  ;;  %2753 = vmatprep.subr.bf16.mxu1 %v4118_v58  ;;  %v4145_v58 = vld [vmem:[#allocation8 + $0x4c4] ss:$16 sps:$4 sm:$0xff]  }
  0xf5   :  { %2711 = vmatpush2.bf16.msra.mxu0 %v4113_v57  ;;  %2754 = vmatpush2.bf16.msra.mxu1 %v4116_v60  ;;  %v4140_v57 = vld [vmem:[#allocation8 + $0x6e0] ss:$16 sps:$4 sm:$0xff]  }
  0xf6   :  { %2712 = vmatprep.subr.bf16.mxu0 %v4121_v61  ;;  %2755 = vmatprep.subr.bf16.mxu1 %v4124_v62  ;;  %v4148_v61 = vld [vmem:[#allocation8 + $0x6c4] ss:$16 sps:$4 sm:$0xff]   ;;  %v4143_v62 = vld [vmem:[#allocation8 + $0x4c0] ss:$16 sps:$4 sm:$0xff]  }
  0xf9   :  { %2713 = vmatpush2.bf16.msra.mxu0 %v4119_v63  ;;  %2756 = vmatpush2.bf16.msra.mxu1 %v4122_v0  ;;  %v4146_v63 = vld [vmem:[#allocation8 + $0x6c0] ss:$16 sps:$4 sm:$0xff]   ;;  %v4151_v0 = vld [vmem:[#allocation8 + $0x4a4] ss:$16 sps:$4 sm:$0xff]  }
  0xfa   :  { %2714 = vmatprep.subr.bf16.mxu0 %v4127_v1  ;;  %2757 = vmatprep.subr.bf16.mxu1 %v4130_v2  ;;  %v4154_v1 = vld [vmem:[#allocation8 + $0x6a4] ss:$16 sps:$4 sm:$0xff]   ;;  %v4149_v2 = vld [vmem:[#allocation8 + $0x4a0] ss:$16 sps:$4 sm:$0xff]  }
  0xfd   :  { %2715 = vmatpush2.bf16.msra.mxu0 %v4125_v3  ;;  %2758 = vmatpush2.bf16.msra.mxu1 %v4128_v4  ;;  %v4152_v3 = vld [vmem:[#allocation8 + $0x6a0] ss:$16 sps:$4 sm:$0xff]   ;;  %v4157_v4 = vld [vmem:[#allocation8 + $0x484] ss:$16 sps:$4 sm:$0xff]  }
  0xfe   :  { %2716 = vmatprep.subr.bf16.mxu0 %v4133_v5  ;;  %2759 = vmatprep.subr.bf16.mxu1 %v4136_v6  ;;  %v4160_v5 = vld [vmem:[#allocation8 + $0x684] ss:$16 sps:$4 sm:$0xff]   ;;  %v4155_v6 = vld [vmem:[#allocation8 + $0x480] ss:$16 sps:$4 sm:$0xff]  }
 0x101   :  { %2717 = vmatpush2.bf16.msra.mxu0 %v4131_v7  ;;  %2760 = vmatpush2.bf16.msra.mxu1 %v4134_v8  ;;  %v4158_v7 = vld [vmem:[#allocation8 + $0x680] ss:$16 sps:$4 sm:$0xff]   ;;  %v4163_v8 = vld [vmem:[#allocation8 + $0x464] ss:$16 sps:$4 sm:$0xff]  }
 0x102   :  { %2772 = vmatprep.subr.bf16.mxu0 %v4139_v9  ;;  %2815 = vmatprep.subr.bf16.mxu1 %v4142_v10  ;;  %v4166_v9 = vld [vmem:[#allocation8 + $0x664] ss:$16 sps:$4 sm:$0xff]   ;;  %v4161_v10 = vld [vmem:[#allocation8 + $0x460] ss:$16 sps:$4 sm:$0xff]  }
 0x144   :  { %v950_v21 = vpop.f32.mrf.mxu0  ;;  %v993_v24 = vpop.f32.mrf.mxu1 }
 0x145   :  { %v951_v27 = vadd.f32 %v950_v21, %v239_v20  ;;  %v994_v30 = vadd.f32 %v993_v24, %v247_v23  ;;  %v4167_v21 = vld [vmem:[#allocation8 + $0x440] ss:$16 sps:$4 sm:$0xff]   ;;  %v4178_v24 = vld [vmem:[#allocation8 + $0x624] ss:$16 sps:$4 sm:$0xff]  }
 0x146   :  { %v952_v15 = vpop.f32.mrf.mxu0  ;;  %v995_v26 = vpop.f32.mrf.mxu1 }
 0x147   :  { %v953_v25 = vadd.f32 %v952_v15, %v243_v19  ;;  %v996_v28 = vadd.f32 %v995_v26, %v251_v22  ;;  %v1088_v39 = vmul.f32 0.2, %v951_v27  ;;  %v1090_v43 = vmul.f32 0.2, %v994_v30  ;;  %v4173_v15 = vld [vmem:[#allocation8 + $0x420] ss:$16 sps:$4 sm:$0xff]  }
 0x148   :  { %v954_v29 = vpop.f32.mrf.mxu0  ;;  %v997_v32 = vpop.f32.mrf.mxu1  ;;  %v4181_v26 = vld [vmem:[#allocation8 + $0x404] ss:$16 sps:$4 sm:$0xff]  }
 0x149   :  { %v955_v31 = vadd.f32 %v954_v29, %v239_v20  ;;  %v998_v33 = vadd.f32 %v997_v32, %v247_v23  ;;  %v1089_v35 = vmul.f32 0.2, %v953_v25  ;;  %v1091_v40 = vmul.f32 0.2, %v996_v28  ;;  %v4172_v20 = vld [vmem:[#allocation8 + $0x644] ss:$16 sps:$4 sm:$0xff]  }
 0x14a   :  { %v956_v34 = vpop.f32.mrf.mxu0  ;;  %v999_v38 = vpop.f32.mrf.mxu1  ;;  %v1104_v49 = vmax.f32 %v951_v27, %v1088_v39  ;;  %v1106_v52 = vmax.f32 %v994_v30, %v1090_v43  ;;  %v4175_v23 = vld [vmem:[#allocation8 + $0x424] ss:$16 sps:$4 sm:$0xff]   ;;  %v4182_v29 = vld [vmem:[#allocation8 + $0x600] ss:$16 sps:$4 sm:$0xff]  }
 0x14b   :  { %v1096_v36 = vmul.f32 0.2, %v955_v31  ;;  %v957_v37 = vadd.f32 %v956_v34, %v243_v19  ;;  %v1098_v41 = vmul.f32 0.2, %v998_v33  ;;  %v1000_v42 = vadd.f32 %v999_v38, %v251_v22  ;;  %v4169_v19 = vld [vmem:[#allocation8 + $0x444] ss:$16 sps:$4 sm:$0xff]  }
 0x14c   :  { %v1105_v46 = vmax.f32 %v953_v25, %v1089_v35  ;;  %v1107_v50 = vmax.f32 %v996_v28, %v1091_v40  ;;  %v4170_v22 = vld [vmem:[#allocation8 + $0x640] ss:$16 sps:$4 sm:$0xff]   ;;  %v4184_v27 = vld [vmem:[#allocation8 + $0x604] ss:$16 sps:$4 sm:$0xff]  }
 0x14d   :  { %v1097_v44 = vmul.f32 0.2, %v957_v37  ;;  %v1112_v45 = vmax.f32 %v955_v31, %v1096_v36  ;;  %v1099_v59 = vmul.f32 0.2, %v1000_v42  ;;  %v1114_v47 = vmax.f32 %v998_v33, %v1098_v41  ;;  %v4176_v25 = vld [vmem:[#allocation8 + $0x620] ss:$16 sps:$4 sm:$0xff]  }
 0x14e   :  { %v4179_v28 = vld [vmem:[#allocation8 + $0x400] ss:$16 sps:$4 sm:$0xff]   ;;  %v4187_v30 = vld [vmem:[#allocation8 + $0x5e4] ss:$16 sps:$4 sm:$0xff]  }
 0x14f   :  { %v1113_v48 = vmax.f32 %v957_v37, %v1097_v44  ;;  %v1115_v51 = vmax.f32 %v1000_v42, %v1099_v59  ;;  %v4742_v55 = vpack.c.bf16 %v1112_v45, %v1104_v49  ;;  %v4746_v60 = vpack.c.bf16 %v1114_v47, %v1106_v52  ;;  %v4190_v31 = vld [vmem:[#allocation8 + $0x7e4] ss:$16 sps:$4 sm:$0xff]   ;;  %v4185_v32 = vld [vmem:[#allocation8 + $0x5e0] ss:$16 sps:$4 sm:$0xff]  }
 0x150   :  { %v4188_v33 = vld [vmem:[#allocation8 + $0x7e0] ss:$16 sps:$4 sm:$0xff]   ;;  %v4193_v34 = vld [vmem:[#allocation8 + $0x5c4] ss:$16 sps:$4 sm:$0xff]   ;;  %v258_v47 = vsub.s32 5, %v4718_v12  ;;  %v266_v49 = vsub.s32 7, %v4718_v12 }
 0x151   :  { %v4740_v53 = vpack.c.bf16 %v1113_v48, %v1105_v46  ;;  %v4744_v56 = vpack.c.bf16 %v1115_v51, %v1107_v50  ;;  %v4196_v35 = vld [vmem:[#allocation8 + $0x7c4] ss:$16 sps:$4 sm:$0xff]   ;;  %v4191_v36 = vld [vmem:[#allocation8 + $0x5c0] ss:$16 sps:$4 sm:$0xff]   ;;  %v254_v48 = vsub.s32 4, %v4718_v12  ;;  %v262_v51 = vsub.s32 6, %v4718_v12 }
 0x152   :  { %v4194_v37 = vld [vmem:[#allocation8 + $0x7c0] ss:$16 sps:$4 sm:$0xff]   ;;  %v4199_v38 = vld [vmem:[#allocation8 + $0x5a4] ss:$16 sps:$4 sm:$0xff]  }
 0x153   :  { %2718 = vmatprep.mubr.bf16.mxu0 %v4740_v53  ;;  %2761 = vmatprep.mubr.bf16.mxu1 %v4744_v56  ;;  %v4202_v39 = vld [vmem:[#allocation8 + $0x7a4] ss:$16 sps:$4 sm:$0xff]   ;;  %v4197_v40 = vld [vmem:[#allocation8 + $0x5a0] ss:$16 sps:$4 sm:$0xff]  }
 0x154   :  { %2719 = vmatmul.mubr.bf16.vlgmr.msra.gmra.mxu0 %v4742_v55  ;;  %2762 = vmatmul.mubr.bf16.vlgmr.msra.gmra.mxu1 %v4746_v60  ;;  %v4200_v41 = vld [vmem:[#allocation8 + $0x7a0] ss:$16 sps:$4 sm:$0xff]   ;;  %v4205_v42 = vld [vmem:[#allocation8 + $0x584] ss:$16 sps:$4 sm:$0xff]  }
 0x155   :  { %2773 = vmatpush1.bf16.msra.mxu0 %v4137_v54  ;;  %2816 = vmatpush1.bf16.msra.mxu1 %v4140_v57  ;;  %v4208_v43 = vld [vmem:[#allocation8 + $0x784] ss:$16 sps:$4 sm:$0xff]   ;;  %v4203_v44 = vld [vmem:[#allocation8 + $0x580] ss:$16 sps:$4 sm:$0xff]   ;;  %v259_v57 = vrot.slane %v4727_v17, %v258_v47 }
 0x156   :  { %2774 = vmatprep.subr.bf16.mxu0 %v4145_v58  ;;  %2817 = vmatprep.subr.bf16.mxu1 %v4148_v61  ;;  %v4206_v45 = vld [vmem:[#allocation8 + $0x780] ss:$16 sps:$4 sm:$0xff]   ;;  %v4211_v59 = vld [vmem:[#allocation8 + $0x564] ss:$16 sps:$4 sm:$0xff]   ;;  %v255_v61 = vrot.slane %v4727_v17, %v254_v48 }
 0x157   :  { %v4214_v46 = vld [vmem:[#allocation8 + $0x764] ss:$16 sps:$4 sm:$0xff]   ;;  %v4209_v50 = vld [vmem:[#allocation8 + $0x560] ss:$16 sps:$4 sm:$0xff]  }
 0x158   :  { %v4212_v52 = vld [vmem:[#allocation8 + $0x760] ss:$16 sps:$4 sm:$0xff]   ;;  %v4217_v54 = vld [vmem:[#allocation8 + $0x544] ss:$16 sps:$4 sm:$0xff]  }
 0x159   :  { %2775 = vmatpush1.bf16.msra.mxu0 %v4143_v62  ;;  %2818 = vmatpush1.bf16.msra.mxu1 %v4146_v63  ;;  %v4220_v58 = vld [vmem:[#allocation8 + $0x744] ss:$16 sps:$4 sm:$0xff]   ;;  %v267_v63 = vrot.slane %v4727_v17, %v266_v49  ;;  %v4233_v49 = vld [vmem:[#allocation8 + $0xe8] ss:$16 sps:$4 sm:$0xff]  }
 0x15a   :  { %2776 = vmatprep.subr.bf16.mxu0 %v4151_v0  ;;  %2819 = vmatprep.subr.bf16.mxu1 %v4154_v1  ;;  %v263_v0 = vrot.slane %v4727_v17, %v262_v51  ;;  %v4221_v17 = vld [vmem:[#allocation8 + $0x520] ss:$16 sps:$4 sm:$0xff]  }
 0x15d   :  { %2777 = vmatpush1.bf16.msra.mxu0 %v4149_v2  ;;  %2820 = vmatpush1.bf16.msra.mxu1 %v4152_v3  ;;  %v4215_v2 = vld [vmem:[#allocation8 + $0x540] ss:$16 sps:$4 sm:$0xff]  }
 0x15e   :  { %2778 = vmatprep.subr.bf16.mxu0 %v4157_v4  ;;  %2821 = vmatprep.subr.bf16.mxu1 %v4160_v5  ;;  %v4218_v4 = vld [vmem:[#allocation8 + $0x740] ss:$16 sps:$4 sm:$0xff]   ;;  %v4223_v5 = vld [vmem:[#allocation8 + $0x524] ss:$16 sps:$4 sm:$0xff]  }
 0x161   :  { %2779 = vmatpush1.bf16.msra.mxu0 %v4155_v6  ;;  %2822 = vmatpush1.bf16.msra.mxu1 %v4158_v7 }
 0x162   :  { %2780 = vmatprep.subr.bf16.mxu0 %v4163_v8  ;;  %2823 = vmatprep.subr.bf16.mxu1 %v4166_v9  ;;  %v4226_v8 = vld [vmem:[#allocation8 + $0x724] ss:$16 sps:$4 sm:$0xff]  }
 0x165   :  { %2781 = vmatpush1.bf16.msra.mxu0 %v4161_v10  ;;  %2824 = vmatpush1.bf16.msra.mxu1 %v4164_v11 }
 0x166   :  { %2782 = vmatprep.subr.bf16.mxu0 %v4169_v19  ;;  %2825 = vmatprep.subr.bf16.mxu1 %v4172_v20 }
 0x169   :  { %2783 = vmatpush1.bf16.msra.mxu0 %v4167_v21  ;;  %2826 = vmatpush1.bf16.msra.mxu1 %v4170_v22 }
 0x16a   :  { %2784 = vmatprep.subr.bf16.mxu0 %v4175_v23  ;;  %2827 = vmatprep.subr.bf16.mxu1 %v4178_v24  ;;  %v4224_v24 = vld [vmem:[#allocation8 + $0x720] ss:$16 sps:$4 sm:$0xff]  }
 0x16d   :  { %2785 = vmatpush1.bf16.msra.mxu0 %v4173_v15  ;;  %2828 = vmatpush1.bf16.msra.mxu1 %v4176_v25  ;;  %v4229_v15 = vld [vmem:[#allocation8 + $0x504] ss:$16 sps:$4 sm:$0xff]  }
 0x16e   :  { %2786 = vmatprep.subr.bf16.mxu0 %v4181_v26  ;;  %2829 = vmatprep.subr.bf16.mxu1 %v4184_v27 }
 0x171   :  { %2787 = vmatpush1.bf16.msra.mxu0 %v4179_v28  ;;  %2830 = vmatpush1.bf16.msra.mxu1 %v4182_v29  ;;  %v4232_v29 = vld [vmem:[#allocation8 + $0x704] ss:$16 sps:$4 sm:$0xff]  }
 0x172   :  { %2788 = vmatprep.subr.bf16.mxu0 %v4187_v30  ;;  %2831 = vmatprep.subr.bf16.mxu1 %v4190_v31 }
 0x175   :  { %2789 = vmatpush2.bf16.msra.mxu0 %v4185_v32  ;;  %2832 = vmatpush2.bf16.msra.mxu1 %v4188_v33 }
 0x176   :  { %2790 = vmatprep.subr.bf16.mxu0 %v4193_v34  ;;  %2833 = vmatprep.subr.bf16.mxu1 %v4196_v35 }
 0x179   :  { %2791 = vmatpush2.bf16.msra.mxu0 %v4191_v36  ;;  %2834 = vmatpush2.bf16.msra.mxu1 %v4194_v37  ;;  %v4227_v36 = vld [vmem:[#allocation8 + $0x500] ss:$16 sps:$4 sm:$0xff]  }
 0x17a   :  { %2792 = vmatprep.subr.bf16.mxu0 %v4199_v38  ;;  %2835 = vmatprep.subr.bf16.mxu1 %v4202_v39  ;;  %v4230_v39 = vld [vmem:[#allocation8 + $0x700] ss:$16 sps:$4 sm:$0xff]  }
 0x17d   :  { %2793 = vmatpush2.bf16.msra.mxu0 %v4197_v40  ;;  %2836 = vmatpush2.bf16.msra.mxu1 %v4200_v41  ;;  %v4235_v40 = vld [vmem:[#allocation8 + $0xec] ss:$16 sps:$4 sm:$0xff]  }
 0x17e   :  { %2794 = vmatprep.subr.bf16.mxu0 %v4205_v42  ;;  %2837 = vmatprep.subr.bf16.mxu1 %v4208_v43 }
 0x181   :  { %2795 = vmatpush2.bf16.msra.mxu0 %v4203_v44  ;;  %2838 = vmatpush2.bf16.msra.mxu1 %v4206_v45  ;;  %v4238_v44 = vld [vmem:[#allocation8 + $0x2ec] ss:$16 sps:$4 sm:$0xff]  }
 0x182   :  { %2796 = vmatprep.subr.bf16.mxu0 %v4211_v59  ;;  %2839 = vmatprep.subr.bf16.mxu1 %v4214_v46 }
 0x184   :  { %v1036_v62 = vpop.f32.mrf.mxu0  ;;  %v1079_v1 = vpop.f32.mrf.mxu1 }
 0x185   :  { %2797 = vmatpush2.bf16.msra.mxu0 %v4209_v50  ;;  %2840 = vmatpush2.bf16.msra.mxu1 %v4212_v52  ;;  %v1037_v9 = vadd.f32 %v1036_v62, %v255_v61  ;;  %v1080_v19 = vadd.f32 %v1079_v1, %v263_v0  ;;  %v4236_v52 = vld [vmem:[#allocation8 + $0x2e8] ss:$16 sps:$4 sm:$0xff]  }
 0x186   :  { %v1038_v3 = vpop.f32.mrf.mxu0  ;;  %2798 = vmatprep.subr.bf16.mxu0 %v4217_v54  ;;  %v1081_v7 = vpop.f32.mrf.mxu1  ;;  %2841 = vmatprep.subr.bf16.mxu1 %v4220_v58  ;;  %v4244_v58 = vld [vmem:[#allocation8 + $0x2cc] ss:$16 sps:$4 sm:$0xff]   ;;  %v4242_v62 = vld [vmem:[#allocation8 + $0x2c8] ss:$16 sps:$4 sm:$0xff]  }
 0x187   :  { %v1039_v6 = vadd.f32 %v1038_v3, %v259_v57  ;;  %v1082_v10 = vadd.f32 %v1081_v7, %v267_v63  ;;  %v1092_v30 = vmul.f32 0.2, %v1037_v9  ;;  %v1094_v34 = vmul.f32 0.2, %v1080_v19  ;;  %v4245_v1 = vld [vmem:[#allocation8 + $0xa8] ss:$16 sps:$4 sm:$0xff]  }
 0x188   :  { %v1040_v11 = vpop.f32.mrf.mxu0  ;;  %v1083_v21 = vpop.f32.mrf.mxu1  ;;  %v4253_v3 = vld [vmem:[#allocation8 + $0x8c] ss:$16 sps:$4 sm:$0xff]  }
 0x189   :  { %v1041_v20 = vadd.f32 %v1040_v11, %v255_v61  ;;  %2799 = vmatpush2.bf16.msra.mxu0 %v4215_v2  ;;  %v1084_v22 = vadd.f32 %v1083_v21, %v263_v0  ;;  %2842 = vmatpush2.bf16.msra.mxu1 %v4218_v4  ;;  %v1093_v25 = vmul.f32 0.2, %v1039_v6  ;;  %v1095_v31 = vmul.f32 0.2, %v1082_v10  ;;  %v4239_v61 = vld [vmem:[#allocation8 + $0xc8] ss:$16 sps:$4 sm:$0xff]  }
 0x18a   :  { %v1042_v23 = vpop.f32.mrf.mxu0  ;;  %2800 = vmatprep.subr.bf16.mxu0 %v4223_v5  ;;  %v1085_v28 = vpop.f32.mrf.mxu1  ;;  %2843 = vmatprep.subr.bf16.mxu1 %v4226_v8  ;;  %v1108_v45 = vmax.f32 %v1037_v9, %v1092_v30  ;;  %v1110_v47 = vmax.f32 %v1080_v19, %v1094_v34  ;;  %v4250_v0 = vld [vmem:[#allocation8 + $0x2ac] ss:$16 sps:$4 sm:$0xff]   ;;  %v4248_v2 = vld [vmem:[#allocation8 + $0x2a8] ss:$16 sps:$4 sm:$0xff]  }
 0x18b   :  { %v1100_v26 = vmul.f32 0.2, %v1041_v20  ;;  %v1043_v27 = vadd.f32 %v1042_v23, %v259_v57  ;;  %v1102_v32 = vmul.f32 0.2, %v1084_v22  ;;  %v1086_v33 = vadd.f32 %v1085_v28, %v267_v63  ;;  %v4241_v57 = vld [vmem:[#allocation8 + $0xcc] ss:$16 sps:$4 sm:$0xff]  }
 0x18c   :  { %v1109_v41 = vmax.f32 %v1039_v6, %v1093_v25  ;;  %v1111_v59 = vmax.f32 %v1082_v10, %v1095_v31  ;;  %v4247_v63 = vld [vmem:[#allocation8 + $0xac] ss:$16 sps:$4 sm:$0xff]   ;;  %v4251_v5 = vld [vmem:[#allocation8 + $0x88] ss:$16 sps:$4 sm:$0xff]  }
 0x18d   :  { %v1101_v35 = vmul.f32 0.2, %v1043_v27  ;;  %2801 = vmatpush2.bf16.msra.mxu0 %v4221_v17  ;;  %v1116_v37 = vmax.f32 %v1041_v20, %v1100_v26  ;;  %v1103_v38 = vmul.f32 0.2, %v1086_v33  ;;  %2844 = vmatpush2.bf16.msra.mxu1 %v4224_v24  ;;  %v1118_v42 = vmax.f32 %v1084_v22, %v1102_v32  ;;  %v4256_v4 = vld [vmem:[#allocation8 + $0x28c] ss:$16 sps:$4 sm:$0xff]  }
 0x18e   :  { %2802 = vmatprep.subr.bf16.mxu0 %v4229_v15  ;;  %2845 = vmatprep.subr.bf16.mxu1 %v4232_v29  ;;  %v4259_v6 = vld [vmem:[#allocation8 + $0x6c] ss:$16 sps:$4 sm:$0xff]   ;;  %v4260_v8 = vld [vmem:[#allocation8 + $0x268] ss:$16 sps:$4 sm:$0xff]  }
 0x18f   :  { %v1117_v43 = vmax.f32 %v1043_v27, %v1101_v35  ;;  %v1119_v46 = vmax.f32 %v1086_v33, %v1103_v38  ;;  %v4762_v50 = vpack.c.bf16 %v1116_v37, %v1108_v45  ;;  %v4766_v54 = vpack.c.bf16 %v1118_v42, %v1110_v47  ;;  %v4262_v7 = vld [vmem:[#allocation8 + $0x26c] ss:$16 sps:$4 sm:$0xff]   ;;  %v4263_v11 = vld [vmem:[#allocation8 + $0x48] ss:$16 sps:$4 sm:$0xff]  }
 0x190   :  { %v4265_v9 = vld [vmem:[#allocation8 + $0x4c] ss:$16 sps:$4 sm:$0xff]   ;;  %v4266_v19 = vld [vmem:[#allocation8 + $0x248] ss:$16 sps:$4 sm:$0xff]  }
 0x191   :  { %2803 = vmatpush2.bf16.msra.mxu0 %v4227_v36  ;;  %v4760_v48 = vpack.c.bf16 %v1117_v43, %v1109_v41  ;;  %2846 = vmatpush2.bf16.msra.mxu1 %v4230_v39  ;;  %v4764_v51 = vpack.c.bf16 %v1119_v46, %v1111_v59  ;;  %v4268_v10 = vld [vmem:[#allocation8 + $0x24c] ss:$16 sps:$4 sm:$0xff]   ;;  %v4269_v17 = vld [vmem:[#allocation8 + $0x28] ss:$16 sps:$4 sm:$0xff]  }
 0x192   :  { %2858 = vmatprep.subr.bf16.mxu0 %v4235_v40  ;;  %2901 = vmatprep.subr.bf16.mxu1 %v4238_v44  ;;  %v4271_v20 = vld [vmem:[#allocation8 + $0x2c] ss:$16 sps:$4 sm:$0xff]   ;;  %v4272_v22 = vld [vmem:[#allocation8 + $0x228] ss:$16 sps:$4 sm:$0xff]  }
 0x193   :  { %2804 = vmatprep.mubr.bf16.mxu0 %v4760_v48  ;;  %2847 = vmatprep.mubr.bf16.mxu1 %v4764_v51  ;;  %v4274_v21 = vld [vmem:[#allocation8 + $0x22c] ss:$16 sps:$4 sm:$0xff]   ;;  %v4275_v15 = vld [vmem:[#allocation8 + $0x8] ss:$16 sps:$4 sm:$0xff]  }
 0x194   :  { %2805 = vmatmul.mubr.bf16.vlgmr.msra.gmra.mxu0 %v4762_v50  ;;  %2848 = vmatmul.mubr.bf16.vlgmr.msra.gmra.mxu1 %v4766_v54  ;;  %v4277_v23 = vld [vmem:[#allocation8 + $0xc] ss:$16 sps:$4 sm:$0xff]   ;;  %v4278_v25 = vld [vmem:[#allocation8 + $0x208] ss:$16 sps:$4 sm:$0xff]  }
 0x195   :  { %2859 = vmatpush1.bf16.msra.mxu0 %v4233_v49  ;;  %2902 = vmatpush1.bf16.msra.mxu1 %v4236_v52  ;;  %v4280_v24 = vld [vmem:[#allocation8 + $0x20c] ss:$16 sps:$4 sm:$0xff]   ;;  %v4281_v28 = vld [vmem:[#allocation8 + $0x1e8] ss:$16 sps:$4 sm:$0xff]  }
 0x196   :  { %2890 = vmatprep.mubr.bf16.mxu0 %v4740_v53  ;;  %2933 = vmatprep.mubr.bf16.mxu1 %v4744_v56  ;;  %v4254_v53 = vld [vmem:[#allocation8 + $0x288] ss:$16 sps:$4 sm:$0xff]   ;;  %v4283_v26 = vld [vmem:[#allocation8 + $0x1ec] ss:$16 sps:$4 sm:$0xff]  }
 0x197   :  { %2860 = vmatprep.subr.bf16.mxu0 %v4241_v57  ;;  %2903 = vmatprep.subr.bf16.mxu1 %v4244_v58  ;;  %v4257_v56 = vld [vmem:[#allocation8 + $0x68] ss:$16 sps:$4 sm:$0xff]   ;;  %v4286_v27 = vld [vmem:[#allocation8 + $0x3ec] ss:$16 sps:$4 sm:$0xff]  }
 0x198   :  { %v4284_v29 = vld [vmem:[#allocation8 + $0x3e8] ss:$16 sps:$4 sm:$0xff]   ;;  %v4289_v30 = vld [vmem:[#allocation8 + $0x1cc] ss:$16 sps:$4 sm:$0xff]  }
 0x199   :  { %2861 = vmatpush1.bf16.msra.mxu0 %v4239_v61  ;;  %2904 = vmatpush1.bf16.msra.mxu1 %v4242_v62  ;;  %v4292_v31 = vld [vmem:[#allocation8 + $0x3cc] ss:$16 sps:$4 sm:$0xff]   ;;  %v4287_v32 = vld [vmem:[#allocation8 + $0x1c8] ss:$16 sps:$4 sm:$0xff]  }
 0x19a   :  { %2862 = vmatprep.subr.bf16.mxu0 %v4247_v63  ;;  %2905 = vmatprep.subr.bf16.mxu1 %v4250_v0  ;;  %v4290_v33 = vld [vmem:[#allocation8 + $0x3c8] ss:$16 sps:$4 sm:$0xff]   ;;  %v4295_v34 = vld [vmem:[#allocation8 + $0x1ac] ss:$16 sps:$4 sm:$0xff]  }
 0x19b   :  { %v4298_v35 = vld [vmem:[#allocation8 + $0x3ac] ss:$16 sps:$4 sm:$0xff]   ;;  %v4293_v36 = vld [vmem:[#allocation8 + $0x1a8] ss:$16 sps:$4 sm:$0xff]  }
 0x19c   :  { %v4296_v37 = vld [vmem:[#allocation8 + $0x3a8] ss:$16 sps:$4 sm:$0xff]   ;;  %v4301_v38 = vld [vmem:[#allocation8 + $0x18c] ss:$16 sps:$4 sm:$0xff]  }
 0x19d   :  { %2863 = vmatpush1.bf16.msra.mxu0 %v4245_v1  ;;  %2906 = vmatpush1.bf16.msra.mxu1 %v4248_v2  ;;  %v4304_v39 = vld [vmem:[#allocation8 + $0x38c] ss:$16 sps:$4 sm:$0xff]   ;;  %v4299_v40 = vld [vmem:[#allocation8 + $0x188] ss:$16 sps:$4 sm:$0xff]  }
 0x19e   :  { %2864 = vmatprep.subr.bf16.mxu0 %v4253_v3  ;;  %2907 = vmatprep.subr.bf16.mxu1 %v4256_v4  ;;  %v4302_v41 = vld [vmem:[#allocation8 + $0x388] ss:$16 sps:$4 sm:$0xff]   ;;  %v4307_v42 = vld [vmem:[#allocation8 + $0x16c] ss:$16 sps:$4 sm:$0xff]  }
 0x19f   :  { %v4310_v43 = vld [vmem:[#allocation8 + $0x36c] ss:$16 sps:$4 sm:$0xff]   ;;  %v4305_v44 = vld [vmem:[#allocation8 + $0x168] ss:$16 sps:$4 sm:$0xff]  }
 0x1a0   :  { %v4308_v45 = vld [vmem:[#allocation8 + $0x368] ss:$16 sps:$4 sm:$0xff]   ;;  %v4313_v59 = vld [vmem:[#allocation8 + $0x14c] ss:$16 sps:$4 sm:$0xff]  }
 0x1a1   :  { %2865 = vmatpush1.bf16.msra.mxu0 %v4251_v5  ;;  %2908 = vmatpush1.bf16.msra.mxu1 %v4254_v53  ;;  %v4316_v46 = vld [vmem:[#allocation8 + $0x34c] ss:$16 sps:$4 sm:$0xff]   ;;  %v4311_v47 = vld [vmem:[#allocation8 + $0x148] ss:$16 sps:$4 sm:$0xff]  }
 0x1a2   :  { %2866 = vmatprep.subr.bf16.mxu0 %v4259_v6  ;;  %2909 = vmatprep.subr.bf16.mxu1 %v4262_v7  ;;  %v4314_v49 = vld [vmem:[#allocation8 + $0x348] ss:$16 sps:$4 sm:$0xff]   ;;  %v4319_v52 = vld [vmem:[#allocation8 + $0x12c] ss:$16 sps:$4 sm:$0xff]  }
 0x1a3   :  { %v4322_v57 = vld [vmem:[#allocation8 + $0x32c] ss:$16 sps:$4 sm:$0xff]   ;;  %v4317_v58 = vld [vmem:[#allocation8 + $0x128] ss:$16 sps:$4 sm:$0xff]  }
 0x1a4   :  { %v4320_v61 = vld [vmem:[#allocation8 + $0x328] ss:$16 sps:$4 sm:$0xff]   ;;  %v4325_v62 = vld [vmem:[#allocation8 + $0x10c] ss:$16 sps:$4 sm:$0xff]  }
 0x1a5   :  { %2867 = vmatpush1.bf16.msra.mxu0 %v4257_v56  ;;  %2910 = vmatpush1.bf16.msra.mxu1 %v4260_v8  ;;  %v4328_v63 = vld [vmem:[#allocation8 + $0x30c] ss:$16 sps:$4 sm:$0xff]   ;;  %v4323_v0 = vld [vmem:[#allocation8 + $0x108] ss:$16 sps:$4 sm:$0xff]  }
 0x1a6   :  { %2868 = vmatprep.subr.bf16.mxu0 %v4265_v9  ;;  %2911 = vmatprep.subr.bf16.mxu1 %v4268_v10  ;;  %v4326_v1 = vld [vmem:[#allocation8 + $0x308] ss:$16 sps:$4 sm:$0xff]   ;;  %v4331_v2 = vld [vmem:[#allocation8 + $0x4ec] ss:$16 sps:$4 sm:$0xff]  }
 0x1a7   :  { %v4334_v3 = vld [vmem:[#allocation8 + $0x6ec] ss:$16 sps:$4 sm:$0xff]   ;;  %v4329_v4 = vld [vmem:[#allocation8 + $0x4e8] ss:$16 sps:$4 sm:$0xff]  }
 0x1a8   :  { %v4332_v5 = vld [vmem:[#allocation8 + $0x6e8] ss:$16 sps:$4 sm:$0xff]   ;;  %v4337_v53 = vld [vmem:[#allocation8 + $0x4cc] ss:$16 sps:$4 sm:$0xff]  }
 0x1a9   :  { %2869 = vmatpush1.bf16.msra.mxu0 %v4263_v11  ;;  %2912 = vmatpush1.bf16.msra.mxu1 %v4266_v19  ;;  %v4340_v6 = vld [vmem:[#allocation8 + $0x6cc] ss:$16 sps:$4 sm:$0xff]   ;;  %v4335_v7 = vld [vmem:[#allocation8 + $0x4c8] ss:$16 sps:$4 sm:$0xff]  }
 0x1aa   :  { %2870 = vmatprep.subr.bf16.mxu0 %v4271_v20  ;;  %2913 = vmatprep.subr.bf16.mxu1 %v4274_v21  ;;  %v4338_v56 = vld [vmem:[#allocation8 + $0x6c8] ss:$16 sps:$4 sm:$0xff]   ;;  %v4343_v8 = vld [vmem:[#allocation8 + $0x4ac] ss:$16 sps:$4 sm:$0xff]  }
 0x1ab   :  { %v4346_v9 = vld [vmem:[#allocation8 + $0x6ac] ss:$16 sps:$4 sm:$0xff]   ;;  %v4341_v10 = vld [vmem:[#allocation8 + $0x4a8] ss:$16 sps:$4 sm:$0xff]  }
 0x1ac   :  { %v4349_v11 = vld [vmem:[#allocation8 + $0x48c] ss:$16 sps:$4 sm:$0xff]   ;;  %v4347_v19 = vld [vmem:[#allocation8 + $0x488] ss:$16 sps:$4 sm:$0xff]  }
 0x1ad   :  { %2871 = vmatpush1.bf16.msra.mxu0 %v4269_v17  ;;  %2914 = vmatpush1.bf16.msra.mxu1 %v4272_v22  ;;  %v4355_v20 = vld [vmem:[#allocation8 + $0x46c] ss:$16 sps:$4 sm:$0xff]   ;;  %v4356_v17 = vld [vmem:[#allocation8 + $0x668] ss:$16 sps:$4 sm:$0xff]  }
 0x1ae   :  { %2872 = vmatprep.subr.bf16.mxu0 %v4277_v23  ;;  %2915 = vmatprep.subr.bf16.mxu1 %v4280_v24  ;;  %v4358_v21 = vld [vmem:[#allocation8 + $0x66c] ss:$16 sps:$4 sm:$0xff]   ;;  %v4359_v24 = vld [vmem:[#allocation8 + $0x448] ss:$16 sps:$4 sm:$0xff]  }
 0x1af   :  { %v4361_v22 = vld [vmem:[#allocation8 + $0x44c] ss:$16 sps:$4 sm:$0xff]  }
 0x1b0   :  { %v4364_v23 = vld [vmem:[#allocation8 + $0x64c] ss:$16 sps:$4 sm:$0xff]  }
 0x1b1   :  { %2873 = vmatpush1.bf16.msra.mxu0 %v4275_v15  ;;  %2916 = vmatpush1.bf16.msra.mxu1 %v4278_v25  ;;  %v4362_v15 = vld [vmem:[#allocation8 + $0x648] ss:$16 sps:$4 sm:$0xff]   ;;  %v4367_v25 = vld [vmem:[#allocation8 + $0x42c] ss:$16 sps:$4 sm:$0xff]  }
 0x1b2   :  { %2874 = vmatprep.subr.bf16.mxu0 %v4283_v26  ;;  %2917 = vmatprep.subr.bf16.mxu1 %v4286_v27  ;;  %v4370_v26 = vld [vmem:[#allocation8 + $0x62c] ss:$16 sps:$4 sm:$0xff]   ;;  %v4365_v27 = vld [vmem:[#allocation8 + $0x428] ss:$16 sps:$4 sm:$0xff]  }
 0x1b5   :  { %2875 = vmatpush2.bf16.msra.mxu0 %v4281_v28  ;;  %2918 = vmatpush2.bf16.msra.mxu1 %v4284_v29  ;;  %v4368_v28 = vld [vmem:[#allocation8 + $0x628] ss:$16 sps:$4 sm:$0xff]   ;;  %v4373_v29 = vld [vmem:[#allocation8 + $0x40c] ss:$16 sps:$4 sm:$0xff]  }
 0x1b6   :  { %2876 = vmatprep.subr.bf16.mxu0 %v4289_v30  ;;  %2919 = vmatprep.subr.bf16.mxu1 %v4292_v31  ;;  %v4376_v30 = vld [vmem:[#allocation8 + $0x60c] ss:$16 sps:$4 sm:$0xff]   ;;  %v4371_v31 = vld [vmem:[#allocation8 + $0x408] ss:$16 sps:$4 sm:$0xff]  }
 0x1b9   :  { %2877 = vmatpush2.bf16.msra.mxu0 %v4287_v32  ;;  %2920 = vmatpush2.bf16.msra.mxu1 %v4290_v33  ;;  %v4374_v32 = vld [vmem:[#allocation8 + $0x608] ss:$16 sps:$4 sm:$0xff]   ;;  %v4379_v33 = vld [vmem:[#allocation8 + $0x5ec] ss:$16 sps:$4 sm:$0xff]  }
 0x1ba   :  { %2878 = vmatprep.subr.bf16.mxu0 %v4295_v34  ;;  %2921 = vmatprep.subr.bf16.mxu1 %v4298_v35  ;;  %v4382_v34 = vld [vmem:[#allocation8 + $0x7ec] ss:$16 sps:$4 sm:$0xff]   ;;  %v4377_v35 = vld [vmem:[#allocation8 + $0x5e8] ss:$16 sps:$4 sm:$0xff]  }
 0x1bd   :  { %2879 = vmatpush2.bf16.msra.mxu0 %v4293_v36  ;;  %2922 = vmatpush2.bf16.msra.mxu1 %v4296_v37  ;;  %v4380_v36 = vld [vmem:[#allocation8 + $0x7e8] ss:$16 sps:$4 sm:$0xff]   ;;  %v4385_v37 = vld [vmem:[#allocation8 + $0x5cc] ss:$16 sps:$4 sm:$0xff]  }
 0x1be   :  { %2880 = vmatprep.subr.bf16.mxu0 %v4301_v38  ;;  %2923 = vmatprep.subr.bf16.mxu1 %v4304_v39  ;;  %v4388_v38 = vld [vmem:[#allocation8 + $0x7cc] ss:$16 sps:$4 sm:$0xff]   ;;  %v4383_v39 = vld [vmem:[#allocation8 + $0x5c8] ss:$16 sps:$4 sm:$0xff]  }
 0x1c1   :  { %2881 = vmatpush2.bf16.msra.mxu0 %v4299_v40  ;;  %2924 = vmatpush2.bf16.msra.mxu1 %v4302_v41  ;;  %v4386_v40 = vld [vmem:[#allocation8 + $0x7c8] ss:$16 sps:$4 sm:$0xff]   ;;  %v4391_v41 = vld [vmem:[#allocation8 + $0x5ac] ss:$16 sps:$4 sm:$0xff]  }
 0x1c2   :  { %2882 = vmatprep.subr.bf16.mxu0 %v4307_v42  ;;  %2925 = vmatprep.subr.bf16.mxu1 %v4310_v43  ;;  %v4394_v42 = vld [vmem:[#allocation8 + $0x7ac] ss:$16 sps:$4 sm:$0xff]   ;;  %v4389_v43 = vld [vmem:[#allocation8 + $0x5a8] ss:$16 sps:$4 sm:$0xff]  }
 0x1c5   :  { %2883 = vmatpush2.bf16.msra.mxu0 %v4305_v44  ;;  %2926 = vmatpush2.bf16.msra.mxu1 %v4308_v45  ;;  %v4392_v44 = vld [vmem:[#allocation8 + $0x7a8] ss:$16 sps:$4 sm:$0xff]   ;;  %v4397_v45 = vld [vmem:[#allocation8 + $0x58c] ss:$16 sps:$4 sm:$0xff]  }
 0x1c6   :  { %2884 = vmatprep.subr.bf16.mxu0 %v4313_v59  ;;  %2927 = vmatprep.subr.bf16.mxu1 %v4316_v46  ;;  %v4400_v59 = vld [vmem:[#allocation8 + $0x78c] ss:$16 sps:$4 sm:$0xff]   ;;  %v4395_v46 = vld [vmem:[#allocation8 + $0x588] ss:$16 sps:$4 sm:$0xff]  }
 0x1c9   :  { %2885 = vmatpush2.bf16.msra.mxu0 %v4311_v47  ;;  %2928 = vmatpush2.bf16.msra.mxu1 %v4314_v49  ;;  %v4398_v47 = vld [vmem:[#allocation8 + $0x788] ss:$16 sps:$4 sm:$0xff]   ;;  %v4403_v49 = vld [vmem:[#allocation8 + $0x56c] ss:$16 sps:$4 sm:$0xff]  }
 0x1ca   :  { %2886 = vmatprep.subr.bf16.mxu0 %v4319_v52  ;;  %2929 = vmatprep.subr.bf16.mxu1 %v4322_v57  ;;  %v4406_v52 = vld [vmem:[#allocation8 + $0x76c] ss:$16 sps:$4 sm:$0xff]   ;;  %v4401_v57 = vld [vmem:[#allocation8 + $0x568] ss:$16 sps:$4 sm:$0xff]  }
 0x1cd   :  { %2887 = vmatpush2.bf16.msra.mxu0 %v4317_v58  ;;  %2930 = vmatpush2.bf16.msra.mxu1 %v4320_v61  ;;  %v4404_v58 = vld [vmem:[#allocation8 + $0x768] ss:$16 sps:$4 sm:$0xff]   ;;  %v4409_v61 = vld [vmem:[#allocation8 + $0x54c] ss:$16 sps:$4 sm:$0xff]  }
 0x1ce   :  { %2888 = vmatprep.subr.bf16.mxu0 %v4325_v62  ;;  %2931 = vmatprep.subr.bf16.mxu1 %v4328_v63  ;;  %v4412_v62 = vld [vmem:[#allocation8 + $0x74c] ss:$16 sps:$4 sm:$0xff]   ;;  %v4407_v63 = vld [vmem:[#allocation8 + $0x548] ss:$16 sps:$4 sm:$0xff]  }
 0x1d1   :  { %2889 = vmatpush2.bf16.msra.mxu0 %v4323_v0  ;;  %2932 = vmatpush2.bf16.msra.mxu1 %v4326_v1  ;;  %v4410_v0 = vld [vmem:[#allocation8 + $0x748] ss:$16 sps:$4 sm:$0xff]   ;;  %v4415_v1 = vld [vmem:[#allocation8 + $0x52c] ss:$16 sps:$4 sm:$0xff]  }
 0x1d2   :  { %2944 = vmatprep.subr.bf16.mxu0 %v4331_v2  ;;  %2987 = vmatprep.subr.bf16.mxu1 %v4334_v3  ;;  %v4418_v2 = vld [vmem:[#allocation8 + $0x72c] ss:$16 sps:$4 sm:$0xff]   ;;  %v4413_v3 = vld [vmem:[#allocation8 + $0x528] ss:$16 sps:$4 sm:$0xff]  }
 0x1d4   :  { %2891 = vmatmul.mubr.bf16.vlgmr.msra.gmra.mxu0 %v4742_v55  ;;  %2934 = vmatmul.mubr.bf16.vlgmr.msra.gmra.mxu1 %v4746_v60  ;;  %v4344_v55 = vld [vmem:[#allocation8 + $0x6a8] ss:$16 sps:$4 sm:$0xff]   ;;  %v4352_v60 = vld [vmem:[#allocation8 + $0x68c] ss:$16 sps:$4 sm:$0xff]  }
 0x1d5   :  { %2945 = vmatpush1.bf16.msra.mxu0 %v4329_v4  ;;  %2976 = vmatprep.mubr.bf16.mxu0 %v4760_v48  ;;  %v4350_v48 = vld [vmem:[#allocation8 + $0x688] ss:$16 sps:$4 sm:$0xff]  }
 0x1d6   :  { %2988 = vmatpush1.bf16.msra.mxu1 %v4332_v5  ;;  %3019 = vmatprep.mubr.bf16.mxu1 %v4764_v51  ;;  %v4353_v51 = vld [vmem:[#allocation8 + $0x468] ss:$16 sps:$4 sm:$0xff]   ;;  %v4421_v5 = vld [vmem:[#allocation8 + $0x50c] ss:$16 sps:$4 sm:$0xff]  }
 0x1d7   :  { %2946 = vmatprep.subr.bf16.mxu0 %v4337_v53  ;;  %2989 = vmatprep.subr.bf16.mxu1 %v4340_v6  ;;  %v4416_v4 = vld [vmem:[#allocation8 + $0x728] ss:$16 sps:$4 sm:$0xff]   ;;  %v4424_v53 = vld [vmem:[#allocation8 + $0x70c] ss:$16 sps:$4 sm:$0xff]  }
 0x1d8   :  { %v4419_v6 = vld [vmem:[#allocation8 + $0x508] ss:$16 sps:$4 sm:$0xff]  }
 0x1d9   :  { %2947 = vmatpush1.bf16.msra.mxu0 %v4335_v7  ;;  %v4422_v7 = vld [vmem:[#allocation8 + $0x708] ss:$16 sps:$4 sm:$0xff]  }
 0x1da   :  { %2990 = vmatpush1.bf16.msra.mxu1 %v4338_v56  ;;  %2948 = vmatprep.subr.bf16.mxu0 %v4343_v8  ;;  %v4427_v56 = vld [vmem:[#allocation10 + $0x74] ss:$8 sps:$4 sm:$0xff]   ;;  %v4425_v8 = vld [vmem:[#allocation10 + $0x70] ss:$8 sps:$4 sm:$0xff]  }
 0x1db   :  { %2991 = vmatprep.subr.bf16.mxu1 %v4346_v9  ;;  %v4430_v9 = vld [vmem:[#allocation10 + $0x64] ss:$8 sps:$4 sm:$0xff]  }
 0x1dd   :  { %2949 = vmatpush1.bf16.msra.mxu0 %v4341_v10  ;;  %v4428_v10 = vld [vmem:[#allocation10 + $0x60] ss:$8 sps:$4 sm:$0xff]  }
 0x1de   :  { %2992 = vmatpush1.bf16.msra.mxu1 %v4344_v55  ;;  %2950 = vmatprep.subr.bf16.mxu0 %v4349_v11  ;;  %v4433_v55 = vld [vmem:[#allocation10 + $0x54] ss:$8 sps:$4 sm:$0xff]   ;;  %v4431_v11 = vld [vmem:[#allocation10 + $0x50] ss:$8 sps:$4 sm:$0xff]  }
 0x1df   :  { %2993 = vmatprep.subr.bf16.mxu1 %v4352_v60  ;;  %v4436_v60 = vld [vmem:[#allocation10 + $0x44] ss:$8 sps:$4 sm:$0xff]  }
 0x1e1   :  { %2951 = vmatpush1.bf16.msra.mxu0 %v4347_v19  ;;  %v4434_v19 = vld [vmem:[#allocation10 + $0x40] ss:$8 sps:$4 sm:$0xff]  }
 0x1e2   :  { %2994 = vmatpush1.bf16.msra.mxu1 %v4350_v48  ;;  %2952 = vmatprep.subr.bf16.mxu0 %v4355_v20  ;;  %v4473_v48 = vld [vmem:[#allocation10 + $0x170] ss:$8 sps:$4 sm:$0xff]   ;;  %v4475_v20 = vld [vmem:[#allocation10 + $0x174] ss:$8 sps:$4 sm:$0xff]  }
 0x1e3   :  { %2995 = vmatprep.subr.bf16.mxu1 %v4358_v21  ;;  %v4439_v21 = vld [vmem:[#allocation10 + $0x34] ss:$8 sps:$4 sm:$0xff]  }
 0x1e5   :  { %2953 = vmatpush1.bf16.msra.mxu0 %v4353_v51  ;;  %v4478_v51 = vld [vmem:[#allocation10 + $0x164] ss:$8 sps:$4 sm:$0xff]  }
 0x1e6   :  { %2996 = vmatpush1.bf16.msra.mxu1 %v4356_v17  ;;  %2954 = vmatprep.subr.bf16.mxu0 %v4361_v22  ;;  %v4481_v17 = vld [vmem:[#allocation10 + $0x154] ss:$8 sps:$4 sm:$0xff]   ;;  %v4442_v22 = vld [vmem:[#allocation10 + $0x24] ss:$8 sps:$4 sm:$0xff]  }
 0x1e7   :  { %2997 = vmatprep.subr.bf16.mxu1 %v4364_v23  ;;  %v4479_v23 = vld [vmem:[#allocation10 + $0x150] ss:$8 sps:$4 sm:$0xff]  }
 0x1e9   :  { %2955 = vmatpush1.bf16.msra.mxu0 %v4359_v24  ;;  %v4440_v24 = vld [vmem:[#allocation10 + $0x20] ss:$8 sps:$4 sm:$0xff]  }
 0x1ea   :  { %2998 = vmatpush1.bf16.msra.mxu1 %v4362_v15  ;;  %2956 = vmatprep.subr.bf16.mxu0 %v4367_v25  ;;  %v4484_v15 = vld [vmem:[#allocation10 + $0x144] ss:$8 sps:$4 sm:$0xff]   ;;  %v4445_v25 = vld [vmem:[#allocation10 + $0x14] ss:$8 sps:$4 sm:$0xff]  }
 0x1eb   :  { %2999 = vmatprep.subr.bf16.mxu1 %v4370_v26  ;;  %v4482_v26 = vld [vmem:[#allocation10 + $0x140] ss:$8 sps:$4 sm:$0xff]  }
 0x1ed   :  { %2957 = vmatpush1.bf16.msra.mxu0 %v4365_v27  ;;  %v4443_v27 = vld [vmem:[#allocation10 + $0x10] ss:$8 sps:$4 sm:$0xff]  }
 0x1ee   :  { %3000 = vmatpush1.bf16.msra.mxu1 %v4368_v28  ;;  %2958 = vmatprep.subr.bf16.mxu0 %v4373_v29  ;;  %v4487_v28 = vld [vmem:[#allocation10 + $0x134] ss:$8 sps:$4 sm:$0xff]   ;;  %v4448_v29 = vld [vmem:[#allocation10 + $0x4] ss:$8 sps:$4 sm:$0xff]  }
 0x1ef   :  { %3001 = vmatprep.subr.bf16.mxu1 %v4376_v30  ;;  %v4485_v30 = vld [vmem:[#allocation10 + $0x130] ss:$8 sps:$4 sm:$0xff]  }
 0x1f1   :  { %2959 = vmatpush1.bf16.msra.mxu0 %v4371_v31  ;;  %v4446_v31 = vld [vmem:[#allocation10] ss:$8 sps:$4 sm:$0xff]  }
 0x1f2   :  { %3002 = vmatpush1.bf16.msra.mxu1 %v4374_v32  ;;  %2960 = vmatprep.subr.bf16.mxu0 %v4379_v33  ;;  %v4490_v32 = vld [vmem:[#allocation10 + $0x124] ss:$8 sps:$4 sm:$0xff]   ;;  %v4451_v33 = vld [vmem:[#allocation10 + $0xf4] ss:$8 sps:$4 sm:$0xff]  }
 0x1f3   :  { %3003 = vmatprep.subr.bf16.mxu1 %v4382_v34  ;;  %v4488_v34 = vld [vmem:[#allocation10 + $0x120] ss:$8 sps:$4 sm:$0xff]  }
 0x1f5   :  { %2961 = vmatpush2.bf16.msra.mxu0 %v4377_v35  ;;  %v4449_v35 = vld [vmem:[#allocation10 + $0xf0] ss:$8 sps:$4 sm:$0xff]  }
 0x1f6   :  { %3004 = vmatpush2.bf16.msra.mxu1 %v4380_v36  ;;  %2962 = vmatprep.subr.bf16.mxu0 %v4385_v37  ;;  %v4493_v36 = vld [vmem:[#allocation10 + $0x114] ss:$8 sps:$4 sm:$0xff]   ;;  %v4454_v37 = vld [vmem:[#allocation10 + $0xe4] ss:$8 sps:$4 sm:$0xff]  }
 0x1f7   :  { %3005 = vmatprep.subr.bf16.mxu1 %v4388_v38  ;;  %v4491_v38 = vld [vmem:[#allocation10 + $0x110] ss:$8 sps:$4 sm:$0xff]  }
 0x1f9   :  { %2963 = vmatpush2.bf16.msra.mxu0 %v4383_v39  ;;  %v4452_v39 = vld [vmem:[#allocation10 + $0xe0] ss:$8 sps:$4 sm:$0xff]  }
 0x1fa   :  { %3006 = vmatpush2.bf16.msra.mxu1 %v4386_v40  ;;  %2964 = vmatprep.subr.bf16.mxu0 %v4391_v41  ;;  %v4496_v40 = vld [vmem:[#allocation10 + $0x104] ss:$8 sps:$4 sm:$0xff]   ;;  %v4457_v41 = vld [vmem:[#allocation10 + $0xd4] ss:$8 sps:$4 sm:$0xff]  }
 0x1fb   :  { %3007 = vmatprep.subr.bf16.mxu1 %v4394_v42  ;;  %v4494_v42 = vld [vmem:[#allocation10 + $0x100] ss:$8 sps:$4 sm:$0xff]  }
 0x1fd   :  { %2965 = vmatpush2.bf16.msra.mxu0 %v4389_v43  ;;  %v4455_v43 = vld [vmem:[#allocation10 + $0xd0] ss:$8 sps:$4 sm:$0xff]  }
 0x1fe   :  { %3008 = vmatpush2.bf16.msra.mxu1 %v4392_v44  ;;  %2966 = vmatprep.subr.bf16.mxu0 %v4397_v45  ;;  %v4499_v44 = vld [vmem:[#allocation10 + $0x1f4] ss:$8 sps:$4 sm:$0xff]   ;;  %v4460_v45 = vld [vmem:[#allocation10 + $0xc4] ss:$8 sps:$4 sm:$0xff]  }
 0x1ff   :  { %3009 = vmatprep.subr.bf16.mxu1 %v4400_v59  ;;  %v4497_v59 = vld [vmem:[#allocation10 + $0x1f0] ss:$8 sps:$4 sm:$0xff]  }
 0x201   :  { %2967 = vmatpush2.bf16.msra.mxu0 %v4395_v46  ;;  %v4458_v46 = vld [vmem:[#allocation10 + $0xc0] ss:$8 sps:$4 sm:$0xff]  }
 0x202   :  { %3010 = vmatpush2.bf16.msra.mxu1 %v4398_v47  ;;  %2968 = vmatprep.subr.bf16.mxu0 %v4403_v49  ;;  %v4502_v47 = vld [vmem:[#allocation10 + $0x1e4] ss:$8 sps:$4 sm:$0xff]   ;;  %v4463_v49 = vld [vmem:[#allocation10 + $0xb4] ss:$8 sps:$4 sm:$0xff]  }
 0x203   :  { %3011 = vmatprep.subr.bf16.mxu1 %v4406_v52  ;;  %v4500_v52 = vld [vmem:[#allocation10 + $0x1e0] ss:$8 sps:$4 sm:$0xff]  }
 0x205   :  { %2969 = vmatpush2.bf16.msra.mxu0 %v4401_v57  ;;  %v4461_v57 = vld [vmem:[#allocation10 + $0xb0] ss:$8 sps:$4 sm:$0xff]  }
 0x206   :  { %3012 = vmatpush2.bf16.msra.mxu1 %v4404_v58  ;;  %2970 = vmatprep.subr.bf16.mxu0 %v4409_v61  ;;  %v4505_v58 = vld [vmem:[#allocation10 + $0x1d4] ss:$8 sps:$4 sm:$0xff]   ;;  %v4466_v61 = vld [vmem:[#allocation10 + $0xa4] ss:$8 sps:$4 sm:$0xff]  }
 0x207   :  { %3013 = vmatprep.subr.bf16.mxu1 %v4412_v62  ;;  %v4503_v62 = vld [vmem:[#allocation10 + $0x1d0] ss:$8 sps:$4 sm:$0xff]  }
 0x209   :  { %2971 = vmatpush2.bf16.msra.mxu0 %v4407_v63  ;;  %v4464_v63 = vld [vmem:[#allocation10 + $0xa0] ss:$8 sps:$4 sm:$0xff]  }
 0x20a   :  { %3014 = vmatpush2.bf16.msra.mxu1 %v4410_v0  ;;  %2972 = vmatprep.subr.bf16.mxu0 %v4415_v1  ;;  %v4508_v0 = vld [vmem:[#allocation10 + $0x1c4] ss:$8 sps:$4 sm:$0xff]  }
 0x20b   :  { %3015 = vmatprep.subr.bf16.mxu1 %v4418_v2  ;;  %v4469_v2 = vld [vmem:[#allocation10 + $0x94] ss:$8 sps:$4 sm:$0xff]  }
 0x20d   :  { %2973 = vmatpush2.bf16.msra.mxu0 %v4413_v3 }
 0x20e   :  { %3016 = vmatpush2.bf16.msra.mxu1 %v4416_v4  ;;  %2974 = vmatprep.subr.bf16.mxu0 %v4421_v5  ;;  %v4506_v4 = vld [vmem:[#allocation10 + $0x1c0] ss:$8 sps:$4 sm:$0xff]   ;;  %v4783_v5 = vld [vmem:[%s4815_s4] sm:$0xf] }
 0x20f   :  { %3017 = vmatprep.subr.bf16.mxu1 %v4424_v53  ;;  %v4467_v53 = vld [vmem:[#allocation10 + $0x90] ss:$8 sps:$4 sm:$0xff]  }
 0x211   :  { %2975 = vmatpush2.bf16.msra.mxu0 %v4419_v6 }
 0x212   :  { %3018 = vmatpush2.bf16.msra.mxu1 %v4422_v7  ;;  %3446 = vmatprep.subr.bf16.mxu0 %v4427_v56  ;;  %v4472_v7 = vld [vmem:[#allocation10 + $0x84] ss:$8 sps:$4 sm:$0xff]  }
 0x213   :  { %3489 = vmatprep.subr.bf16.mxu1 %v4475_v20 }
 0x214   :  { %2977 = vmatmul.mubr.bf16.vlgmr.msra.gmra.mxu0 %v4762_v50  ;;  %v4476_v50 = vld [vmem:[#allocation10 + $0x160] ss:$8 sps:$4 sm:$0xff]   ;;  %v2720_v1 = vpop.f32.mrf.mxu0  ;;  %v2763_v3 = vpop.f32.mrf.mxu1 }
 0x215   :  { %3020 = vmatmul.mubr.bf16.vlgmr.msra.gmra.mxu1 %v4766_v54  ;;  %3447 = vmatpush1.bf16.msra.mxu0 %v4425_v8  ;;  %v4437_v54 = vld [vmem:[#allocation10 + $0x30] ss:$8 sps:$4 sm:$0xff]   ;;  %v1389_v8 = vrot.slane %v4783_v5, %v4724_v14 }
 0x216   :  { %3448 = vmatprep.subr.bf16.mxu0 %v4430_v9  ;;  %3490 = vmatpush1.bf16.msra.mxu1 %v4473_v48  ;;  %v2722_v6 = vpop.f32.mrf.mxu0  ;;  %v2765_v56 = vpop.f32.mrf.mxu1  ;;  %v1393_v9 = vrot.slane %v4783_v5, %v4721_v13 }
 0x217   :  { %3491 = vmatprep.subr.bf16.mxu1 %v4478_v51 }
 0x219   :  { %3449 = vmatpush1.bf16.msra.mxu0 %v4428_v10  ;;  %v4470_v10 = vld [vmem:[#allocation10 + $0x80] ss:$8 sps:$4 sm:$0xff]  }
 0x21a   :  { %3450 = vmatprep.subr.bf16.mxu0 %v4433_v55  ;;  %3492 = vmatpush1.bf16.msra.mxu1 %v4476_v50  ;;  %v2724_v55 = vpop.f32.mrf.mxu0 }
 0x21b   :  { %3493 = vmatprep.subr.bf16.mxu1 %v4481_v17  ;;  %v2725_v20 = vadd.f32 %v2724_v55, %v1389_v8 }
 0x21c   :  { %v2726_v48 = vpop.f32.mrf.mxu0 }
 0x21d   :  { %3451 = vmatpush1.bf16.msra.mxu0 %v4431_v11  ;;  %v2767_v11 = vpop.f32.mrf.mxu1  ;;  %v2727_v17 = vadd.f32 %v2726_v48, %v1393_v9 }
 0x21e   :  { %3452 = vmatprep.subr.bf16.mxu0 %v4436_v60  ;;  %3494 = vmatpush1.bf16.msra.mxu1 %v4479_v23  ;;  %v2721_v60 = vadd.f32 %v2720_v1, %v1389_v8 }
 0x21f   :  { %3495 = vmatprep.subr.bf16.mxu1 %v4484_v15  ;;  %v4511_v15 = vld [vmem:[#allocation10 + $0x1b4] ss:$8 sps:$4 sm:$0xff]  }
 0x220   :  { %v2764_v51 = vadd.f32 %v2763_v3, %v2721_v60 }
 0x221   :  { %3453 = vmatpush1.bf16.msra.mxu0 %v4434_v19  ;;  %v2723_v19 = vadd.f32 %v2722_v6, %v1393_v9 }
 0x222   :  { %3454 = vmatprep.subr.bf16.mxu0 %v4439_v21  ;;  %3496 = vmatpush1.bf16.msra.mxu1 %v4482_v26  ;;  %v2769_v21 = vpop.f32.mrf.mxu1 }
 0x223   :  { %3497 = vmatprep.subr.bf16.mxu1 %v4487_v28  ;;  %v4509_v28 = vld [vmem:[#allocation10 + $0x1b0] ss:$8 sps:$4 sm:$0xff]  }
 0x225   :  { %3455 = vmatpush1.bf16.msra.mxu0 %v4437_v54  ;;  %v2766_v54 = vadd.f32 %v2765_v56, %v2723_v19 }
 0x226   :  { %3456 = vmatprep.subr.bf16.mxu0 %v4442_v22  ;;  %3498 = vmatpush1.bf16.msra.mxu1 %v4485_v30  ;;  %v2770_v30 = vadd.f32 %v2769_v21, %v2727_v17 }
 0x227   :  { %3499 = vmatprep.subr.bf16.mxu1 %v4490_v32 }
 0x229   :  { %3457 = vmatpush1.bf16.msra.mxu0 %v4440_v24 }
 0x22a   :  { %3458 = vmatprep.subr.bf16.mxu0 %v4445_v25  ;;  %3500 = vmatpush1.bf16.msra.mxu1 %v4488_v34  ;;  %v2768_v25 = vadd.f32 %v2767_v11, %v2725_v20 }
 0x22b   :  { %3501 = vmatprep.subr.bf16.mxu1 %v4493_v36  ;;  %v4514_v36 = vld [vmem:[#allocation10 + $0x1a4] ss:$8 sps:$4 sm:$0xff]  }
 0x22d   :  { %3459 = vmatpush1.bf16.msra.mxu0 %v4443_v27 }
 0x22e   :  { %3460 = vmatprep.subr.bf16.mxu0 %v4448_v29  ;;  %3502 = vmatpush1.bf16.msra.mxu1 %v4491_v38 }
 0x22f   :  { %3503 = vmatprep.subr.bf16.mxu1 %v4496_v40 }
 0x231   :  { %3461 = vmatpush1.bf16.msra.mxu0 %v4446_v31 }
 0x232   :  { %3462 = vmatprep.subr.bf16.mxu0 %v4451_v33  ;;  %3504 = vmatpush1.bf16.msra.mxu1 %v4494_v42 }
 0x233   :  { %3505 = vmatprep.subr.bf16.mxu1 %v4499_v44 }
 0x235   :  { %3463 = vmatpush2.bf16.msra.mxu0 %v4449_v35 }
 0x236   :  { %3464 = vmatprep.subr.bf16.mxu0 %v4454_v37  ;;  %3506 = vmatpush2.bf16.msra.mxu1 %v4497_v59 }
 0x237   :  { %3507 = vmatprep.subr.bf16.mxu1 %v4502_v47 }
 0x239   :  { %3465 = vmatpush2.bf16.msra.mxu0 %v4452_v39  ;;  %v4512_v39 = vld [vmem:[#allocation10 + $0x1a0] ss:$8 sps:$4 sm:$0xff]  }
 0x23a   :  { %3466 = vmatprep.subr.bf16.mxu0 %v4457_v41  ;;  %3508 = vmatpush2.bf16.msra.mxu1 %v4500_v52 }
 0x23b   :  { %3509 = vmatprep.subr.bf16.mxu1 %v4505_v58  ;;  %v4520_v58 = vld [vmem:[#allocation10 + $0x184] ss:$8 sps:$4 sm:$0xff]  }
 0x23d   :  { %3467 = vmatpush2.bf16.msra.mxu0 %v4455_v43 }
 0x23e   :  { %3468 = vmatprep.subr.bf16.mxu0 %v4460_v45  ;;  %3510 = vmatpush2.bf16.msra.mxu1 %v4503_v62  ;;  %v4517_v45 = vld [vmem:[#allocation10 + $0x194] ss:$8 sps:$4 sm:$0xff]  }
 0x23f   :  { %3511 = vmatprep.subr.bf16.mxu1 %v4508_v0 }
 0x241   :  { %3469 = vmatpush2.bf16.msra.mxu0 %v4458_v46  ;;  %v4515_v46 = vld [vmem:[#allocation10 + $0x190] ss:$8 sps:$4 sm:$0xff]  }
 0x242   :  { %3470 = vmatprep.subr.bf16.mxu0 %v4463_v49  ;;  %3512 = vmatpush2.bf16.msra.mxu1 %v4506_v4  ;;  %v1397_v4 = vrot.slane %v4783_v5, %v246_v18 }
 0x243   :  { %3513 = vmatprep.subr.bf16.mxu1 %v4511_v15 }
 0x245   :  { %3471 = vmatpush2.bf16.msra.mxu0 %v4461_v57  ;;  %v4518_v57 = vld [vmem:[#allocation10 + $0x180] ss:$8 sps:$4 sm:$0xff]  }
 0x246   :  { %3472 = vmatprep.subr.bf16.mxu0 %v4466_v61  ;;  %3514 = vmatpush2.bf16.msra.mxu1 %v4509_v28 }
 0x247   :  { %3515 = vmatprep.subr.bf16.mxu1 %v4514_v36 }
 0x249   :  { %3473 = vmatpush2.bf16.msra.mxu0 %v4464_v63 }
 0x24a   :  { %3474 = vmatprep.subr.bf16.mxu0 %v4469_v2  ;;  %3516 = vmatpush2.bf16.msra.mxu1 %v4512_v39  ;;  %v3114_v39 = vld [vmem:[%s4817_s6] sm:$0x3] }
 0x24b   :  { %3517 = vmatprep.subr.bf16.mxu1 %v4517_v45 }
 0x24d   :  { %3475 = vmatpush2.bf16.msra.mxu0 %v4467_v53  ;;  %v1401_v53 = vrot.slane %v4783_v5, %v250_v16 }
 0x24e   :  { %3476 = vmatprep.subr.bf16.mxu0 %v4472_v7  ;;  %3518 = vmatpush2.bf16.msra.mxu1 %v4515_v46 }
 0x24f   :  { %3519 = vmatprep.subr.bf16.mxu1 %v4520_v58 }
 0x251   :  { %3477 = vmatpush2.bf16.msra.mxu0 %v4470_v10 }
 0x252   :  { %3520 = vmatpush2.bf16.msra.mxu1 %v4518_v57 }
 0x254   :  { %v2806_v50 = vpop.f32.mrf.mxu0  ;;  %v2849_v22 = vpop.f32.mrf.mxu1 }
 0x255   :  { %v2807_v23 = vadd.f32 %v2806_v50, %v2764_v51 }
 0x256   :  { %v2808_v24 = vpop.f32.mrf.mxu0  ;;  %v2851_v27 = vpop.f32.mrf.mxu1 }
 0x257   :  { %v2809_v26 = vadd.f32 %v2808_v24, %v2766_v54  ;;  %v2850_v34 = vadd.f32 %v2849_v22, %v2807_v23 }
 0x258   :  { %v2810_v29 = vpop.f32.mrf.mxu0  ;;  %v2853_v33 = vpop.f32.mrf.mxu1 }
 0x259   :  { %v2852_v31 = vadd.f32 %v2851_v27, %v2809_v26  ;;  %v2811_v32 = vadd.f32 %v2810_v29, %v2768_v25  ;;  %v3030_v44 = vmul.f32 0.2, %v2850_v34 }
 0x25a   :  { %v2812_v35 = vpop.f32.mrf.mxu0  ;;  %v2855_v40 = vpop.f32.mrf.mxu1 }
 0x25b   :  { %v2854_v37 = vadd.f32 %v2853_v33, %v2811_v32  ;;  %v2813_v38 = vadd.f32 %v2812_v35, %v2770_v30  ;;  %v3031_v41 = vmul.f32 0.2, %v2852_v31  ;;  %v3038_v61 = vmax.f32 %v2850_v34, %v3030_v44 }
 0x25d   :  { %v3034_v42 = vmul.f32 0.2, %v2854_v37  ;;  %v2856_v43 = vadd.f32 %v2855_v40, %v2813_v38  ;;  %v3039_v49 = vmax.f32 %v2852_v31, %v3031_v41  ;;  %v3119_v41 = vrot.slane %v3114_v39, %v4724_v14 }
 0x25f   :  { %v3035_v59 = vmul.f32 0.2, %v2856_v43  ;;  %v3042_v47 = vmax.f32 %v2854_v37, %v3034_v42  ;;  %v3123_v42 = vrot.slane %v3114_v39, %v4721_v13 }
 0x261   :  { %v3043_v52 = vmax.f32 %v2856_v43, %v3035_v59  ;;  %v3046_v63 = vpack.c.bf16 %v3042_v47, %v3038_v61 }
 0x263   :  { %v3047_v62 = vpack.c.bf16 %v3043_v52, %v3039_v49  ;;  %v3540_v49 = vld [vmem:[%s4818_s7] sm:$0x3] }
 0x265   :  { %3478 = vmatprep.mubr.bf16.mxu0 %v3047_v62 }
 0x266   :  { %3479 = vmatmul.mubr.bf16.vlgmr.msra.gmra.mxu0 %v3046_v63 }
 0x294   :  { %v2892_v0 = vpop.f32.mrf.mxu0  ;;  %v2935_v1 = vpop.f32.mrf.mxu1 }
 0x295   :  { %v2893_v56 = vadd.f32 %v2892_v0, %v1397_v4  ;;  %v3545_v0 = vrot.slane %v3540_v49, %v4724_v14  ;;  %v4029_v14 = vld [vmem:[#allocation2] ss:$0 sm:$0xff] }
 0x296   :  { %v2894_v2 = vpop.f32.mrf.mxu0  ;;  %v2937_v3 = vpop.f32.mrf.mxu1 }
 0x297   :  { %v2895_v8 = vadd.f32 %v2894_v2, %v1401_v53  ;;  %v2936_v11 = vadd.f32 %v2935_v1, %v2893_v56 }
 0x298   :  { %v2896_v6 = vpop.f32.mrf.mxu0  ;;  %v2939_v7 = vpop.f32.mrf.mxu1 }
 0x299   :  { %v2897_v10 = vadd.f32 %v2896_v6, %v1397_v4  ;;  %v2938_v19 = vadd.f32 %v2937_v3, %v2895_v8  ;;  %v3549_v4 = vrot.slane %v3540_v49, %v4721_v13 }
 0x29a   :  { %v2898_v9 = vpop.f32.mrf.mxu0  ;;  %v2941_v55 = vpop.f32.mrf.mxu1 }
 0x29b   :  { %v2899_v48 = vadd.f32 %v2898_v9, %v1401_v53  ;;  %v2940_v50 = vadd.f32 %v2939_v7, %v2897_v10 }
 0x29d   :  { %v2942_v17 = vadd.f32 %v2941_v55, %v2899_v48 }
 0x2d4   :  { %v2978_v60 = vpop.f32.mrf.mxu0 }
 0x2d5   :  { %v3021_v20 = vpop.f32.mrf.mxu1  ;;  %v2979_v21 = vadd.f32 %v2978_v60, %v2936_v11 }
 0x2d6   :  { %v2980_v51 = vpop.f32.mrf.mxu0 }
 0x2d7   :  { %v2981_v18 = vadd.f32 %v2980_v51, %v2938_v19  ;;  %v3023_v54 = vpop.f32.mrf.mxu1  ;;  %v3022_v23 = vadd.f32 %v3021_v20, %v2979_v21 }
 0x2d8   :  { %v2982_v12 = vpop.f32.mrf.mxu0 }
 0x2d9   :  { %v3024_v16 = vadd.f32 %v3023_v54, %v2981_v18  ;;  %v2983_v5 = vadd.f32 %v2982_v12, %v2940_v50  ;;  %v3025_v22 = vpop.f32.mrf.mxu1  ;;  %v3032_v30 = vmul.f32 0.2, %v3022_v23 }
 0x2da   :  { %v2984_v24 = vpop.f32.mrf.mxu0 }
 0x2db   :  { %v3026_v15 = vadd.f32 %v3025_v22, %v2983_v5  ;;  %v2985_v25 = vadd.f32 %v2984_v24, %v2942_v17  ;;  %v3027_v26 = vpop.f32.mrf.mxu1  ;;  %v3033_v27 = vmul.f32 0.2, %v3024_v16  ;;  %v3040_v35 = vmax.f32 %v3022_v23, %v3032_v30 }
 0x2dd   :  { %v3036_v28 = vmul.f32 0.2, %v3026_v15  ;;  %v3028_v29 = vadd.f32 %v3027_v26, %v2985_v25  ;;  %v3041_v33 = vmax.f32 %v3024_v16, %v3033_v27 }
 0x2df   :  { %v3037_v31 = vmul.f32 0.2, %v3028_v29  ;;  %v3044_v32 = vmax.f32 %v3026_v15, %v3036_v28 }
 0x2e1   :  { %v3045_v34 = vmax.f32 %v3028_v29, %v3037_v31  ;;  %v3048_v37 = vpack.c.bf16 %v3044_v32, %v3040_v35 }
 0x2e3   :  { %v3049_v36 = vpack.c.bf16 %v3045_v34, %v3041_v33 }
 0x2e5   :  { %3521 = vmatprep.mubr.bf16.mxu1 %v3049_v36 }
 0x2e6   :  { %3522 = vmatmul.mubr.bf16.vlgmr.msra.gmra.mxu1 %v3048_v37 }
 0x326   :  { %v3480_v38 = vpop.f32.mrf.mxu0 }
 0x327   :  { %v3481_v44 = vadd.f32 %v3480_v38, %v3119_v41 }
 0x328   :  { %v3482_v40 = vpop.f32.mrf.mxu0 }
 0x329   :  { %v3483_v59 = vadd.f32 %v3482_v40, %v3123_v42 }
 0x32a   :  { %v3484_v43 = vpop.f32.mrf.mxu0 }
 0x32b   :  { %v3485_v57 = vadd.f32 %v3484_v43, %v3119_v41 }
 0x32c   :  { %v3486_v46 = vpop.f32.mrf.mxu0 }
 0x32d   :  { %v3487_v62 = vadd.f32 %v3486_v46, %v3123_v42 }
 0x3a6   :  { %v3523_v45 = vpop.f32.mrf.mxu1 }
 0x3a7   :  { %v3524_v47 = vadd.f32 %v3523_v45, %v3481_v44 }
 0x3a8   :  { %v3525_v52 = vpop.f32.mrf.mxu1 }
 0x3a9   :  { %v3532_v58 = vmul.f32 0.2, %v3524_v47  ;;  %v3526_v61 = vadd.f32 %v3525_v52, %v3483_v59 }
 0x3aa   :  { %v3527_v63 = vpop.f32.mrf.mxu1 }
 0x3ab   :  { %v3536_v1 = vmax.f32 %v3524_v47, %v3532_v58  ;;  %v3533_v2 = vmul.f32 0.2, %v3526_v61  ;;  %v3528_v3 = vadd.f32 %v3527_v63, %v3485_v57 }
 0x3ac   :  { %v3529_v53 = vpop.f32.mrf.mxu1 }
 0x3ad   :  { %v3537_v6 = vmax.f32 %v3526_v61, %v3533_v2  ;;  %v3534_v7 = vmul.f32 0.2, %v3528_v3  ;;  %v3530_v56 = vadd.f32 %v3529_v53, %v3487_v62  ;;  %v3552_v10 = vmul.f32 %v3545_v0, %v3536_v1 }
 0x3af   :  { %v3538_v8 = vmax.f32 %v3528_v3, %v3534_v7  ;;  %v3535_v9 = vmul.f32 0.2, %v3530_v56  ;;  %v3553_v55 = vmul.f32 %v3549_v4, %v3537_v6 }
 0x3b1   :  { %v3539_v11 = vmax.f32 %v3530_v56, %v3535_v9  ;;  %v3556_v60 = vadd.f32 %v3553_v55, %v3552_v10  ;;  %v3554_v19 = vmul.f32 %v3545_v0, %v3538_v8 }
 0x3b3   :  { %3557 = vadd.xlane.f32.xlu0 %v3556_v60  ;;  %v3555_v48 = vmul.f32 %v3549_v4, %v3539_v11 }
 0x3b5   :  { %v3559_v20 = vadd.f32 %v3555_v48, %v3554_v19 }
 0x3b7   :  { %3560 = vadd.xlane.f32.xlu0 %v3559_v20 }
 0x43c   :  { %v3558_v21 = vpop.xlane.xlu0 %3557 }
 0x43d   :  { %v3569_v51 = vadd.f32 %v4029_v14, %v3558_v21 }
 0x43f   :  { %3572 = vst.msk [vmem:[%s4820_s9] sm:$0xff] %vm3571_vm0, %v3569_v51 }
 0x440   :  { %v3561_v13 = vpop.xlane.xlu0 %3560 }
 0x441   :  { %v3570_v50 = vadd.f32 %v4029_v14, %v3561_v13 }
 0x443   :  { %3573 = vst.msk [vmem:[%s4820_s9 + $0x8] sm:$0xff] %vm3571_vm0, %v3570_v50 }
 0x444   :  { %3578 = vsyncpa [#allocation4], 1 }
 0x445   :  { %3579 = vsyncpa [#allocation6], 1 }
 0x446   :  { %3580 = vsyncpa [#allocation9], 1 }

</bundles_post_ra>
